<compile_context>
chip_gen: v7x
topology: tpu7x:2x2x1
jax: 0.10.0
libtpu: 0.0.40
codegen_flags: <defaults>
</compile_context>

<pallas_src>
import jax
import jax.numpy as jnp
from jax import lax
from jax.experimental import pallas as pl
from jax.experimental.pallas import tpu as pltpu

# ----------------------------- fixed geometry ------------------------------
H_IN = 28            # input spatial size
KH = KW = 3          # conv kernel
C1 = 16              # conv1 out channels
C2 = 32              # conv2 out channels
P1 = 13              # pooled1 spatial (28 -> 26 -> 13)
P2 = 5               # pooled2 spatial (11 -> 5, floor)
NCLS = 10            # classes
NPAD = 128           # lane-dense logits width (classes live in lanes 0..9)
L1 = P1 * C1         # 208 : pooled1 row width  (w * C1 + ci)
L2 = P2 * C2         # 160 : pooled2 row width  (w * C2 + co)
K1 = KH * H_IN       # 84  : conv1 contraction (kh merged into K)
RPI = 8              # rows per image per parity block (7/6 valid + pad)
BT = 8               # batch tile (v5e-safe; 16 recommended on v6e/v7x)


# ---------------------------------------------------------------------------
# Trace-time layout plumbing (plain JAX, runs once per call outside the kernel)
# ---------------------------------------------------------------------------
def _build_conv1_lhs(x_nchw):
    """x (B,1,28,28) -> (2_pr, 2_tpar, B*8, 84) bf16.

    Row (b*8 + m) of block [pr, tpar] is the concatenation over kh of input
    rows 2*t + pr + kh, where t = 2m (tpar=0, m=0..6) or t = 2m+1 (tpar=1,
    m=0..5); remaining rows are zero padding.  Multiplying by the conv1
    Toeplitz weights gives pooled1 row t (pool1-H parity pr, pool1-W parity in
    the weight columns), already in even/odd-row order for conv2's pool2-H.
    """
    B = x_nchw.shape[0]
    img = x_nchw[:, 0]                                        # (B, 28, 28)
    pr_blocks = []
    for pr in range(2):
        t_blocks = []
        for tpar in range(2):
            nval = 7 if tpar == 0 else 6
            t = 2 * jnp.arange(nval) + tpar                   # pooled1 rows
            taps = [img[:, 2 * t + pr + kh, :] for kh in range(KH)]
            blk = jnp.concatenate(taps, axis=-1)              # (B, nval, 84)
            blk = jnp.pad(blk, ((0, 0), (0, RPI - nval), (0, 0)))
            t_blocks.append(blk)                              # (B, 8, 84)
        pr_blocks.append(jnp.stack(t_blocks, axis=0))         # (2, B, 8, 84)
    x1 = jnp.stack(pr_blocks, axis=0)                         # (2, 2, B, 8, 84)
    return x1.reshape(2, 2, B * RPI, K1).astype(jnp.bfloat16)


def _build_conv1_weights(w1):
    """w1 (16,1,3,3) OIHW -> (84, 416) bf16, cols = [pc*208 + j*16 + co].

    W1[kh*28 + w, pc*208 + j*16 + co] = w1[co,0,kh, w-(2j+pc)]  (0 when the kw
    tap is out of range).  Row r of the conv1 LHS times W1 gives conv1
    responses at spatial columns 2j+pc for every pooled column j.
    """
    wi = jnp.arange(H_IN)[:, None, None]
    jj = jnp.arange(P1)[None, :, None]
    kw = jnp.arange(KW)[None, None, :]
    per_pc = []
    for pc in range(2):
        sel = (wi == 2 * jj + pc + kw).astype(w1.dtype)       # (28, 13, 3)
        per_kh = []
        for kh in range(KH):
            tap = jnp.transpose(w1[:, 0, kh, :], (1, 0))      # (3, 16) [kw, co]
            m = jnp.einsum('wjk,kc->wjc', sel, tap)           # (28, 13, 16)
            per_kh.append(m.reshape(H_IN, L1))
        per_pc.append(jnp.concatenate(per_kh, axis=0))        # (84, 208)
    return jnp.concatenate(per_pc, axis=1).astype(jnp.bfloat16)   # (84, 416)


def _build_conv2_weights(w2):
    """w2 (32,16,3,3) OIHW -> (3, 208, 320) bf16, cols = [wp*160 + j*32 + co].

    W2[kh][w*16 + ci, wp*160 + j*32 + co] = w2[co,ci,kh, w-(2j+wp)].
    """
    wi = jnp.arange(P1)[:, None, None]
    jj = jnp.arange(P2)[None, :, None]
    kw = jnp.arange(KW)[None, None, :]
    mats = []
    for kh in range(KH):
        tap = w2[:, :, kh, :]                                 # (32, 16, 3) [co,ci,kw]
        per_wp = []
        for wp in range(2):
            sel = (wi == 2 * jj + wp + kw).astype(w2.dtype)   # (13, 5, 3)
            m = jnp.einsum('wjk,oik->wijo', sel, tap)         # (13, 16, 5, 32)
            per_wp.append(m.reshape(L1, L2))
        mats.append(jnp.concatenate(per_wp, axis=1))          # (208, 320)
    return jnp.stack(mats, axis=0).astype(jnp.bfloat16)       # (3, 208, 320)


def _build_linear_weights(wl):
    """wl (10, 800) with PyTorch CHW flatten (co*25 + h*5 + w)
    -> (5, 160, 128) bf16 so that logits = sum_h pooled2_row_h @ WL[h]."""
    wl4 = wl.reshape(NCLS, C2, P2, P2)                        # [d, co, h, w]
    m = jnp.transpose(wl4, (2, 3, 1, 0)).reshape(P2, L2, NCLS)
    return jnp.pad(m, ((0, 0), (0, 0), (0, NPAD - NCLS))).astype(jnp.bfloat16)


# ---------------------------------------------------------------------------
# Fused kernel: BT images per grid step (grid axis is "parallel").
# ---------------------------------------------------------------------------
def cnn_fused_kernel(x1_ref, w1_ref, b1_ref, w2_ref, b2_ref, wl_ref, bl_ref, o_ref):
    # x1_ref: (2, 2, BT*8, 84) bf16   w1_ref: (84, 416) bf16   b1_ref: (1, 208) f32
    # w2_ref: (3, 208, 320) bf16      b2_ref: (1, 160) f32
    # wl_ref: (5, 160, 128) bf16      bl_ref: (1, 128) f32     o_ref: (BT, 128) f32
    f32 = jnp.float32
    bf16 = jnp.bfloat16
    m8 = x1_ref.shape[2]
    bt = m8 // RPI

    # ---- conv1 (kh merged into K) + ReLU + 2x2/2 max-pool -----------------
    # pool1-H = max over pr (two LHS parities), pool1-W = max over the two
    # 208-lane halves (pc folded into weight columns).  bias/ReLU commute.
    p1_blocks = []
    for tpar in range(2):                                     # even / odd pooled1 rows
        mm = jnp.dot(x1_ref[0, tpar], w1_ref[...], preferred_element_type=f32)
        mm = jnp.maximum(mm, jnp.dot(x1_ref[1, tpar], w1_ref[...],
                                     preferred_element_type=f32))
        mm = jnp.maximum(mm[:, :L1], mm[:, L1:])              # pool1-W
        p1_blocks.append(jnp.maximum(mm + b1_ref[...], 0.0))  # (BT*8, 208) f32
    p1_e, p1_o = p1_blocks

    # Shift-by-one-row views (E[m+1], O[m+1]); wraparound lands in unused rows.
    e1 = pltpu.roll(p1_e, shift=m8 - 1, axis=0)
    o1 = pltpu.roll(p1_o, shift=m8 - 1, axis=0)
    p1_e, p1_o, e1, o1 = [t.astype(bf16) for t in (p1_e, p1_o, e1, o1)]

    # ---- conv2 (pool2-W folded into wp column halves) ----------------------
    # Even conv2 rows use (E[m], O[m], E[m+1]); odd rows use (O[m], E[m+1], O[m+1]).
    a_even = jnp.dot(p1_e, w2_ref[0], preferred_element_type=f32)
    a_even = a_even + jnp.dot(p1_o, w2_ref[1], preferred_element_type=f32)
    a_even = a_even + jnp.dot(e1, w2_ref[2], preferred_element_type=f32)
    a_odd = jnp.dot(p1_o, w2_ref[0], preferred_element_type=f32)
    a_odd = a_odd + jnp.dot(e1, w2_ref[1], preferred_element_type=f32)
    a_odd = a_odd + jnp.dot(o1, w2_ref[2], preferred_element_type=f32)

    m2 = jnp.maximum(a_even, a_odd)                           # pool2-H
    m2 = jnp.maximum(m2[:, :L2], m2[:, L2:])                  # pool2-W
    g = jnp.maximum(m2 + b2_ref[...], 0.0)                    # (BT*8, 160); rows 0..4/image valid

    # ---- flatten (CHW order baked into WL) + Linear ------------------------
    g3 = g.reshape(bt, RPI, L2)
    out = None
    for h in range(P2):
        feat = g3[:, h, :].astype(bf16)                       # (BT, 160)
        t = jnp.dot(feat, wl_ref[h], preferred_element_type=f32)
        out = t if out is None else out + t
    o_ref[...] = out + bl_ref[...]                            # lane-dense (BT, 128) store


# ---------------------------------------------------------------------------
# Forward pass: trace-time layout plumbing + one fused, batch-tiled pallas_call.
# ---------------------------------------------------------------------------
def cnn_forward(x_nchw, params, block_batch=BT):
    w1, b1, w2, b2, wl, bl = params
    B = x_nchw.shape[0]
    Bp = ((B + block_batch - 1) // block_batch) * block_batch
    if Bp != B:
        x_nchw = jnp.pad(x_nchw, ((0, Bp - B), (0, 0), (0, 0), (0, 0)))

    x1 = _build_conv1_lhs(x_nchw)                  # (2, 2, Bp*8, 84) bf16
    W1 = _build_conv1_weights(w1)                  # (84, 416) bf16
    W2 = _build_conv2_weights(w2)                  # (3, 208, 320) bf16
    WL = _build_linear_weights(wl)                 # (5, 160, 128) bf16
    b1r = jnp.tile(b1, P1).reshape(1, L1)          # bias along the (w*C1+ci) lanes
    b2r = jnp.tile(b2, P2).reshape(1, L2)
    blr = jnp.pad(bl, (0, NPAD - NCLS)).reshape(1, NPAD)

    out = pl.pallas_call(
        cnn_fused_kernel,
        out_shape=jax.ShapeDtypeStruct((Bp, NPAD), jnp.float32),
        grid_spec=pltpu.PrefetchScalarGridSpec(
            num_scalar_prefetch=0,
            grid=(Bp // block_batch,),
            in_specs=[
                pl.BlockSpec((2, 2, block_batch * RPI, K1), lambda i: (0, 0, i, 0)),
                pl.BlockSpec((K1, 2 * L1), lambda i: (0, 0)),
                pl.BlockSpec((1, L1), lambda i: (0, 0)),
                pl.BlockSpec((KH, L1, 2 * L2), lambda i: (0, 0, 0)),
                pl.BlockSpec((1, L2), lambda i: (0, 0)),
                pl.BlockSpec((P2, L2, NPAD), lambda i: (0, 0, 0)),
                pl.BlockSpec((1, NPAD), lambda i: (0, 0)),
            ],
            out_specs=pl.BlockSpec((block_batch, NPAD), lambda i: (i, 0)),
        ),
        compiler_params=pltpu.CompilerParams(
            dimension_semantics=("parallel",)),    # shards batch tiles over v7x's 2 TCs
    )(x1, W1, b1r, W2, b2r, WL, blr)
    return out[:B, :NCLS]


# ---------------------------------------------------------------------------
# Pure-JAX reference (same semantics as the PyTorch module), f32 HIGHEST.
# ---------------------------------------------------------------------------
def cnn_reference(x_nchw, params):
    w1, b1, w2, b2, wl, bl = params

    def conv_block(x, w, b):
        y = lax.conv_general_dilated(
            x, w, window_strides=(1, 1), padding='VALID',
            dimension_numbers=('NCHW', 'OIHW', 'NCHW'),
            precision=lax.Precision.HIGHEST)
        y = jnp.maximum(y + b.reshape(1, -1, 1, 1), 0.0)
        return lax.reduce_window(y, -jnp.inf, lax.max,
                                 (1, 1, 2, 2), (1, 1, 2, 2), 'VALID')

    y = conv_block(x_nchw, w1, b1)
    y = conv_block(y, w2, b2)
    feat = y.reshape(y.shape[0], -1)
    return jnp.dot(feat, wl.T, precision=lax.Precision.HIGHEST) + bl


if __name__ == "__main__":
    key = jax.random.PRNGKey(0)
    kx, k1, k2, k3, k4, k5, k6 = jax.random.split(key, 7)

    B = 16   # two grid steps of BT=8 images (keeps both v7x TensorCores busy)
    # Input must be 28x28 so that 32*5*5 features reach the Linear layer.
    x = jax.random.normal(kx, (B, 1, 28, 28), jnp.float32)

    # Deterministic synthetic parameters (PyTorch layer shapes).
    w1 = 0.10 * jax.random.normal(k1, (16, 1, 3, 3), jnp.float32)
    b1 = 0.10 * jax.random.normal(k2, (16,), jnp.float32)
    w2 = 0.05 * jax.random.normal(k3, (32, 16, 3, 3), jnp.float32)
    b2 = 0.10 * jax.random.normal(k4, (32,), jnp.float32)
    wl = 0.05 * jax.random.normal(k5, (10, 32 * 5 * 5), jnp.float32)
    bl = 0.10 * jax.random.normal(k6, (10,), jnp.float32)
    params = (w1, b1, w2, b2, wl, bl)

    fwd = jax.jit(cnn_forward)
    out = jax.block_until_ready(fwd(x, params))
    assert out.shape == (B, 10), out.shape

    ref = jax.block_until_ready(jax.jit(cnn_reference)(x, params))
    err = float(jnp.max(jnp.abs(out - ref)))
    # Kernel runs weights/activations in bf16 (f32 accumulation) vs. the f32
    # HIGHEST-precision reference; deviation stays well below 3e-2 here.
    assert err < 3e-2, f"max abs err vs reference: {err}"

    print("KERNEL_OK")
</pallas_src>

<mosaic_0001>
module attributes {stable_mosaic.version = 11 : i64} {
  func.func @cnn_fused_kernel(%arg0: i32, %arg1: memref<2x2x64x84xbf16, #tpu.memory_space<vmem>>, %arg2: memref<84x416xbf16, #tpu.memory_space<vmem>>, %arg3: memref<1x208xf32, #tpu.memory_space<vmem>>, %arg4: memref<3x208x320xbf16, #tpu.memory_space<vmem>>, %arg5: memref<1x160xf32, #tpu.memory_space<vmem>>, %arg6: memref<5x160x128xbf16, #tpu.memory_space<vmem>>, %arg7: memref<1x128xf32, #tpu.memory_space<vmem>>, %arg8: memref<8x128xf32, #tpu.memory_space<vmem>>) attributes {dimension_semantics = [#tpu.dimension_semantics<parallel>], iteration_bounds = array<i64: 2>, scalar_prefetch = 0 : i64, scratch_operands = 0 : i64, tpu.core_type = #tpu.core_type<tc>, window_params = [{transform_indices = @transform_0, window_bounds = array<i64: 2, 2, 64, 84>}, {pipeline_mode = #tpu.pipeline_mode<synchronous>, transform_indices = @transform_1, window_bounds = array<i64: 84, 416>}, {pipeline_mode = #tpu.pipeline_mode<synchronous>, transform_indices = @transform_2, window_bounds = array<i64: 1, 208>}, {pipeline_mode = #tpu.pipeline_mode<synchronous>, transform_indices = @transform_3, window_bounds = array<i64: 3, 208, 320>}, {pipeline_mode = #tpu.pipeline_mode<synchronous>, transform_indices = @transform_4, window_bounds = array<i64: 1, 160>}, {pipeline_mode = #tpu.pipeline_mode<synchronous>, transform_indices = @transform_5, window_bounds = array<i64: 5, 160, 128>}, {pipeline_mode = #tpu.pipeline_mode<synchronous>, transform_indices = @transform_6, window_bounds = array<i64: 1, 128>}, {transform_indices = @transform_7, window_bounds = array<i64: 8, 128>}]} {
    %c0 = arith.constant 0 : index
    %c0_0 = arith.constant 0 : index
    %c0_1 = arith.constant 0 : index
    %c0_2 = arith.constant 0 : index
    %0 = vector.load %arg1[%c0, %c0_0, %c0_1, %c0_2] : memref<2x2x64x84xbf16, #tpu.memory_space<vmem>>, vector<1x1x64x84xbf16>
    %1 = vector.shape_cast %0 : vector<1x1x64x84xbf16> to vector<64x84xbf16>
    %c0_3 = arith.constant 0 : index
    %c0_4 = arith.constant 0 : index
    %2 = vector.load %arg2[%c0_3, %c0_4] : memref<84x416xbf16, #tpu.memory_space<vmem>>, vector<84x416xbf16>
    %cst = arith.constant dense<0.000000e+00> : vector<64x416xf32>
    %3 = tpu.matmul %1, %2, %cst {dimension_numbers = #tpu.dot_dimension_numbers<[1], [0], [0], [1], [0, 0, 1, 1], [], []>} : vector<64x84xbf16>, vector<84x416xbf16>, vector<64x416xf32> -> vector<64x416xf32>
    %c1 = arith.constant 1 : index
    %c0_5 = arith.constant 0 : index
    %c0_6 = arith.constant 0 : index
    %c0_7 = arith.constant 0 : index
    %4 = vector.load %arg1[%c1, %c0_5, %c0_6, %c0_7] : memref<2x2x64x84xbf16, #tpu.memory_space<vmem>>, vector<1x1x64x84xbf16>
    %5 = vector.shape_cast %4 : vector<1x1x64x84xbf16> to vector<64x84xbf16>
    %c0_8 = arith.constant 0 : index
    %c0_9 = arith.constant 0 : index
    %6 = vector.load %arg2[%c0_8, %c0_9] : memref<84x416xbf16, #tpu.memory_space<vmem>>, vector<84x416xbf16>
    %cst_10 = arith.constant dense<0.000000e+00> : vector<64x416xf32>
    %7 = tpu.matmul %5, %6, %cst_10 {dimension_numbers = #tpu.dot_dimension_numbers<[1], [0], [0], [1], [0, 0, 1, 1], [], []>} : vector<64x84xbf16>, vector<84x416xbf16>, vector<64x416xf32> -> vector<64x416xf32>
    %8 = arith.maximumf %3, %7 : vector<64x416xf32>
    %9 = vector.extract_strided_slice %8 {offsets = [0, 0], sizes = [64, 208], strides = [1, 1]} : vector<64x416xf32> to vector<64x208xf32>
    %10 = vector.extract_strided_slice %8 {offsets = [0, 208], sizes = [64, 208], strides = [1, 1]} : vector<64x416xf32> to vector<64x208xf32>
    %11 = arith.maximumf %9, %10 : vector<64x208xf32>
    %c0_11 = arith.constant 0 : index
    %c0_12 = arith.constant 0 : index
    %12 = vector.load %arg3[%c0_11, %c0_12] : memref<1x208xf32, #tpu.memory_space<vmem>>, vector<1x208xf32>
    %13 = vector.broadcast %12 : vector<1x208xf32> to vector<64x208xf32>
    %14 = arith.addf %11, %13 : vector<64x208xf32>
    %cst_13 = arith.constant 0.000000e+00 : f32
    %15 = vector.broadcast %cst_13 : f32 to vector<64x208xf32>
    %16 = arith.maximumf %14, %15 : vector<64x208xf32>
    %c0_14 = arith.constant 0 : index
    %c1_15 = arith.constant 1 : index
    %c0_16 = arith.constant 0 : index
    %c0_17 = arith.constant 0 : index
    %17 = vector.load %arg1[%c0_14, %c1_15, %c0_16, %c0_17] : memref<2x2x64x84xbf16, #tpu.memory_space<vmem>>, vector<1x1x64x84xbf16>
    %18 = vector.shape_cast %17 : vector<1x1x64x84xbf16> to vector<64x84xbf16>
    %c0_18 = arith.constant 0 : index
    %c0_19 = arith.constant 0 : index
    %19 = vector.load %arg2[%c0_18, %c0_19] : memref<84x416xbf16, #tpu.memory_space<vmem>>, vector<84x416xbf16>
    %cst_20 = arith.constant dense<0.000000e+00> : vector<64x416xf32>
    %20 = tpu.matmul %18, %19, %cst_20 {dimension_numbers = #tpu.dot_dimension_numbers<[1], [0], [0], [1], [0, 0, 1, 1], [], []>} : vector<64x84xbf16>, vector<84x416xbf16>, vector<64x416xf32> -> vector<64x416xf32>
    %c1_21 = arith.constant 1 : index
    %c1_22 = arith.constant 1 : index
    %c0_23 = arith.constant 0 : index
    %c0_24 = arith.constant 0 : index
    %21 = vector.load %arg1[%c1_21, %c1_22, %c0_23, %c0_24] : memref<2x2x64x84xbf16, #tpu.memory_space<vmem>>, vector<1x1x64x84xbf16>
    %22 = vector.shape_cast %21 : vector<1x1x64x84xbf16> to vector<64x84xbf16>
    %c0_25 = arith.constant 0 : index
    %c0_26 = arith.constant 0 : index
    %23 = vector.load %arg2[%c0_25, %c0_26] : memref<84x416xbf16, #tpu.memory_space<vmem>>, vector<84x416xbf16>
    %cst_27 = arith.constant dense<0.000000e+00> : vector<64x416xf32>
    %24 = tpu.matmul %22, %23, %cst_27 {dimension_numbers = #tpu.dot_dimension_numbers<[1], [0], [0], [1], [0, 0, 1, 1], [], []>} : vector<64x84xbf16>, vector<84x416xbf16>, vector<64x416xf32> -> vector<64x416xf32>
    %25 = arith.maximumf %20, %24 : vector<64x416xf32>
    %26 = vector.extract_strided_slice %25 {offsets = [0, 0], sizes = [64, 208], strides = [1, 1]} : vector<64x416xf32> to vector<64x208xf32>
    %27 = vector.extract_strided_slice %25 {offsets = [0, 208], sizes = [64, 208], strides = [1, 1]} : vector<64x416xf32> to vector<64x208xf32>
    %28 = arith.maximumf %26, %27 : vector<64x208xf32>
    %c0_28 = arith.constant 0 : index
    %c0_29 = arith.constant 0 : index
    %29 = vector.load %arg3[%c0_28, %c0_29] : memref<1x208xf32, #tpu.memory_space<vmem>>, vector<1x208xf32>
    %30 = vector.broadcast %29 : vector<1x208xf32> to vector<64x208xf32>
    %31 = arith.addf %28, %30 : vector<64x208xf32>
    %cst_30 = arith.constant 0.000000e+00 : f32
    %32 = vector.broadcast %cst_30 : f32 to vector<64x208xf32>
    %33 = arith.maximumf %31, %32 : vector<64x208xf32>
    %c63_i32 = arith.constant 63 : i32
    %34 = tpu.dynamic_rotate %16 by %c63_i32 dim 0 : vector<64x208xf32>, i32 -> vector<64x208xf32>
    %c63_i32_31 = arith.constant 63 : i32
    %35 = tpu.dynamic_rotate %33 by %c63_i32_31 dim 0 : vector<64x208xf32>, i32 -> vector<64x208xf32>
    %36 = arith.truncf %16 : vector<64x208xf32> to vector<64x208xbf16>
    %37 = arith.truncf %33 : vector<64x208xf32> to vector<64x208xbf16>
    %38 = arith.truncf %34 : vector<64x208xf32> to vector<64x208xbf16>
    %39 = arith.truncf %35 : vector<64x208xf32> to vector<64x208xbf16>
    %c0_32 = arith.constant 0 : index
    %c0_33 = arith.constant 0 : index
    %c0_34 = arith.constant 0 : index
    %40 = vector.load %arg4[%c0_32, %c0_33, %c0_34] : memref<3x208x320xbf16, #tpu.memory_space<vmem>>, vector<1x208x320xbf16>
    %41 = vector.shape_cast %40 : vector<1x208x320xbf16> to vector<208x320xbf16>
    %cst_35 = arith.constant dense<0.000000e+00> : vector<64x320xf32>
    %42 = tpu.matmul %36, %41, %cst_35 {dimension_numbers = #tpu.dot_dimension_numbers<[1], [0], [0], [1], [0, 0, 1, 1], [], []>} : vector<64x208xbf16>, vector<208x320xbf16>, vector<64x320xf32> -> vector<64x320xf32>
    %c1_36 = arith.constant 1 : index
    %c0_37 = arith.constant 0 : index
    %c0_38 = arith.constant 0 : index
    %43 = vector.load %arg4[%c1_36, %c0_37, %c0_38] : memref<3x208x320xbf16, #tpu.memory_space<vmem>>, vector<1x208x320xbf16>
    %44 = vector.shape_cast %43 : vector<1x208x320xbf16> to vector<208x320xbf16>
    %cst_39 = arith.constant dense<0.000000e+00> : vector<64x320xf32>
    %45 = tpu.matmul %37, %44, %cst_39 {dimension_numbers = #tpu.dot_dimension_numbers<[1], [0], [0], [1], [0, 0, 1, 1], [], []>} : vector<64x208xbf16>, vector<208x320xbf16>, vector<64x320xf32> -> vector<64x320xf32>
    %46 = arith.addf %42, %45 : vector<64x320xf32>
    %c2 = arith.constant 2 : index
    %c0_40 = arith.constant 0 : index
    %c0_41 = arith.constant 0 : index
    %47 = vector.load %arg4[%c2, %c0_40, %c0_41] : memref<3x208x320xbf16, #tpu.memory_space<vmem>>, vector<1x208x320xbf16>
    %48 = vector.shape_cast %47 : vector<1x208x320xbf16> to vector<208x320xbf16>
    %cst_42 = arith.constant dense<0.000000e+00> : vector<64x320xf32>
    %49 = tpu.matmul %38, %48, %cst_42 {dimension_numbers = #tpu.dot_dimension_numbers<[1], [0], [0], [1], [0, 0, 1, 1], [], []>} : vector<64x208xbf16>, vector<208x320xbf16>, vector<64x320xf32> -> vector<64x320xf32>
    %50 = arith.addf %46, %49 : vector<64x320xf32>
    %c0_43 = arith.constant 0 : index
    %c0_44 = arith.constant 0 : index
    %c0_45 = arith.constant 0 : index
    %51 = vector.load %arg4[%c0_43, %c0_44, %c0_45] : memref<3x208x320xbf16, #tpu.memory_space<vmem>>, vector<1x208x320xbf16>
    %52 = vector.shape_cast %51 : vector<1x208x320xbf16> to vector<208x320xbf16>
    %cst_46 = arith.constant dense<0.000000e+00> : vector<64x320xf32>
    %53 = tpu.matmul %37, %52, %cst_46 {dimension_numbers = #tpu.dot_dimension_numbers<[1], [0], [0], [1], [0, 0, 1, 1], [], []>} : vector<64x208xbf16>, vector<208x320xbf16>, vector<64x320xf32> -> vector<64x320xf32>
    %c1_47 = arith.constant 1 : index
    %c0_48 = arith.constant 0 : index
    %c0_49 = arith.constant 0 : index
    %54 = vector.load %arg4[%c1_47, %c0_48, %c0_49] : memref<3x208x320xbf16, #tpu.memory_space<vmem>>, vector<1x208x320xbf16>
    %55 = vector.shape_cast %54 : vector<1x208x320xbf16> to vector<208x320xbf16>
    %cst_50 = arith.constant dense<0.000000e+00> : vector<64x320xf32>
    %56 = tpu.matmul %38, %55, %cst_50 {dimension_numbers = #tpu.dot_dimension_numbers<[1], [0], [0], [1], [0, 0, 1, 1], [], []>} : vector<64x208xbf16>, vector<208x320xbf16>, vector<64x320xf32> -> vector<64x320xf32>
    %57 = arith.addf %53, %56 : vector<64x320xf32>
    %c2_51 = arith.constant 2 : index
    %c0_52 = arith.constant 0 : index
    %c0_53 = arith.constant 0 : index
    %58 = vector.load %arg4[%c2_51, %c0_52, %c0_53] : memref<3x208x320xbf16, #tpu.memory_space<vmem>>, vector<1x208x320xbf16>
    %59 = vector.shape_cast %58 : vector<1x208x320xbf16> to vector<208x320xbf16>
    %cst_54 = arith.constant dense<0.000000e+00> : vector<64x320xf32>
    %60 = tpu.matmul %39, %59, %cst_54 {dimension_numbers = #tpu.dot_dimension_numbers<[1], [0], [0], [1], [0, 0, 1, 1], [], []>} : vector<64x208xbf16>, vector<208x320xbf16>, vector<64x320xf32> -> vector<64x320xf32>
    %61 = arith.addf %57, %60 : vector<64x320xf32>
    %62 = arith.maximumf %50, %61 : vector<64x320xf32>
    %63 = vector.extract_strided_slice %62 {offsets = [0, 0], sizes = [64, 160], strides = [1, 1]} : vector<64x320xf32> to vector<64x160xf32>
    %64 = vector.extract_strided_slice %62 {offsets = [0, 160], sizes = [64, 160], strides = [1, 1]} : vector<64x320xf32> to vector<64x160xf32>
    %65 = arith.maximumf %63, %64 : vector<64x160xf32>
    %c0_55 = arith.constant 0 : index
    %c0_56 = arith.constant 0 : index
    %66 = vector.load %arg5[%c0_55, %c0_56] : memref<1x160xf32, #tpu.memory_space<vmem>>, vector<1x160xf32>
    %67 = vector.broadcast %66 : vector<1x160xf32> to vector<64x160xf32>
    %68 = arith.addf %65, %67 : vector<64x160xf32>
    %cst_57 = arith.constant 0.000000e+00 : f32
    %69 = vector.broadcast %cst_57 : f32 to vector<64x160xf32>
    %70 = arith.maximumf %68, %69 : vector<64x160xf32>
    %71 = vector.shape_cast %70 : vector<64x160xf32> to vector<8x8x160xf32>
    %72 = vector.extract_strided_slice %71 {offsets = [0, 0, 0], sizes = [8, 1, 160], strides = [1, 1, 1]} : vector<8x8x160xf32> to vector<8x1x160xf32>
    %73 = vector.shape_cast %72 : vector<8x1x160xf32> to vector<8x160xf32>
    %74 = arith.truncf %73 : vector<8x160xf32> to vector<8x160xbf16>
    %c0_58 = arith.constant 0 : index
    %c0_59 = arith.constant 0 : index
    %c0_60 = arith.constant 0 : index
    %75 = vector.load %arg6[%c0_58, %c0_59, %c0_60] : memref<5x160x128xbf16, #tpu.memory_space<vmem>>, vector<1x160x128xbf16>
    %76 = vector.shape_cast %75 : vector<1x160x128xbf16> to vector<160x128xbf16>
    %cst_61 = arith.constant dense<0.000000e+00> : vector<8x128xf32>
    %77 = tpu.matmul %74, %76, %cst_61 {dimension_numbers = #tpu.dot_dimension_numbers<[1], [0], [0], [1], [0, 0, 1, 1], [], []>} : vector<8x160xbf16>, vector<160x128xbf16>, vector<8x128xf32> -> vector<8x128xf32>
    %78 = vector.extract_strided_slice %71 {offsets = [0, 1, 0], sizes = [8, 1, 160], strides = [1, 1, 1]} : vector<8x8x160xf32> to vector<8x1x160xf32>
    %79 = vector.shape_cast %78 : vector<8x1x160xf32> to vector<8x160xf32>
    %80 = arith.truncf %79 : vector<8x160xf32> to vector<8x160xbf16>
    %c1_62 = arith.constant 1 : index
    %c0_63 = arith.constant 0 : index
    %c0_64 = arith.constant 0 : index
    %81 = vector.load %arg6[%c1_62, %c0_63, %c0_64] : memref<5x160x128xbf16, #tpu.memory_space<vmem>>, vector<1x160x128xbf16>
    %82 = vector.shape_cast %81 : vector<1x160x128xbf16> to vector<160x128xbf16>
    %cst_65 = arith.constant dense<0.000000e+00> : vector<8x128xf32>
    %83 = tpu.matmul %80, %82, %cst_65 {dimension_numbers = #tpu.dot_dimension_numbers<[1], [0], [0], [1], [0, 0, 1, 1], [], []>} : vector<8x160xbf16>, vector<160x128xbf16>, vector<8x128xf32> -> vector<8x128xf32>
    %84 = arith.addf %77, %83 : vector<8x128xf32>
    %85 = vector.extract_strided_slice %71 {offsets = [0, 2, 0], sizes = [8, 1, 160], strides = [1, 1, 1]} : vector<8x8x160xf32> to vector<8x1x160xf32>
    %86 = vector.shape_cast %85 : vector<8x1x160xf32> to vector<8x160xf32>
    %87 = arith.truncf %86 : vector<8x160xf32> to vector<8x160xbf16>
    %c2_66 = arith.constant 2 : index
    %c0_67 = arith.constant 0 : index
    %c0_68 = arith.constant 0 : index
    %88 = vector.load %arg6[%c2_66, %c0_67, %c0_68] : memref<5x160x128xbf16, #tpu.memory_space<vmem>>, vector<1x160x128xbf16>
    %89 = vector.shape_cast %88 : vector<1x160x128xbf16> to vector<160x128xbf16>
    %cst_69 = arith.constant dense<0.000000e+00> : vector<8x128xf32>
    %90 = tpu.matmul %87, %89, %cst_69 {dimension_numbers = #tpu.dot_dimension_numbers<[1], [0], [0], [1], [0, 0, 1, 1], [], []>} : vector<8x160xbf16>, vector<160x128xbf16>, vector<8x128xf32> -> vector<8x128xf32>
    %91 = arith.addf %84, %90 : vector<8x128xf32>
    %92 = vector.extract_strided_slice %71 {offsets = [0, 3, 0], sizes = [8, 1, 160], strides = [1, 1, 1]} : vector<8x8x160xf32> to vector<8x1x160xf32>
    %93 = vector.shape_cast %92 : vector<8x1x160xf32> to vector<8x160xf32>
    %94 = arith.truncf %93 : vector<8x160xf32> to vector<8x160xbf16>
    %c3 = arith.constant 3 : index
    %c0_70 = arith.constant 0 : index
    %c0_71 = arith.constant 0 : index
    %95 = vector.load %arg6[%c3, %c0_70, %c0_71] : memref<5x160x128xbf16, #tpu.memory_space<vmem>>, vector<1x160x128xbf16>
    %96 = vector.shape_cast %95 : vector<1x160x128xbf16> to vector<160x128xbf16>
    %cst_72 = arith.constant dense<0.000000e+00> : vector<8x128xf32>
    %97 = tpu.matmul %94, %96, %cst_72 {dimension_numbers = #tpu.dot_dimension_numbers<[1], [0], [0], [1], [0, 0, 1, 1], [], []>} : vector<8x160xbf16>, vector<160x128xbf16>, vector<8x128xf32> -> vector<8x128xf32>
    %98 = arith.addf %91, %97 : vector<8x128xf32>
    %99 = vector.extract_strided_slice %71 {offsets = [0, 4, 0], sizes = [8, 1, 160], strides = [1, 1, 1]} : vector<8x8x160xf32> to vector<8x1x160xf32>
    %100 = vector.shape_cast %99 : vector<8x1x160xf32> to vector<8x160xf32>
    %101 = arith.truncf %100 : vector<8x160xf32> to vector<8x160xbf16>
    %c4 = arith.constant 4 : index
    %c0_73 = arith.constant 0 : index
    %c0_74 = arith.constant 0 : index
    %102 = vector.load %arg6[%c4, %c0_73, %c0_74] : memref<5x160x128xbf16, #tpu.memory_space<vmem>>, vector<1x160x128xbf16>
    %103 = vector.shape_cast %102 : vector<1x160x128xbf16> to vector<160x128xbf16>
    %cst_75 = arith.constant dense<0.000000e+00> : vector<8x128xf32>
    %104 = tpu.matmul %101, %103, %cst_75 {dimension_numbers = #tpu.dot_dimension_numbers<[1], [0], [0], [1], [0, 0, 1, 1], [], []>} : vector<8x160xbf16>, vector<160x128xbf16>, vector<8x128xf32> -> vector<8x128xf32>
    %105 = arith.addf %98, %104 : vector<8x128xf32>
    %c0_76 = arith.constant 0 : index
    %c0_77 = arith.constant 0 : index
    %106 = vector.load %arg7[%c0_76, %c0_77] : memref<1x128xf32, #tpu.memory_space<vmem>>, vector<1x128xf32>
    %107 = vector.broadcast %106 : vector<1x128xf32> to vector<8x128xf32>
    %108 = arith.addf %105, %107 : vector<8x128xf32>
    %c0_78 = arith.constant 0 : index
    %c0_79 = arith.constant 0 : index
    %109 = vector.load %arg8[%c0_78, %c0_79] : memref<8x128xf32, #tpu.memory_space<vmem>>, vector<8x128xf32>
    tpu.vector_store %arg8[%c0_78, %c0_79], %108 {strides = array<i32>} : memref<8x128xf32, #tpu.memory_space<vmem>>, vector<8x128xf32>,
    return
  }
  func.func @transform_0(%arg0: i32) -> (i32, i32, i32, i32) {
    %c0_i32 = arith.constant 0 : i32
    %c0_i32_0 = arith.constant 0 : i32
    %c0_i32_1 = arith.constant 0 : i32
    %c0_i32_2 = arith.constant 0 : i32
    return %c0_i32, %c0_i32_0, %arg0, %c0_i32_1 : i32, i32, i32, i32
  }
  func.func @transform_1(%arg0: i32) -> (i32, i32) {
    %c0_i32 = arith.constant 0 : i32
    %c0_i32_0 = arith.constant 0 : i32
    %c0_i32_1 = arith.constant 0 : i32
    return %c0_i32, %c0_i32_0 : i32, i32
  }
  func.func @transform_2(%arg0: i32) -> (i32, i32) {
    %c0_i32 = arith.constant 0 : i32
    %c0_i32_0 = arith.constant 0 : i32
    %c0_i32_1 = arith.constant 0 : i32
    return %c0_i32, %c0_i32_0 : i32, i32
  }
  func.func @transform_3(%arg0: i32) -> (i32, i32, i32) {
    %c0_i32 = arith.constant 0 : i32
    %c0_i32_0 = arith.constant 0 : i32
    %c0_i32_1 = arith.constant 0 : i32
    %c0_i32_2 = arith.constant 0 : i32
    return %c0_i32, %c0_i32_0, %c0_i32_1 : i32, i32, i32
  }
  func.func @transform_4(%arg0: i32) -> (i32, i32) {
    %c0_i32 = arith.constant 0 : i32
    %c0_i32_0 = arith.constant 0 : i32
    %c0_i32_1 = arith.constant 0 : i32
    return %c0_i32, %c0_i32_0 : i32, i32
  }
  func.func @transform_5(%arg0: i32) -> (i32, i32, i32) {
    %c0_i32 = arith.constant 0 : i32
    %c0_i32_0 = arith.constant 0 : i32
    %c0_i32_1 = arith.constant 0 : i32
    %c0_i32_2 = arith.constant 0 : i32
    return %c0_i32, %c0_i32_0, %c0_i32_1 : i32, i32, i32
  }
  func.func @transform_6(%arg0: i32) -> (i32, i32) {
    %c0_i32 = arith.constant 0 : i32
    %c0_i32_0 = arith.constant 0 : i32
    %c0_i32_1 = arith.constant 0 : i32
    return %c0_i32, %c0_i32_0 : i32, i32
  }
  func.func @transform_7(%arg0: i32) -> (i32, i32) {
    %c0_i32 = arith.constant 0 : i32
    %c0_i32_0 = arith.constant 0 : i32
    return %arg0, %c0_i32 : i32, i32
  }
}

</mosaic_0001>

<bundles_post_ra>
// kernel: tile.13
= control target key start
LH: loop header
LB: loop body
LE: loop exit
PB: predicated region body
PF: predicated region fallthrough
CT: control target
= control target key end

     0   :  { %s28_s0 = inlined_call_operand.vmem [shape: f32[16], index: 0, kind: input, shape index: {}]   ;;  %s29_s1 = inlined_call_operand.vmem [shape: f32[13,16], index: 1, kind: output, shape index: {}]  }
   0x1   :  { %v4_v0 = vld [vmem:[%s28_s0] ss:$0 sm:$0xff] }
   0x2   :  { %5 = vst [vmem:[%s29_s1] sm:$0xff] %v4_v0  ;;  %8 = vst [vmem:[%s29_s1 + $0x8] sm:$0xff] %v4_v0 }

// kernel: tile.14
= control target key start
LH: loop header
LB: loop body
LE: loop exit
PB: predicated region body
PF: predicated region fallthrough
CT: control target
= control target key end

     0   :  { %s78_s10 = smov 112   ;;  %s79_s11 = smov 80   ;;  %vm4_vm0 = vcmask 130048   ;;  %vm10_vm1 = vcmask 1048448   ;;  %vm16_vm2 = vcmask 917248   ;;  %vm22_vm3 = vcmask 786048   ;;  %s125_s0 = inlined_call_operand.vmem [shape: f32[13,16], index: 0, kind: input, shape index: {}]   ;;  %s126_s1 = inlined_call_operand.vmem [shape: f32[1,208], index: 1, kind: output, shape index: {}]  }
   0x1   :  { %v63_v0 = vld [vmem:[%s125_s0 + $0x7] sm:$0x1]   ;;  %v65_v1 = vld [vmem:[%s125_s0 + $0x5] sm:$0x1]   ;;  %s25_s12 = smov 3  ;;  %s32_s17 = smov 3 }
   0x2   :  { %8 = vrot.lane.b32.xlu0 %v63_v0, %s78_s10  ;;  %20 = vrot.lane.b32.xlu1 %v65_v1, %s79_s11  ;;  %v64_v2 = vld [vmem:[%s125_s0 + $0x6] sm:$0x1]   ;;  %s39_s18 = smov 3  ;;  %s80_s19 = smov 96   ;;  %vm29_vm4 = vcmask 654848   ;;  %vm36_vm5 = vcmask 523648  }
   0x3   :  { %v66_v3 = vld [vmem:[%s125_s0 + $0x4] ss:$8 sm:%s25_s12]   ;;  %s81_s20 = smov 64   ;;  %v67_v4 = vld [vmem:[%s125_s0 + $0x3] ss:$8 sm:%s32_s17]   ;;  %s2_s23 = smov 3 }
   0x4   :  { %v68_v5 = vld [vmem:[%s125_s0 + $0x2] ss:$8 sm:%s39_s18]   ;;  %v3_v6 = vld [vmem:[%s125_s0] ss:$8 sm:%s2_s23]   ;;  %s46_s28 = smov 3  ;;  %s82_s29 = smov 48  }
   0x5   :  { %5 = vst.msk [vmem:[#allocation0] ss:$8 sm:$0x3] %vm4_vm0, %v3_v6   ;;  %s83_s30 = smov 32   ;;  %v69_v7 = vld [vmem:[%s125_s0 + $0x1] ss:$8 sm:%s46_s28]  }
   0x6   :  { %14 = vrot.lane.b32.xlu0 %v64_v2, %s80_s19  ;;  %27 = vrot.lane.b32.xlu1 %v66_v3, %s81_s20  ;;  %s84_s0 = smov 16   ;;  %vm43_vm6 = vcmask 392448   ;;  %vm50_vm7 = vcmask 261248  }
   0xa   :  { %34 = vrot.lane.b32.xlu0 %v67_v4, %s82_s29  ;;  %41 = vrot.lane.b32.xlu1 %v68_v5, %s83_s30 }
   0xe   :  { %48 = vrot.lane.b32.xlu0 %v69_v7, %s84_s0 }
  0x74   :  { %v9_v8 = vpop.permute.xlu0 %8   ;;  %v21_v9 = vpop.permute.xlu1 %20  }
  0x75   :  { %11 = vst.msk [vmem:[#allocation0] sm:$0x1] %vm10_vm1, %v9_v8  }
  0x78   :  { %v15_v10 = vpop.permute.xlu0 %14   ;;  %v28_v11 = vpop.permute.xlu1 %27  }
  0x79   :  { %17 = vst.msk [vmem:[#allocation0] sm:$0x1] %vm16_vm2, %v15_v10  }
  0x7a   :  { %23 = vst.msk [vmem:[#allocation0] sm:$0x1] %vm22_vm3, %v21_v9  }
  0x7b   :  { %30 = vst.msk [vmem:[#allocation0] ss:$8 sm:$0x3] %vm29_vm4, %v28_v11  }
  0x7c   :  { %v35_v12 = vpop.permute.xlu0 %34   ;;  %v42_v13 = vpop.permute.xlu1 %41  }
  0x7d   :  { %37 = vst.msk [vmem:[#allocation0] ss:$8 sm:$0x3] %vm36_vm5, %v35_v12  }
  0x7e   :  { %44 = vst.msk [vmem:[#allocation0] ss:$8 sm:$0x3] %vm43_vm6, %v42_v13  }
  0x80   :  { %v49_v14 = vpop.permute.xlu0 %48  }
  0x81   :  { %51 = vst.msk [vmem:[#allocation0] ss:$8 sm:$0x3] %vm50_vm7, %v49_v14  }
  0x88   :  { %v55_v15 = vld [vmem:[#allocation0] sm:$0x1]  ;;  %v59_v16 = vld [vmem:[#allocation0 + $0x8] sm:$0x1] }
  0x89   :  { %57 = vst [vmem:[%s126_s1] sm:$0x1] %v55_v15  ;;  %70 = vst [vmem:[%s126_s1 + $0x1] sm:$0x1] %v59_v16 }

// kernel: tile.18
= control target key start
LH: loop header
LB: loop body
LE: loop exit
PB: predicated region body
PF: predicated region fallthrough
CT: control target
= control target key end

     0   :  { %s22_s0 = inlined_call_operand.vmem [shape: f32[32], index: 0, kind: input, shape index: {}]   ;;  %s23_s1 = inlined_call_operand.vmem [shape: f32[5,32], index: 1, kind: output, shape index: {}]  }
   0x1   :  { %v4_v0 = vld [vmem:[%s22_s0] ss:$0 sm:$0xff] }
   0x2   :  { %5 = vst [vmem:[%s23_s1] sm:$0xff] %v4_v0 }

// kernel: tile.19
= control target key start
LH: loop header
LB: loop body
LE: loop exit
PB: predicated region body
PF: predicated region fallthrough
CT: control target
= control target key end

     0   :  { %s42_s8 = smov 96   ;;  %s2_s11 = smov 3  ;;  %vm4_vm0 = vcmask 261120   ;;  %vm10_vm1 = vcmask 1048320   ;;  %vm16_vm2 = vcmask 785920   ;;  %vm22_vm3 = vcmask 523520   ;;  %s73_s0 = inlined_call_operand.vmem [shape: f32[5,32], index: 0, kind: input, shape index: {}]   ;;  %s74_s1 = inlined_call_operand.vmem [shape: f32[1,160], index: 1, kind: output, shape index: {}]  }
   0x1   :  { %v35_v0 = vld [vmem:[%s73_s0 + $0x3] sm:$0x1]   ;;  %v37_v1 = vld [vmem:[%s73_s0 + $0x1] sm:$0x1]   ;;  %v36_v2 = vld [vmem:[%s73_s0 + $0x2] sm:$0x1]  }
   0x2   :  { %8 = vrot.lane.b32.xlu0 %v35_v0, %s42_s8  ;;  %s43_s14 = smov 32   ;;  %v3_v3 = vld [vmem:[%s73_s0] ss:$4 sm:%s2_s11]   ;;  %s44_s0 = smov 64  }
   0x3   :  { %20 = vrot.lane.b32.xlu1 %v37_v1, %s43_s14  ;;  %5 = vst.msk [vmem:[#allocation0] ss:$8 sm:$0x3] %vm4_vm0, %v3_v3  }
   0x6   :  { %14 = vrot.lane.b32.xlu0 %v36_v2, %s44_s0 }
   0xa   :  { %v31_v4 = vld [vmem:[#allocation0 + $0x8] sm:$0x1] }
   0xb   :  { %38 = vst [vmem:[%s74_s1 + $0x1] sm:$0x1] %v31_v4 }
  0x74   :  { %v9_v5 = vpop.permute.xlu0 %8  }
  0x75   :  { %11 = vst.msk [vmem:[#allocation0] sm:$0x1] %vm10_vm1, %v9_v5   ;;  %v21_v6 = vpop.permute.xlu1 %20  }
  0x78   :  { %v15_v7 = vpop.permute.xlu0 %14  }
  0x79   :  { %17 = vst.msk [vmem:[#allocation0] sm:$0x1] %vm16_vm2, %v15_v7  }
  0x7a   :  { %23 = vst.msk [vmem:[#allocation0] sm:$0x1] %vm22_vm3, %v21_v6  }
  0x81   :  { %v27_v8 = vld [vmem:[#allocation0] sm:$0x1] }
  0x82   :  { %29 = vst [vmem:[%s74_s1] sm:$0x1] %v27_v8 }

// kernel: cnn_forward.1
= control target key start
LH: loop header
LB: loop body
LE: loop exit
PB: predicated region body
PF: predicated region fallthrough
CT: control target
= control target key end

     0   :  { %12 = vsyncpa [#allocation4], 0  ;;  %s8532_s0 = inlined_call_operand.vmem [shape: bf16[2,2,128,84], index: 0, kind: input, shape index: {}]   ;;  %s8533_s1 = inlined_call_operand.vmem [shape: bf16[84,416], index: 1, kind: input, shape index: {}]   ;;  %s8534_s2 = inlined_call_operand.vmem [shape: f32[1,208], index: 2, kind: input, shape index: {}]   ;;  %s8535_s3 = inlined_call_operand.vmem [shape: bf16[3,208,320], index: 3, kind: input, shape index: {}]   ;;  %s8536_s4 = inlined_call_operand.vmem [shape: f32[1,160], index: 4, kind: input, shape index: {}]   ;;  %s8537_s5 = inlined_call_operand.vmem [shape: bf16[5,160,128], index: 5, kind: input, shape index: {}]   ;;  %s8538_s6 = inlined_call_operand.vmem [shape: f32[1,128], index: 6, kind: input, shape index: {}]   ;;  %s8539_s7 = inlined_call_operand.hbm [shape: f32[16,128], index: 7, kind: output, shape index: {}]  }
   0x1   :  { %14 = vsyncpa [#allocation4 + $0x1], 0  ;;  %s5709_s24 = smov 0   ;;  %s5711_s25 = smov 0  }
   0x2   :  { %s5713_s26 = smov 0   ;;  %s5715_s27 = smov 0  }
   0x3 LB: > { %s4602_s28 = sadd.s32 4294967295, %s5663_s27   ;;  %s4603_s29 = sadd.s32 4294967294, %s5663_s27   ;;  %s5663_s27 = sphi %s5715_s27, %s8859_s27   ;;  %s5659_s26 = sphi %s5713_s26, %s8858_s26   ;;  %s5655_s25 = sphi %s5711_s25, %s8857_s25   ;;  %s5651_s24 = sphi %s5709_s24, %s8856_s24  }
   0x4   : > { %s5732_s30 = sadd.s32 1, %s5663_s27   ;;  %s27_s8 = sadd.s32 1, %s5659_s26 }
   0x5   : > { %s24_s9 = ssub.s32 %s5663_s27, %s5732_s30  ;;  %p34_p0 = scmp.ne.s32.totalorder %s5659_s26, %s5655_s25 }
   0x6   : > { %p25_p1 = scmp.eq.s32.totalorder %s24_s9, 0  ;;  %p35_p2 = scmp.eq.s32.totalorder %s5663_s27, 0 }
   0x7   : > { %p190_p3 = scmp.eq.s32.totalorder %s4602_s28, 1  ;;  %p195_p4 = scmp.ne.s32.totalorder %s5655_s25, %s5651_s24 }
   0x8   : > { %s5745_s10 = scalar_select %p25_p1, %s5659_s26, %s27_s8  }
   0x9   : > { %p36_p5 = por %p35_p2, %p34_p0  ;;  %p5747_p6 = por %p190_p3, %p34_p0 }
   0xa   : > { %p196_p7 = scmp.eq.s32.totalorder %s4603_s29, 1  ;;  %p4605_p9 = scmp.ge.s32.totalorder %s5663_s27, 2 }
   0xc   : > { %p5751_p8 = por %p196_p7, %p195_p4  ;;  %230 = sbr.rel (%p4605_p9) target bundleno = 31 (0x1f), region = 40 }
  0x13   : > { %233 = sbr.rel (!%p36_p5) target bundleno = 31 (0x1f), region = 44  ;;  %s235_s13 = sand.u32 (%p36_p5), 1, %s5659_s26  }
  0x14   : > { %s5125_s14 = sshll.u32 (%p36_p5), %s5663_s27, 5  ;;  %s4606_s15 = sshll.u32 (%p36_p5), %s235_s13, 7 }
  0x15   : > { %s5763_s18 = scalar_lea.vmem (%p36_p5), %s8532_s0, %s5125_s14  ;;  %s237_s19 = scalar_lea.vmem (%p36_p5), [#allocation2], %s4606_s15 }
  0x16   : > { %v256_v0 = vld [vmem:[%s5763_s18] sm:$0xff] (%p36_p5)   ;;  %v260_v1 = vld [vmem:[%s5763_s18 + $0x8] sm:$0xff] (%p36_p5)   ;;  %v264_v2 = vld [vmem:[%s5763_s18 + $0x10] sm:$0xff] (%p36_p5)  }
  0x17   : > { %257 = vst [vmem:[%s237_s19] sm:$0xff] (%p36_p5), %v256_v0   ;;  %261 = vst [vmem:[%s237_s19 + $0x8] sm:$0xff] (%p36_p5), %v260_v1   ;;  %v268_v3 = vld [vmem:[%s5763_s18 + $0x18] sm:$0xff] (%p36_p5)   ;;  %v272_v4 = vld [vmem:[%s5763_s18 + $0x40] sm:$0xff] (%p36_p5)  }
  0x18   : > { %265 = vst [vmem:[%s237_s19 + $0x10] sm:$0xff] (%p36_p5), %v264_v2   ;;  %v276_v5 = vld [vmem:[%s5763_s18 + $0x48] sm:$0xff] (%p36_p5)   ;;  %269 = vst [vmem:[%s237_s19 + $0x18] sm:$0xff] (%p36_p5), %v268_v3   ;;  %v280_v6 = vld [vmem:[%s5763_s18 + $0x50] sm:$0xff] (%p36_p5)  }
  0x19   : > { %273 = vst [vmem:[%s237_s19 + $0x20] sm:$0xff] (%p36_p5), %v272_v4   ;;  %277 = vst [vmem:[%s237_s19 + $0x28] sm:$0xff] (%p36_p5), %v276_v5   ;;  %v284_v7 = vld [vmem:[%s5763_s18 + $0x58] sm:$0xff] (%p36_p5)   ;;  %v288_v8 = vld [vmem:[%s5763_s18 + $0x80] sm:$0xff] (%p36_p5)  }
  0x1a   : > { %281 = vst [vmem:[%s237_s19 + $0x30] sm:$0xff] %v280_v6   ;;  %285 = vst [vmem:[%s237_s19 + $0x38] sm:$0xff] %v284_v7   ;;  %v292_v9 = vld [vmem:[%s5763_s18 + $0x88] sm:$0xff]   ;;  %v296_v10 = vld [vmem:[%s5763_s18 + $0x90] sm:$0xff]  }
  0x1b   : > { %289 = vst [vmem:[%s237_s19 + $0x40] sm:$0xff] %v288_v8   ;;  %v300_v11 = vld [vmem:[%s5763_s18 + $0x98] sm:$0xff]   ;;  %293 = vst [vmem:[%s237_s19 + $0x48] sm:$0xff] %v292_v9   ;;  %v304_v12 = vld [vmem:[%s5763_s18 + $0xc0] sm:$0xff]  }
  0x1c   : > { %297 = vst [vmem:[%s237_s19 + $0x50] sm:$0xff] %v296_v10   ;;  %301 = vst [vmem:[%s237_s19 + $0x58] sm:$0xff] %v300_v11   ;;  %v308_v13 = vld [vmem:[%s5763_s18 + $0xc8] sm:$0xff]   ;;  %v312_v14 = vld [vmem:[%s5763_s18 + $0xd0] sm:$0xff]  }
  0x1d   : > { %305 = vst [vmem:[%s237_s19 + $0x60] sm:$0xff] %v304_v12   ;;  %309 = vst [vmem:[%s237_s19 + $0x68] sm:$0xff] %v308_v13   ;;  %v316_v15 = vld [vmem:[%s5763_s18 + $0xd8] sm:$0xff]  }
  0x1e   : > { %313 = vst [vmem:[%s237_s19 + $0x70] sm:$0xff] %v312_v14   ;;  %317 = vst [vmem:[%s237_s19 + $0x78] sm:$0xff] %v316_v15  }
  0x1f PF: > { %p4609_p10 = scmp.ge.s32.totalorder %s5663_s27, 1  ;;  %p405_p11 = scmp.lt.s32.totalorder %s5663_s27, 3 }
  0x21   : > { %p406_p12 = pnand %p4609_p10, %p405_p11 }
  0x23   : > { %409 = sbr.rel (%p406_p12) target bundleno = 1501 (0x5dd), region = 85 }
  0x2a   : > { %v5786_v16 = vld [vmem:[%s8533_s1 + $0x4] ss:$16 sps:$4 sm:$0xff]   ;;  %v5791_v17 = vld [vmem:[%s8533_s1] ss:$16 sps:$4 sm:$0xff]   ;;  %v8540_v18 = vmov 0   ;;  %s5796_s29 = sand.u32 1, %s5655_s25  }
  0x2b   : > { %663 = vmatprep.mubr.bf16.mxu1 %v8540_v18  ;;  %850 = vmatprep.mubr.bf16.mxu0 %v8540_v18  ;;  %v5803_v19 = vld [vmem:[%s8533_s1 + $0x24] ss:$16 sps:$4 sm:$0xff]   ;;  %v5810_v20 = vld [vmem:[%s8533_s1 + $0x20] ss:$16 sps:$4 sm:$0xff]   ;;  %s4610_s15 = sshll.u32 %s5796_s29, 7  ;;  %vm618_vm0 = vcmask 1041408  }
  0x2c   : > { %631 = vmatprep.subr.bf16.mxu1 %v5786_v16  ;;  %818 = vmatprep.subr.bf16.mxu0 %v5786_v16  ;;  %v5818_v21 = vld [vmem:[%s8533_s1 + $0x44] ss:$16 sps:$4 sm:$0xff]   ;;  %v5825_v22 = vld [vmem:[%s8533_s1 + $0x40] ss:$16 sps:$4 sm:$0xff]   ;;  %s5827_s20 = scalar_lea.vmem [#allocation2], %s4610_s15  ;;  %vm605_vm1 = vcmask 687104  }
  0x2d   : > { %632 = vmatpush1.bf16.msra.mxu1 %v5791_v17  ;;  %819 = vmatpush1.bf16.msra.mxu0 %v5791_v17  ;;  %v5834_v23 = vld [vmem:[%s8533_s1 + $0x64] ss:$16 sps:$4 sm:$0xff]   ;;  %v5841_v24 = vld [vmem:[%s8533_s1 + $0x60] ss:$16 sps:$4 sm:$0xff]   ;;  %v5869_v30 = vld [vmem:[%s8533_s1 + $0xc] ss:$16 sps:$4 sm:$0xff]  }
  0x2e   : > { %633 = vmatprep.subr.bf16.mxu1 %v5803_v19  ;;  %820 = vmatprep.subr.bf16.mxu0 %v5803_v19  ;;  %v5848_v25 = vld [vmem:[%s8533_s1 + $0x84] ss:$16 sps:$4 sm:$0xff]   ;;  %v5858_v27 = vld [vmem:[%s8533_s1 + $0x80] ss:$16 sps:$4 sm:$0xff]   ;;  %v5889_v34 = vld [vmem:[%s8533_s1 + $0x8] ss:$16 sps:$4 sm:$0xff]  }
  0x2f   : > { %v473_v26 = vld [vmem:[%s8533_s1 + $0xa0] sm:$0x33]  ;;  %v5895_v35 = vld [vmem:[%s8533_s1 + $0x2c] ss:$16 sps:$4 sm:$0xff]   ;;  %v5907_v36 = vld [vmem:[%s8533_s1 + $0x28] ss:$16 sps:$4 sm:$0xff]  }
  0x30   : > { %v5862_v28 = vcombine.high %v473_v26, %v473_v26  ;;  %v4636_v29 = vcombine.low %v473_v26, %v473_v26  ;;  %v5879_v32 = vld [vmem:[%s5827_s20] sm:$0xff]   ;;  %v5912_v37 = vld [vmem:[%s5827_s20 + $0x8] sm:$0xff]   ;;  %v5326_v45 = vld [vmem:[%s5827_s20 + $0x10] sm:$0xff]   ;;  %s5666_s9 = smov 48   ;;  %vm1068_vm2 = vcmask 392192   ;;  %vm2131_vm4 = vcmask 654336  }
  0x31   : > { %634 = vmatpush1.bf16.msra.mxu1 %v5810_v20  ;;  %821 = vmatpush1.bf16.msra.mxu0 %v5810_v20  ;;  %v5882_v33 = vld [vmem:[%s5827_s20 + $0x40] sm:$0xff]   ;;  %v5915_v38 = vld [vmem:[%s5827_s20 + $0x48] sm:$0xff]   ;;  %v5960_v46 = vld [vmem:[%s5827_s20 + $0x50] sm:$0xff]   ;;  %s5667_s16 = smov 96   ;;  %vm3597_vm5 = vcmask 785408   ;;  %vm3772_vm6 = vcmask 1041409  }
  0x32   : > { %635 = vmatprep.subr.bf16.mxu1 %v5818_v21  ;;  %822 = vmatprep.subr.bf16.mxu0 %v5818_v21  ;;  %v5876_v31 = vsel %vm618_vm0, %v4636_v29, 0  ;;  %v5920_v39 = vld [vmem:[%s8533_s1 + $0x4c] ss:$16 sps:$4 sm:$0xff]   ;;  %v5925_v40 = vld [vmem:[%s8533_s1 + $0x48] ss:$16 sps:$4 sm:$0xff]   ;;  %v6002_v53 = vld [vmem:[%s5827_s20 + $0x20] sm:$0xff]  }
  0x33   : > { %v5931_v41 = vld [vmem:[%s8533_s1 + $0x6c] ss:$16 sps:$4 sm:$0xff]   ;;  %v5939_v42 = vld [vmem:[%s8533_s1 + $0x68] ss:$16 sps:$4 sm:$0xff]   ;;  %v6031_v55 = vld [vmem:[%s5827_s20 + $0x30] sm:$0xff]   ;;  %vm3775_vm7 = vcmask 1042434  }
  0x34   : > { %v5949_v43 = vld [vmem:[%s8533_s1 + $0x8c] ss:$16 sps:$4 sm:$0xff]   ;;  %v5965_v47 = vld [vmem:[%s8533_s1 + $0x88] ss:$16 sps:$4 sm:$0xff]   ;;  %v5342_v57 = vld [vmem:[%s5827_s20 + $0x60] sm:$0xff]   ;;  %vm3778_vm8 = vcmask 1043459  }
  0x35   : > { %636 = vmatpush1.bf16.msra.mxu1 %v5825_v22  ;;  %823 = vmatpush1.bf16.msra.mxu0 %v5825_v22  ;;  %v474_v44 = vld [vmem:[%s8533_s1 + $0xa8] sm:$0x33]  ;;  %v5334_v50 = vld [vmem:[%s5827_s20 + $0x18] sm:$0xff]   ;;  %v5344_v59 = vld [vmem:[%s5827_s20 + $0x70] sm:$0xff]   ;;  %vm3781_vm9 = vcmask 1044484   ;;  %vm3784_vm10 = vcmask 1045509  }
  0x36   : > { %637 = vmatprep.subr.bf16.mxu1 %v5834_v23  ;;  %824 = vmatprep.subr.bf16.mxu0 %v5834_v23  ;;  %v5972_v48 = vcombine.high %v474_v44, %v474_v44  ;;  %v4638_v49 = vcombine.low %v474_v44, %v474_v44  ;;  %v5982_v51 = vld [vmem:[%s5827_s20 + $0x58] sm:$0xff]   ;;  %v6015_v54 = vld [vmem:[%s5827_s20 + $0x28] sm:$0xff]   ;;  %v5352_v11 = vld [vmem:[%s8535_s3 + $0x154] ss:$12 sps:$4 sm:$0xff]   ;;  %vm3787_vm11 = vcmask 1046534   ;;  %vm3790_vm12 = vcmask 1047559  }
  0x37   : > { %v5341_v56 = vld [vmem:[%s5827_s20 + $0x38] sm:$0xff]   ;;  %v5343_v58 = vld [vmem:[%s5827_s20 + $0x68] sm:$0xff]   ;;  %vm3869_vm13 = vcmask 261120   ;;  %s4611_s13 = sshll.u32 %s5796_s29, 3  ;;  %s4525_s23 = scalar_lea.sflag [#allocation4], %s5796_s29 }
  0x38   : > { %v5987_v52 = vsel %vm618_vm0, %v4638_v49, 0  ;;  %v5345_v60 = vld [vmem:[%s5827_s20 + $0x78] sm:$0xff]   ;;  %s5122_s20 = sshll.u32 %s4602_s28, 7  ;;  %s442_s17 = scalar_lea.vmem [#allocation3], %s4611_s13 }
  0x39   : > { %638 = vmatpush1.bf16.msra.mxu1 %v5841_v24  ;;  %825 = vmatpush1.bf16.msra.mxu0 %v5841_v24  ;;  %s4538_s18 = sshll.u32 %s442_s17, 4  ;;  %s8488_s22 = scalar_lea.hbm %s8539_s7, %s5122_s20  ;;  %s8490_s18 = int_to_ptr.vmem [resolvable:$true] %s4538_s18 }
  0x3a   : > { %639 = vmatprep.subr.bf16.mxu1 %v5848_v25  ;;  %826 = vmatprep.subr.bf16.mxu0 %v5848_v25  ;;  %s5601_s28 = scalar_lea.vmem %s8490_s18, 128 }
  0x3b   : > { %p5602_p13 = scmp.ne.s32.totalorder %s8490_s18, %s5601_s28 }
  0x3d   : > { %640 = vmatpush1.bf16.msra.mxu1 %v5858_v27  ;;  %827 = vmatpush1.bf16.msra.mxu0 %v5858_v27  ;;  %p5603_p0 = pnand %p5602_p13, %p5747_p6 }
  0x3e   : > { %4640 = vmatprep.subr.msk.bf16.mxu1 %vm618_vm0, %v5862_v28  ;;  %4662 = vmatprep.subr.msk.bf16.mxu0 %vm618_vm0, %v5862_v28 }
  0x3f   : > { %p5604_p1 = pneg %p5603_p0 }
  0x41   : > { %642 = vmatpush1.bf16.msra.mxu1 %v5876_v31  ;;  %829 = vmatpush1.bf16.msra.mxu0 %v5876_v31 }
  0x42   : > { %704 = vmatprep.subr.bf16.mxu1 %v5869_v30  ;;  %1202 = vmatprep.subr.bf16.mxu0 %v5786_v16 }
  0x44   : > { %4641 = vmatmul.mubr.msk.bf16.vlgmr.msra.gmra.mrb[0].mxu1 %vm605_vm1, %v5879_v32  ;;  %4663 = vmatmul.mubr.msk.bf16.vlgmr.msra.gmra.mrb[0].mxu0 %vm605_vm1, %v5882_v33 }
  0x45   : > { %705 = vmatpush1.bf16.msra.mxu1 %v5889_v34  ;;  %673 = vmatprep.mubr.bf16.mxu1 %v8540_v18 }
  0x46   : > { %706 = vmatprep.subr.bf16.mxu1 %v5895_v35  ;;  %860 = vmatprep.mubr.bf16.mxu0 %v8540_v18 }
  0x47   : > { %1203 = vmatpush1.bf16.msra.mxu0 %v5791_v17 }
  0x48   : > { %1204 = vmatprep.subr.bf16.mxu0 %v5803_v19 }
  0x49   : > { %707 = vmatpush1.bf16.msra.mxu1 %v5907_v36 }
  0x4a   : > { %708 = vmatprep.subr.bf16.mxu1 %v5920_v39 }
  0x4b   : > { %1205 = vmatpush1.bf16.msra.mxu0 %v5810_v20 }
  0x4c   : > { %4642 = vmatmul.mubr.msk.bf16.gmra.mrb[4].mxu1 %vm605_vm1, %v5912_v37  ;;  %4664 = vmatmul.mubr.msk.bf16.gmra.mrb[4].mxu0 %vm605_vm1, %v5915_v38 }
  0x4d   : > { %709 = vmatpush1.bf16.msra.mxu1 %v5925_v40  ;;  %683 = vmatprep.mubr.bf16.mxu1 %v8540_v18 }
  0x4e   : > { %870 = vmatprep.mubr.bf16.mxu0 %v8540_v18  ;;  %710 = vmatprep.subr.bf16.mxu1 %v5931_v41 }
  0x4f   : > { %1206 = vmatprep.subr.bf16.mxu0 %v5818_v21 }
  0x50   : > { %1207 = vmatpush1.bf16.msra.mxu0 %v5825_v22 }
  0x51   : > { %711 = vmatpush1.bf16.msra.mxu1 %v5939_v42  ;;  %1208 = vmatprep.subr.bf16.mxu0 %v5834_v23 }
  0x52   : > { %712 = vmatprep.subr.bf16.mxu1 %v5949_v43 }
  0x54   : > { %4643 = vmatmul.mubr.msk.bf16.gmra.mrb[8].mxu1 %vm605_vm1, %v5326_v45  ;;  %4665 = vmatmul.mubr.msk.bf16.gmra.mrb[8].mxu0 %vm605_vm1, %v5960_v46 }
  0x55   : > { %693 = vmatprep.mubr.bf16.mxu1 %v8540_v18  ;;  %713 = vmatpush1.bf16.msra.mxu1 %v5965_v47 }
  0x56   : > { %880 = vmatprep.mubr.bf16.mxu0 %v8540_v18  ;;  %4645 = vmatprep.subr.msk.bf16.mxu1 %vm618_vm0, %v5972_v48 }
  0x57   : > { %1209 = vmatpush1.bf16.msra.mxu0 %v5841_v24 }
  0x58   : > { %1210 = vmatprep.subr.bf16.mxu0 %v5848_v25 }
  0x59   : > { %715 = vmatpush1.bf16.msra.mxu1 %v5987_v52 }
  0x5a   : > { %891 = vmatprep.subr.bf16.mxu1 %v5869_v30 }
  0x5b   : > { %1211 = vmatpush1.bf16.msra.mxu0 %v5858_v27 }
  0x5c   : > { %4644 = vmatmul.mubr.msk.bf16.gmra.mrb[12].mxu1 %vm605_vm1, %v5334_v50  ;;  %4666 = vmatmul.mubr.msk.bf16.gmra.mrb[12].mxu0 %vm605_vm1, %v5982_v51 }
  0x5d   : > { %736 = vmatprep.mubr.bf16.mxu1 %v8540_v18  ;;  %4684 = vmatprep.subr.msk.bf16.mxu0 %vm618_vm0, %v5862_v28 }
  0x5e   : > { %1234 = vmatprep.mubr.bf16.mxu0 %v8540_v18 }
  0x5f   : > { %1213 = vmatpush1.bf16.msra.mxu0 %v5876_v31 }
  0x60   : > { %1389 = vmatprep.subr.bf16.mxu0 %v5786_v16 }
  0x64   : > { %4646 = vmatmul.mubr.msk.bf16.vlgmr.msra.gmra.mrb[16].mxu1 %vm605_vm1, %v5879_v32  ;;  %4685 = vmatmul.mubr.msk.bf16.vlgmr.msra.gmra.mrb[16].mxu0 %vm605_vm1, %v6002_v53 }
  0x65   : > { %892 = vmatpush1.bf16.msra.mxu1 %v5889_v34  ;;  %746 = vmatprep.mubr.bf16.mxu1 %v8540_v18 }
  0x66   : > { %893 = vmatprep.subr.bf16.mxu1 %v5895_v35  ;;  %1244 = vmatprep.mubr.bf16.mxu0 %v8540_v18 }
  0x67   : > { %1390 = vmatpush1.bf16.msra.mxu0 %v5791_v17 }
  0x68   : > { %1391 = vmatprep.subr.bf16.mxu0 %v5803_v19 }
  0x69   : > { %894 = vmatpush1.bf16.msra.mxu1 %v5907_v36 }
  0x6a   : > { %895 = vmatprep.subr.bf16.mxu1 %v5920_v39 }
  0x6b   : > { %1392 = vmatpush1.bf16.msra.mxu0 %v5810_v20 }
  0x6c   : > { %4647 = vmatmul.mubr.msk.bf16.gmra.mrb[20].mxu1 %vm605_vm1, %v5912_v37  ;;  %4686 = vmatmul.mubr.msk.bf16.gmra.mrb[20].mxu0 %vm605_vm1, %v6015_v54 }
  0x6d   : > { %896 = vmatpush1.bf16.msra.mxu1 %v5925_v40  ;;  %756 = vmatprep.mubr.bf16.mxu1 %v8540_v18 }
  0x6e   : > { %897 = vmatprep.subr.bf16.mxu1 %v5931_v41  ;;  %1254 = vmatprep.mubr.bf16.mxu0 %v8540_v18 }
  0x6f   : > { %1393 = vmatprep.subr.bf16.mxu0 %v5818_v21 }
  0x70   : > { %1394 = vmatpush1.bf16.msra.mxu0 %v5825_v22 }
  0x71   : > { %898 = vmatpush1.bf16.msra.mxu1 %v5939_v42  ;;  %1395 = vmatprep.subr.bf16.mxu0 %v5834_v23 }
  0x72   : > { %899 = vmatprep.subr.bf16.mxu1 %v5949_v43 }
  0x74   : > { %4648 = vmatmul.mubr.msk.bf16.gmra.mrb[24].mxu1 %vm605_vm1, %v5326_v45  ;;  %4687 = vmatmul.mubr.msk.bf16.gmra.mrb[24].mxu0 %vm605_vm1, %v6031_v55 }
  0x75   : > { %766 = vmatprep.mubr.bf16.mxu1 %v8540_v18  ;;  %900 = vmatpush1.bf16.msra.mxu1 %v5965_v47 }
  0x76   : > { %4667 = vmatprep.subr.msk.bf16.mxu1 %vm618_vm0, %v5972_v48  ;;  %1396 = vmatpush1.bf16.msra.mxu0 %v5841_v24 }
  0x77   : > { %1264 = vmatprep.mubr.bf16.mxu0 %v8540_v18  ;;  %1397 = vmatprep.subr.bf16.mxu0 %v5848_v25 }
  0x79   : > { %902 = vmatpush1.bf16.msra.mxu1 %v5987_v52 }
  0x7a   : > { %1275 = vmatprep.subr.bf16.mxu1 %v5869_v30  ;;  %1398 = vmatpush1.bf16.msra.mxu0 %v5858_v27 }
  0x7b   : > { %4706 = vmatprep.subr.msk.bf16.mxu0 %vm618_vm0, %v5862_v28 }
  0x7c   : > { %4649 = vmatmul.mubr.msk.bf16.gmra.mrb[28].mxu1 %vm605_vm1, %v5334_v50  ;;  %4688 = vmatmul.mubr.msk.bf16.gmra.mrb[28].mxu0 %vm605_vm1, %v5341_v56 }
  0x7d   : > { %923 = vmatprep.mubr.bf16.mxu1 %v8540_v18  ;;  %1421 = vmatprep.mubr.bf16.mxu0 %v8540_v18 }
  0x7e   : > { %1400 = vmatpush1.bf16.msra.mxu0 %v5876_v31 }
  0x84   : > { %4668 = vmatmul.mubr.msk.bf16.vlgmr.msra.gmra.mrb[32].mxu1 %vm605_vm1, %v5882_v33  ;;  %4707 = vmatmul.mubr.msk.bf16.vlgmr.msra.gmra.mrb[32].mxu0 %vm605_vm1, %v5342_v57 }
  0x85   : > { %1276 = vmatpush1.bf16.msra.mxu1 %v5889_v34  ;;  %933 = vmatprep.mubr.bf16.mxu1 %v8540_v18 }
  0x86   : > { %1277 = vmatprep.subr.bf16.mxu1 %v5895_v35  ;;  %1431 = vmatprep.mubr.bf16.mxu0 %v8540_v18 }
  0x89   : > { %1278 = vmatpush1.bf16.msra.mxu1 %v5907_v36 }
  0x8a   : > { %1279 = vmatprep.subr.bf16.mxu1 %v5920_v39 }
  0x8c   : > { %4669 = vmatmul.mubr.msk.bf16.gmra.mrb[36].mxu1 %vm605_vm1, %v5915_v38  ;;  %4708 = vmatmul.mubr.msk.bf16.gmra.mrb[36].mxu0 %vm605_vm1, %v5343_v58 }
  0x8d   : > { %1280 = vmatpush1.bf16.msra.mxu1 %v5925_v40  ;;  %943 = vmatprep.mubr.bf16.mxu1 %v8540_v18 }
  0x8e   : > { %1281 = vmatprep.subr.bf16.mxu1 %v5931_v41  ;;  %1441 = vmatprep.mubr.bf16.mxu0 %v8540_v18 }
  0x91   : > { %1282 = vmatpush1.bf16.msra.mxu1 %v5939_v42 }
  0x92   : > { %1283 = vmatprep.subr.bf16.mxu1 %v5949_v43 }
  0x94   : > { %4670 = vmatmul.mubr.msk.bf16.gmra.mrb[40].mxu1 %vm605_vm1, %v5960_v46  ;;  %4709 = vmatmul.mubr.msk.bf16.gmra.mrb[40].mxu0 %vm605_vm1, %v5344_v59 }
  0x95   : > { %953 = vmatprep.mubr.bf16.mxu1 %v8540_v18  ;;  %1284 = vmatpush1.bf16.msra.mxu1 %v5965_v47 }
  0x96   : > { %4689 = vmatprep.subr.msk.bf16.mxu1 %vm618_vm0, %v5972_v48  ;;  %1451 = vmatprep.mubr.bf16.mxu0 %v8540_v18 }
  0x99   : > { %1286 = vmatpush1.bf16.msra.mxu1 %v5987_v52 }
  0x9a   : > { %1462 = vmatprep.subr.bf16.mxu1 %v5869_v30 }
  0x9c   : > { %4671 = vmatmul.mubr.msk.bf16.gmra.mrb[44].mxu1 %vm605_vm1, %v5982_v51  ;;  %4710 = vmatmul.mubr.msk.bf16.gmra.mrb[44].mxu0 %vm605_vm1, %v5345_v60 }
  0x9d   : > { %1307 = vmatprep.mubr.bf16.mxu1 %v8540_v18 }
  0xa4   : > { %4690 = vmatmul.mubr.msk.bf16.vlgmr.msra.gmra.mrb[48].mxu1 %vm605_vm1, %v6002_v53 }
  0xa5   : > { %1463 = vmatpush1.bf16.msra.mxu1 %v5889_v34  ;;  %1317 = vmatprep.mubr.bf16.mxu1 %v8540_v18 }
  0xa6   : > { %1464 = vmatprep.subr.bf16.mxu1 %v5895_v35 }
  0xa9   : > { %1465 = vmatpush1.bf16.msra.mxu1 %v5907_v36 }
  0xaa   : > { %1466 = vmatprep.subr.bf16.mxu1 %v5920_v39 }
  0xac   : > { %4691 = vmatmul.mubr.msk.bf16.gmra.mrb[52].mxu1 %vm605_vm1, %v6015_v54 }
  0xad   : > { %1467 = vmatpush1.bf16.msra.mxu1 %v5925_v40  ;;  %1327 = vmatprep.mubr.bf16.mxu1 %v8540_v18 }
  0xae   : > { %1468 = vmatprep.subr.bf16.mxu1 %v5931_v41 }
  0xb1   : > { %1469 = vmatpush1.bf16.msra.mxu1 %v5939_v42 }
  0xb2   : > { %1470 = vmatprep.subr.bf16.mxu1 %v5949_v43 }
  0xb4   : > { %4692 = vmatmul.mubr.msk.bf16.gmra.mrb[56].mxu1 %vm605_vm1, %v6031_v55 }
  0xb5   : > { %1337 = vmatprep.mubr.bf16.mxu1 %v8540_v18  ;;  %1471 = vmatpush1.bf16.msra.mxu1 %v5965_v47 }
  0xb6   : > { %4711 = vmatprep.subr.msk.bf16.mxu1 %vm618_vm0, %v5972_v48 }
  0xb9   : > { %1473 = vmatpush1.bf16.msra.mxu1 %v5987_v52 }
  0xba   : > { %2217 = vmatprep.subr.bf16.mxu1 %v8540_v18 }
  0xbc   : > { %4693 = vmatmul.mubr.msk.bf16.gmra.mrb[60].mxu1 %vm605_vm1, %v5341_v56 }
  0xbd   : > { %1494 = vmatprep.mubr.bf16.mxu1 %v8540_v18 }
  0xc4   : > { %4712 = vmatmul.mubr.msk.bf16.vlgmr.msra.gmra.mrb[64].mxu1 %vm605_vm1, %v5342_v57 }
  0xc5   : > { %1504 = vmatprep.mubr.bf16.mxu1 %v8540_v18 }
  0xcc   : > { %4713 = vmatmul.mubr.msk.bf16.gmra.mrb[68].mxu1 %vm605_vm1, %v5343_v58 }
  0xcd   : > { %1514 = vmatprep.mubr.bf16.mxu1 %v8540_v18 }
  0xd4   : > { %4714 = vmatmul.mubr.msk.bf16.gmra.mrb[72].mxu1 %vm605_vm1, %v5344_v59 }
  0xd5   : > { %1524 = vmatprep.mubr.bf16.mxu1 %v8540_v18 }
  0xdc   : > { %4715 = vmatmul.mubr.msk.bf16.gmra.mrb[76].mxu1 %vm605_vm1, %v5345_v60 }
 0x117   : > { %v6126_v61 = vpop.f32.mrb[0].mxu1  ;;  %v6128_v62 = vpop.f32.mrb[0].mxu0 }
 0x118   : > { %8645 = vst [vmem:[#allocation6_spill] sm:$0xff] %v6126_v61  ;;  %8646 = vst [vmem:[#allocation7_spill] sm:$0xff] %v6128_v62  ;;  %v667_v0 = vpop.f32.mrb[1].mxu1  ;;  %v854_v1 = vpop.f32.mrb[1].mxu0 }
 0x119   : > { %v6132_v2 = vmax.f32 %v667_v0, %v854_v1  ;;  %v6134_v3 = vpop.f32.mrb[2].mxu1  ;;  %v6136_v4 = vpop.f32.mrb[2].mxu0 }
 0x11a   : > { %8647 = vst [vmem:[#allocation8_spill] sm:$0xff] %v6134_v3  ;;  %8648 = vst [vmem:[#allocation9_spill] sm:$0xff] %v6136_v4  ;;  %v671_v6 = vpop.f32.mrb[3].mxu1  ;;  %v858_v7 = vpop.f32.mrb[3].mxu0 }
 0x11b   : > { %v6140_v8 = vmax.f32 %v671_v6, %v858_v7 }
 0x11f   : > { %v6142_v9 = vpop.f32.mrb[4].mxu1  ;;  %v6144_v10 = vpop.f32.mrb[4].mxu0 }
 0x120   : > { %8649 = vst [vmem:[#allocation10_spill] sm:$0xff] %v6142_v9  ;;  %8650 = vst [vmem:[#allocation11_spill] sm:$0xff] %v6144_v10  ;;  %v677_v12 = vpop.f32.mrb[5].mxu1  ;;  %v864_v13 = vpop.f32.mrb[5].mxu0 }
 0x121   : > { %v6148_v14 = vmax.f32 %v677_v12, %v864_v13  ;;  %v6150_v15 = vpop.f32.mrb[6].mxu1  ;;  %v6152_v16 = vpop.f32.mrb[6].mxu0 }
 0x122   : > { %8651 = vst [vmem:[#allocation12_spill] sm:$0xff] %v6150_v15  ;;  %8652 = vst [vmem:[#allocation13_spill] sm:$0xff] %v6152_v16  ;;  %v681_v19 = vpop.f32.mrb[7].mxu1  ;;  %v868_v20 = vpop.f32.mrb[7].mxu0 }
 0x123   : > { %v6156_v21 = vmax.f32 %v681_v19, %v868_v20 }
 0x127   : > { %v6158_v22 = vpop.f32.mrb[8].mxu1  ;;  %v6160_v23 = vpop.f32.mrb[8].mxu0 }
 0x128   : > { %8653 = vst [vmem:[#allocation14_spill] sm:$0xff] %v6158_v22  ;;  %8654 = vst [vmem:[#allocation15_spill] sm:$0xff] %v6160_v23  ;;  %v687_v25 = vpop.f32.mrb[9].mxu1  ;;  %v874_v26 = vpop.f32.mrb[9].mxu0 }
 0x129   : > { %v6164_v27 = vmax.f32 %v687_v25, %v874_v26  ;;  %v6166_v28 = vpop.f32.mrb[10].mxu1  ;;  %v6168_v29 = vpop.f32.mrb[10].mxu0 }
 0x12a   : > { %8655 = vst [vmem:[#allocation16_spill] sm:$0xff] %v6166_v28  ;;  %8656 = vst [vmem:[#allocation17_spill] sm:$0xff] %v6168_v29  ;;  %v691_v31 = vpop.f32.mrb[11].mxu1  ;;  %v878_v32 = vpop.f32.mrb[11].mxu0 }
 0x12b   : > { %v6172_v33 = vmax.f32 %v691_v31, %v878_v32 }
 0x12d   : > { %8657 = vst [vmem:[#allocation18_spill] sm:$0xff] %v6172_v33 }
 0x12f   : > { %v6174_v34 = vpop.f32.mrb[12].mxu1  ;;  %v6176_v35 = vpop.f32.mrb[12].mxu0 }
 0x130   : > { %8658 = vst [vmem:[#allocation19_spill] sm:$0xff] %v6174_v34  ;;  %8659 = vst [vmem:[#allocation20_spill] sm:$0xff] %v6176_v35  ;;  %v697_v37 = vpop.f32.mrb[13].mxu1  ;;  %v884_v38 = vpop.f32.mrb[13].mxu0  ;;  %v5348_v35 = vld [vmem:[%s8535_s3 + $0x13c] ss:$12 sps:$4 sm:$0xff]  }
 0x131   : > { %v6180_v39 = vmax.f32 %v697_v37, %v884_v38  ;;  %v6182_v40 = vpop.f32.mrb[14].mxu1  ;;  %v6184_v41 = vpop.f32.mrb[14].mxu0  ;;  %2144 = vmatprep.subr.bf16.mxu0 %v5348_v35  ;;  %v5356_v35 = vld [vmem:[%s8535_s3 + $0x16c] ss:$12 sps:$4 sm:$0xff]  }
 0x132   : > { %8661 = vst [vmem:[#allocation22_spill] sm:$0xff] %v6182_v40  ;;  %8662 = vst [vmem:[#allocation23_spill] sm:$0xff] %v6184_v41  ;;  %v701_v43 = vpop.f32.mrb[15].mxu1  ;;  %v888_v44 = vpop.f32.mrb[15].mxu0 }
 0x133   : > { %8660 = vst [vmem:[#allocation21_spill] sm:$0xff] %v6180_v39  ;;  %v6188_v45 = vmax.f32 %v701_v43, %v888_v44 }
 0x135   : > { %8663 = vst [vmem:[#allocation24_spill] sm:$0xff] %v6188_v45 }
 0x137   : > { %v6190_v46 = vpop.f32.mrb[16].mxu1  ;;  %v6192_v47 = vpop.f32.mrb[16].mxu0 }
 0x138   : > { %8664 = vst [vmem:[#allocation25_spill] sm:$0xff] %v6192_v47  ;;  %v6194_v48 = vpop.f32.mrb[17].mxu1  ;;  %v1238_v49 = vpop.f32.mrb[17].mxu0 }
 0x139   : > { %v6196_v50 = vpop.f32.mrb[18].mxu1  ;;  %v6198_v51 = vpop.f32.mrb[18].mxu0 }
 0x13a   : > { %8665 = vst [vmem:[#allocation26_spill] sm:$0xff] %v6198_v51  ;;  %v6200_v52 = vpop.f32.mrb[19].mxu1  ;;  %v1242_v53 = vpop.f32.mrb[19].mxu0  ;;  %v5376_v51 = vld [vmem:[%s8535_s3 + $0x1e4] ss:$12 sps:$4 sm:$0xff]  }
 0x13f   : > { %v6202_v54 = vpop.f32.mrb[20].mxu1  ;;  %v6204_v55 = vpop.f32.mrb[20].mxu0 }
 0x140   : > { %8666 = vst [vmem:[#allocation27_spill] sm:$0xff] %v6204_v55  ;;  %v6206_v56 = vpop.f32.mrb[21].mxu1  ;;  %v1248_v57 = vpop.f32.mrb[21].mxu0 }
 0x141   : > { %v6208_v58 = vpop.f32.mrb[22].mxu1  ;;  %v6210_v59 = vpop.f32.mrb[22].mxu0 }
 0x142   : > { %8667 = vst [vmem:[#allocation28_spill] sm:$0xff] %v6210_v59  ;;  %v6212_v60 = vpop.f32.mrb[23].mxu1  ;;  %v1252_v0 = vpop.f32.mrb[23].mxu0 }
 0x147   : > { %v6214_v1 = vpop.f32.mrb[24].mxu1  ;;  %v6216_v6 = vpop.f32.mrb[24].mxu0 }
 0x148   : > { %8668 = vst [vmem:[#allocation29_spill] sm:$0xff] %v6216_v6  ;;  %v6218_v7 = vpop.f32.mrb[25].mxu1  ;;  %v1258_v12 = vpop.f32.mrb[25].mxu0 }
 0x149   : > { %v6220_v13 = vpop.f32.mrb[26].mxu1  ;;  %v6222_v19 = vpop.f32.mrb[26].mxu0 }
 0x14a   : > { %8669 = vst [vmem:[#allocation30_spill] sm:$0xff] %v6222_v19  ;;  %v6224_v20 = vpop.f32.mrb[27].mxu1  ;;  %v1262_v25 = vpop.f32.mrb[27].mxu0  ;;  %v5353_v19 = vld [vmem:[%s8535_s3 + $0x158] ss:$12 sps:$4 sm:$0xff]  }
 0x14f   : > { %v6226_v26 = vpop.f32.mrb[28].mxu1  ;;  %v6228_v31 = vpop.f32.mrb[28].mxu0 }
 0x150   : > { %8670 = vst [vmem:[#allocation31_spill] sm:$0xff] %v6226_v26  ;;  %8671 = vst [vmem:[#allocation32_spill] sm:$0xff] %v6228_v31  ;;  %v6230_v32 = vpop.f32.mrb[29].mxu1  ;;  %v6232_v37 = vpop.f32.mrb[29].mxu0  ;;  %v5396_v26 = vld [vmem:[%s8535_s3 + $0x25c] ss:$12 sps:$4 sm:$0xff]  }
 0x151   : > { %8672 = vst [vmem:[#allocation33_spill] sm:$0xff] %v6230_v32  ;;  %v6234_v38 = vpop.f32.mrb[30].mxu1  ;;  %v6236_v43 = vpop.f32.mrb[30].mxu0 }
 0x152   : > { %8673 = vst [vmem:[#allocation34_spill] sm:$0xff] %v6234_v38  ;;  %8674 = vst [vmem:[#allocation35_spill] sm:$0xff] %v6236_v43  ;;  %v6238_v44 = vpop.f32.mrb[31].mxu1  ;;  %v6240_v42 = vpop.f32.mrb[31].mxu0  ;;  %v5369_v43 = vld [vmem:[%s8535_s3 + $0x1b8] ss:$12 sps:$4 sm:$0xff]  }
 0x153   : > { %8675 = vst [vmem:[#allocation36_spill] sm:$0xff] %v6238_v44  ;;  %v5386_v38 = vld [vmem:[%s8535_s3 + $0x228] ss:$12 sps:$4 sm:$0xff]  }
 0x157   : > { %v6242_v36 = vpop.f32.mrb[32].mxu1  ;;  %v6244_v30 = vpop.f32.mrb[32].mxu0 }
 0x158   : > { %8676 = vst [vmem:[#allocation37_spill] sm:$0xff] %v6244_v30  ;;  %v6248_v17 = vpop.f32.mrb[33].mxu1  ;;  %v1425_v5 = vpop.f32.mrb[33].mxu0 }
 0x159   : > { %v6254_v18 = vpop.f32.mrb[34].mxu1  ;;  %v6256_v41 = vmax.f32 %v1238_v49, %v1425_v5  ;;  %v6258_v40 = vpop.f32.mrb[34].mxu0 }
 0x15a   : > { %8677 = vst [vmem:[#allocation38_spill] sm:$0xff] %v6258_v40  ;;  %v6262_v34 = vpop.f32.mrb[35].mxu1  ;;  %v1429_v29 = vpop.f32.mrb[35].mxu0 }
 0x15b   : > { %v6268_v28 = vmax.f32 %v1242_v53, %v1429_v29 }
 0x15f   : > { %v6270_v63 = vpop.f32.mrb[36].mxu1  ;;  %v6272_v5 = vpop.f32.mrb[36].mxu0 }
 0x160   : > { %8678 = vst [vmem:[#allocation39_spill] sm:$0xff] %v6272_v5  ;;  %v6276_v23 = vpop.f32.mrb[37].mxu1  ;;  %v1435_v22 = vpop.f32.mrb[37].mxu0 }
 0x161   : > { %v6282_v16 = vpop.f32.mrb[38].mxu1  ;;  %v6284_v29 = vmax.f32 %v1248_v57, %v1435_v22  ;;  %v6286_v53 = vpop.f32.mrb[38].mxu0  ;;  %v8682_v57 = vmov 0  }
 0x162   : > { %8679 = vst [vmem:[#allocation40_spill] sm:$0xff] %v6286_v53  ;;  %v6290_v15 = vpop.f32.mrb[39].mxu1  ;;  %v1439_v10 = vpop.f32.mrb[39].mxu0 }
 0x163   : > { %v6296_v9 = vmax.f32 %v1252_v0, %v1439_v10 }
 0x167   : > { %v6298_v24 = vpop.f32.mrb[40].mxu1  ;;  %v6300_v22 = vpop.f32.mrb[40].mxu0 }
 0x168   : > { %8680 = vst [vmem:[#allocation41_spill] sm:$0xff] %v6300_v22  ;;  %v6304_v4 = vpop.f32.mrb[41].mxu1  ;;  %v1445_v3 = vpop.f32.mrb[41].mxu0 }
 0x169   : > { %v6310_v62 = vpop.f32.mrb[42].mxu1  ;;  %v6312_v10 = vmax.f32 %v1258_v12, %v1445_v3  ;;  %v6314_v0 = vpop.f32.mrb[42].mxu0  ;;  %v5346_v3 = vld [vmem:[%s8535_s3 + $0x138] ss:$12 sps:$4 sm:$0xff]   ;;  %v5349_v12 = vld [vmem:[%s8535_s3 + $0x140] ss:$12 sps:$4 sm:$0xff]  }
 0x16a   : > { %8681 = vst [vmem:[#allocation42_spill] sm:$0xff] %v6314_v0  ;;  %v6321_v61 = vpop.f32.mrb[43].mxu1  ;;  %v1449_v22 = vpop.f32.mrb[43].mxu0  ;;  %2145 = vmatpush1.bf16.msra.mxu0 %v5346_v3  ;;  %2218 = vmatpush1.bf16.msra.mxu1 %v5349_v12  ;;  %v5350_v0 = vld [vmem:[%s8535_s3 + $0x150] ss:$12 sps:$4 sm:$0xff]  }
 0x16b   : > { %v6333_v6 = vmax.f32 %v1262_v25, %v1449_v22  ;;  %2219 = vmatprep.subr.bf16.mxu1 %v8682_v57  ;;  %2146 = vmatprep.subr.bf16.mxu0 %v5352_v11  ;;  %v5360_v3 = vld [vmem:[%s8535_s3 + $0x184] ss:$12 sps:$4 sm:$0xff]  }
 0x16e   : > { %2147 = vmatpush1.bf16.msra.mxu0 %v5350_v0  ;;  %2220 = vmatpush1.bf16.msra.mxu1 %v5353_v19  ;;  %v5358_v0 = vld [vmem:[%s8535_s3 + $0x180] ss:$12 sps:$4 sm:$0xff]  }
 0x16f   : > { %v6345_v49 = vpop.f32.mrb[44].mxu1  ;;  %v6347_v25 = vpop.f32.mrb[44].mxu0  ;;  %2221 = vmatprep.subr.bf16.mxu1 %v8682_v57  ;;  %2148 = vmatprep.subr.bf16.mxu0 %v5356_v35  ;;  %v5364_v35 = vld [vmem:[%s8535_s3 + $0x19c] ss:$12 sps:$4 sm:$0xff]  }
 0x170   : > { %8683 = vst [vmem:[#allocation43_spill] sm:$0xff] %v6345_v49  ;;  %8684 = vst [vmem:[#allocation44_spill] sm:$0xff] %v6347_v25  ;;  %v6351_v22 = vpop.f32.mrb[45].mxu1  ;;  %v1455_v12 = vpop.f32.mrb[45].mxu0  ;;  %v5361_v25 = vld [vmem:[%s8535_s3 + $0x188] ss:$12 sps:$4 sm:$0xff]  }
 0x171   : > { %8685 = vst [vmem:[#allocation45_spill] sm:$0xff] %v6351_v22  ;;  %v6357_v59 = vpop.f32.mrb[46].mxu1  ;;  %v6360_v5 = vmax.f32 %v6232_v37, %v1455_v12  ;;  %v6362_v11 = vpop.f32.mrb[46].mxu0  ;;  %v5354_v37 = vld [vmem:[%s8535_s3 + $0x168] ss:$12 sps:$4 sm:$0xff]  }
 0x172   : > { %8686 = vst [vmem:[#allocation46_spill] sm:$0xff] %v6357_v59  ;;  %8687 = vst [vmem:[#allocation47_spill] sm:$0xff] %v6362_v11  ;;  %v6370_v19 = vpop.f32.mrb[47].mxu1  ;;  %v1459_v53 = vpop.f32.mrb[47].mxu0  ;;  %v5357_v12 = vld [vmem:[%s8535_s3 + $0x170] ss:$12 sps:$4 sm:$0xff]   ;;  %2149 = vmatpush1.bf16.msra.mxu0 %v5354_v37 }
 0x173   : > { %8688 = vst [vmem:[#allocation48_spill] sm:$0xff] %v6370_v19  ;;  %v6383_v31 = vmax.f32 %v6240_v42, %v1459_v53  ;;  %2222 = vmatpush1.bf16.msra.mxu1 %v5357_v12  ;;  %2150 = vmatprep.subr.bf16.mxu0 %v5360_v3  ;;  %v5362_v53 = vld [vmem:[%s8535_s3 + $0x198] ss:$12 sps:$4 sm:$0xff]   ;;  %v5365_v3 = vld [vmem:[%s8535_s3 + $0x1a0] ss:$12 sps:$4 sm:$0xff]  }
 0x174   : > { %2223 = vmatprep.subr.bf16.mxu1 %v8682_v57  ;;  %v5393_v22 = vld [vmem:[%s8535_s3 + $0x248] ss:$12 sps:$4 sm:$0xff]  }
 0x176   : > { %2151 = vmatpush1.bf16.msra.mxu0 %v5358_v0  ;;  %v5366_v0 = vld [vmem:[%s8535_s3 + $0x1b0] ss:$12 sps:$4 sm:$0xff]  }
 0x177   : > { %v6395_v11 = vpop.f32.mrb[48].mxu1  ;;  %2224 = vmatpush1.bf16.msra.mxu1 %v5361_v25  ;;  %2152 = vmatprep.subr.bf16.mxu0 %v5364_v35  ;;  %v5368_v25 = vld [vmem:[%s8535_s3 + $0x1b4] ss:$12 sps:$4 sm:$0xff]   ;;  %v5372_v35 = vld [vmem:[%s8535_s3 + $0x1cc] ss:$12 sps:$4 sm:$0xff]  }
 0x178   : > { %v6397_v42 = vpop.f32.mrb[49].mxu1  ;;  %2225 = vmatprep.subr.bf16.mxu1 %v8682_v57 }
 0x179   : > { %v6405_v37 = vpop.f32.mrb[50].mxu1 }
 0x17a   : > { %v6411_v12 = vpop.f32.mrb[51].mxu1  ;;  %2153 = vmatpush1.bf16.msra.mxu0 %v5362_v53  ;;  %v5370_v53 = vld [vmem:[%s8535_s3 + $0x1c8] ss:$12 sps:$4 sm:$0xff]  }
 0x17b   : > { %2226 = vmatpush1.bf16.msra.mxu1 %v5365_v3  ;;  %2154 = vmatprep.subr.bf16.mxu0 %v5368_v25  ;;  %v5373_v3 = vld [vmem:[%s8535_s3 + $0x1d0] ss:$12 sps:$4 sm:$0xff]  }
 0x17c   : > { %2227 = vmatprep.subr.bf16.mxu1 %v8682_v57 }
 0x17e   : > { %2155 = vmatpush1.bf16.msra.mxu0 %v5366_v0  ;;  %v5377_v0 = vld [vmem:[%s8535_s3 + $0x1e8] ss:$12 sps:$4 sm:$0xff]  }
 0x17f   : > { %v6426_v55 = vpop.f32.mrb[52].mxu1  ;;  %2228 = vmatpush1.bf16.msra.mxu1 %v5369_v43  ;;  %2156 = vmatprep.subr.bf16.mxu0 %v5372_v35  ;;  %v5374_v43 = vld [vmem:[%s8535_s3 + $0x1e0] ss:$12 sps:$4 sm:$0xff]   ;;  %v5380_v35 = vld [vmem:[%s8535_s3 + $0x1fc] ss:$12 sps:$4 sm:$0xff]  }
 0x180   : > { %v6428_v40 = vpop.f32.mrb[53].mxu1  ;;  %2229 = vmatprep.subr.bf16.mxu1 %v8682_v57 }
 0x181   : > { %v6436_v25 = vpop.f32.mrb[54].mxu1 }
 0x182   : > { %v6442_v30 = vpop.f32.mrb[55].mxu1  ;;  %2157 = vmatpush1.bf16.msra.mxu0 %v5370_v53  ;;  %v5378_v53 = vld [vmem:[%s8535_s3 + $0x1f8] ss:$12 sps:$4 sm:$0xff]  }
 0x183   : > { %2230 = vmatpush1.bf16.msra.mxu1 %v5373_v3  ;;  %2158 = vmatprep.subr.bf16.mxu0 %v5376_v51  ;;  %v5381_v51 = vld [vmem:[%s8535_s3 + $0x200] ss:$12 sps:$4 sm:$0xff]  }
 0x184   : > { %2231 = vmatprep.subr.bf16.mxu1 %v8682_v57 }
 0x186   : > { %2159 = vmatpush1.bf16.msra.mxu0 %v5374_v43  ;;  %v5384_v43 = vld [vmem:[%s8535_s3 + $0x214] ss:$12 sps:$4 sm:$0xff]  }
 0x187   : > { %v6454_v47 = vpop.f32.mrb[56].mxu1  ;;  %2232 = vmatpush1.bf16.msra.mxu1 %v5377_v0  ;;  %2160 = vmatprep.subr.bf16.mxu0 %v5380_v35  ;;  %v5382_v0 = vld [vmem:[%s8535_s3 + $0x210] ss:$12 sps:$4 sm:$0xff]   ;;  %v5385_v35 = vld [vmem:[%s8535_s3 + $0x218] ss:$12 sps:$4 sm:$0xff]  }
 0x188   : > { %v6456_v45 = vpop.f32.mrb[57].mxu1  ;;  %2233 = vmatprep.subr.bf16.mxu1 %v8682_v57 }
 0x189   : > { %v6464_v3 = vpop.f32.mrb[58].mxu1 }
 0x18a   : > { %v6467_v39 = vpop.f32.mrb[59].mxu1  ;;  %2161 = vmatpush1.bf16.msra.mxu0 %v5378_v53 }
 0x18b   : > { %2234 = vmatpush1.bf16.msra.mxu1 %v5381_v51  ;;  %2162 = vmatprep.subr.bf16.mxu0 %v5384_v43  ;;  %v5388_v51 = vld [vmem:[%s8535_s3 + $0x22c] ss:$12 sps:$4 sm:$0xff]   ;;  %v5389_v43 = vld [vmem:[%s8535_s3 + $0x230] ss:$12 sps:$4 sm:$0xff]  }
 0x18c   : > { %2235 = vmatprep.subr.bf16.mxu1 %v8682_v57 }
 0x18e   : > { %2163 = vmatpush1.bf16.msra.mxu0 %v5382_v0  ;;  %v5392_v0 = vld [vmem:[%s8535_s3 + $0x244] ss:$12 sps:$4 sm:$0xff]  }
 0x18f   : > { %v6479_v19 = vpop.f32.mrb[60].mxu1  ;;  %2236 = vmatpush1.bf16.msra.mxu1 %v5385_v35  ;;  %2164 = vmatprep.subr.bf16.mxu0 %v5388_v51  ;;  %v5390_v35 = vld [vmem:[%s8535_s3 + $0x240] ss:$12 sps:$4 sm:$0xff]  }
 0x190   : > { %v6481_v44 = vpop.f32.mrb[61].mxu1  ;;  %2237 = vmatprep.subr.bf16.mxu1 %v8682_v57 }
 0x191   : > { %v6483_v53 = vpop.f32.mrb[62].mxu1 }
 0x192   : > { %v6489_v59 = vpop.f32.mrb[63].mxu1  ;;  %2165 = vmatpush1.bf16.msra.mxu0 %v5386_v38 }
 0x193   : > { %2238 = vmatpush1.bf16.msra.mxu1 %v5389_v43  ;;  %2166 = vmatprep.subr.bf16.mxu0 %v5392_v0 }
 0x194   : > { %2239 = vmatprep.subr.bf16.mxu1 %v8682_v57 }
 0x196   : > { %2167 = vmatpush1.bf16.msra.mxu0 %v5390_v35 }
 0x197   : > { %v1496_v32 = vpop.f32.mrb[64].mxu1  ;;  %2240 = vmatpush1.bf16.msra.mxu1 %v5393_v22  ;;  %v5397_v22 = vld [vmem:[%s8535_s3 + $0x260] ss:$12 sps:$4 sm:$0xff]   ;;  %2168 = vmatprep.subr.bf16.mxu0 %v5396_v26 }
 0x198   : > { %v1537_v51 = vmax.f32 %v6395_v11, %v1496_v32  ;;  %v1498_v38 = vpop.f32.mrb[65].mxu1  ;;  %2241 = vmatprep.subr.bf16.mxu1 %v8682_v57  ;;  %v5394_v32 = vld [vmem:[%s8535_s3 + $0x258] ss:$12 sps:$4 sm:$0xff]  }
 0x199   : > { %v1538_v43 = vmax.f32 %v6397_v42, %v1498_v38  ;;  %v1500_v49 = vpop.f32.mrb[66].mxu1 }
 0x19a   : > { %v1541_v33 = vmax.f32 %v6405_v37, %v1500_v49  ;;  %1593 = vrot.lane.b32.xlu0 %v1537_v51, %s5666_s9  ;;  %v1502_v0 = vpop.f32.mrb[67].mxu1  ;;  %2169 = vmatpush1.bf16.msra.mxu0 %v5394_v32  ;;  %v5400_v49 = vld [vmem:[%s8535_s3 + $0x4] ss:$12 sps:$4 sm:$0xff]  }
 0x19b   : > { %v1542_v11 = vmax.f32 %v6411_v12, %v1502_v0  ;;  %2242 = vmatpush1.bf16.msra.mxu1 %v5397_v22  ;;  %2502 = vmatprep.subr.bf16.mxu0 %v5400_v49 }
 0x19c   : > { %1599 = vrot.lane.b32.xlu1 %v1541_v33, %s5666_s9  ;;  %2575 = vmatprep.subr.bf16.mxu1 %v8682_v57 }
 0x19e   : > { %1595 = vrot.lane.b32.xlu0 %v1538_v43, %s5666_s9 }
 0x19f   : > { %v1506_v42 = vpop.f32.mrb[68].mxu1 }
 0x1a0   : > { %v1545_v37 = vmax.f32 %v6426_v55, %v1506_v42  ;;  %1601 = vrot.lane.b32.xlu1 %v1542_v11, %s5666_s9  ;;  %v1508_v12 = vpop.f32.mrb[69].mxu1 }
 0x1a1   : > { %v1546_v26 = vmax.f32 %v6428_v40, %v1508_v12  ;;  %v1510_v33 = vpop.f32.mrb[70].mxu1 }
 0x1a2   : > { %v1549_v35 = vmax.f32 %v6436_v25, %v1510_v33  ;;  %1591 = vrot.lane.b32.xlu0 %v6256_v41, %s5666_s9  ;;  %v1512_v51 = vpop.f32.mrb[71].mxu1 }
 0x1a3   : > { %v1550_v38 = vmax.f32 %v6442_v30, %v1512_v51 }
 0x1a4   : > { %1597 = vrot.lane.b32.xlu1 %v6268_v28, %s5666_s9 }
 0x1a6   : > { %1603 = vrot.lane.b32.xlu0 %v6284_v29, %s5666_s9 }
 0x1a7   : > { %v1516_v55 = vpop.f32.mrb[72].mxu1 }
 0x1a8   : > { %v1553_v43 = vmax.f32 %v6454_v47, %v1516_v55  ;;  %1609 = vrot.lane.b32.xlu1 %v6296_v9, %s5666_s9  ;;  %v1518_v40 = vpop.f32.mrb[73].mxu1 }
 0x1a9   : > { %v1554_v25 = vmax.f32 %v6456_v45, %v1518_v40  ;;  %v1520_v0 = vpop.f32.mrb[74].mxu1 }
 0x1aa   : > { %v1557_v32 = vmax.f32 %v6464_v3, %v1520_v0  ;;  %1615 = vrot.lane.b32.xlu0 %v6312_v10, %s5666_s9  ;;  %v1522_v30 = vpop.f32.mrb[75].mxu1 }
 0x1ab   : > { %v1558_v22 = vmax.f32 %v6467_v39, %v1522_v30 }
 0x1ac   : > { %1621 = vrot.lane.b32.xlu1 %v6333_v6, %s5666_s9 }
 0x1ae   : > { %1627 = vrot.lane.b32.xlu0 %v6360_v5, %s5666_s9 }
 0x1af   : > { %v1526_v47 = vpop.f32.mrb[76].mxu1 }
 0x1b0   : > { %v1561_v11 = vmax.f32 %v6479_v19, %v1526_v47  ;;  %1633 = vrot.lane.b32.xlu1 %v6383_v31, %s5666_s9  ;;  %v1528_v45 = vpop.f32.mrb[77].mxu1  ;;  %v8691_v19 = vmax.f32 %v6196_v50, %v6254_v18  ;;  %v8694_v18 = vmax.f32 %v6206_v56, %v6276_v23  ;;  %v8700_v23 = vmax.f32 %v6224_v20, %v6321_v61  ;;  %v8705_v50 = vld [vmem:[#allocation33_spill] sm:$0xff]  ;;  %v8709_v61 = vld [vmem:[#allocation46_spill] sm:$0xff] }
 0x1b1   : > { %v1562_v3 = vmax.f32 %v6481_v44, %v1528_v45  ;;  %v1530_v49 = vpop.f32.mrb[78].mxu1  ;;  %v8690_v44 = vmax.f32 %v6194_v48, %v6248_v17  ;;  %v8693_v17 = vmax.f32 %v6202_v54, %v6270_v63  ;;  %v8697_v63 = vmax.f32 %v6214_v1, %v6298_v24  ;;  %v8701_v24 = vld [vmem:[#allocation18_spill] sm:$0xff] }
 0x1b2   : > { %v1565_v42 = vmax.f32 %v6483_v53, %v1530_v49  ;;  %1605 = vrot.lane.b32.xlu0 %v1545_v37, %s5666_s9  ;;  %v1532_v39 = vpop.f32.mrb[79].mxu1  ;;  %v8692_v53 = vmax.f32 %v6200_v52, %v6262_v34  ;;  %v8695_v34 = vmax.f32 %v6208_v58, %v6282_v16  ;;  %v8698_v16 = vmax.f32 %v6218_v7, %v6304_v4  ;;  %v8703_v4 = vld [vmem:[#allocation43_spill] sm:$0xff]  ;;  %v8708_v54 = vld [vmem:[#allocation34_spill] sm:$0xff]  ;;  %v8711_v58 = vld [vmem:[#allocation36_spill] sm:$0xff] }
 0x1b3   : > { %v1566_v12 = vmax.f32 %v6489_v59, %v1532_v39  ;;  %v8689_v59 = vmax.f32 %v6190_v46, %v6242_v36  ;;  %v8696_v36 = vmax.f32 %v6212_v60, %v6290_v15  ;;  %v8699_v15 = vmax.f32 %v6220_v13, %v6310_v62  ;;  %v8702_v46 = vld [vmem:[#allocation31_spill] sm:$0xff]  ;;  %v8706_v62 = vld [vmem:[#allocation45_spill] sm:$0xff]  ;;  %v8712_v60 = vld [vmem:[#allocation48_spill] sm:$0xff] }
 0x1b4   : > { %1607 = vrot.lane.b32.xlu1 %v1546_v26, %s5666_s9  ;;  %v8704_v48 = vmax.f32 %v8702_v46, %v8703_v4  ;;  %v8707_v52 = vmax.f32 %v8705_v50, %v8706_v62  ;;  %v8710_v56 = vmax.f32 %v8708_v54, %v8709_v61  ;;  %v8713_v1 = vmax.f32 %v8711_v58, %v8712_v60  ;;  %v8714_v7 = vld [vmem:[#allocation21_spill] sm:$0xff]  ;;  %v8715_v13 = vld [vmem:[#allocation24_spill] sm:$0xff] }
 0x1b5   : > { %v1119_v20 = vlaneseq  ;;  %v8717_v39 = vld [vmem:[#allocation37_spill] sm:$0xff] }
 0x1b6   : > { %1611 = vrot.lane.b32.xlu0 %v1549_v35, %s5666_s9  ;;  %v1117_v35 = vld [vmem:[%s8534_s2] sm:$0x3]  ;;  %v5401_v54 = vld [vmem:[%s8535_s3 + $0x8] ss:$12 sps:$4 sm:$0xff]  }
 0x1b7   : > { %v6649_v37 = vshrl.u32 %v1119_v20, 7 }
 0x1b8   : > { %1613 = vrot.lane.b32.xlu1 %v1550_v38, %s5666_s9 }
 0x1b9   : > { %v8586_v33 = vsub.s32 1, %v6649_v37  ;;  %vm1737_vm3 = vcmp.lt.s32.totalorder %v6649_v37, 7 }
 0x1ba   : > { %1617 = vrot.lane.b32.xlu0 %v1553_v43, %s5666_s9  ;;  %v8585_v43 = vsub.s32 0, %v6649_v37 }
 0x1bb   : > { %v6657_v38 = vrot.slane %v1117_v35, %v8586_v33  ;;  %v7029_v33 = vld [vmem:[%s8535_s3 + $0x10c] ss:$12 sps:$4 sm:$0xff]  }
 0x1bc   : > { %1619 = vrot.lane.b32.xlu1 %v1554_v25, %s5666_s9  ;;  %v6667_v47 = vrot.slane %v1117_v35, %v8585_v43  ;;  %v5402_v35 = vld [vmem:[%s8535_s3 + $0x18] ss:$12 sps:$4 sm:$0xff]   ;;  %v6984_v43 = vld [vmem:[%s8535_s3 + $0xf4] ss:$12 sps:$4 sm:$0xff]  }
 0x1be   : > { %1623 = vrot.lane.b32.xlu0 %v1557_v32, %s5666_s9 }
 0x1c0   : > { %1625 = vrot.lane.b32.xlu1 %v1558_v22, %s5666_s9 }
 0x1c2   : > { %1629 = vrot.lane.b32.xlu0 %v1561_v11, %s5666_s9 }
 0x1c4   : > { %1631 = vrot.lane.b32.xlu1 %v1562_v3, %s5666_s9 }
 0x1c6   : > { %1635 = vrot.lane.b32.xlu0 %v1565_v42, %s5666_s9  ;;  %v8716_v42 = vld [vmem:[#allocation25_spill] sm:$0xff] }
 0x1c8   : > { %1637 = vrot.lane.b32.xlu1 %v1566_v12, %s5666_s9 }
 0x1ca   : > { %1022 = vrot.lane.b32.xlu0 %v8689_v59, %s5666_s9 }
 0x1cc   : > { %1024 = vrot.lane.b32.xlu1 %v8690_v44, %s5666_s9 }
 0x1ce   : > { %1028 = vrot.lane.b32.xlu0 %v8691_v19, %s5666_s9 }
 0x1d0   : > { %1030 = vrot.lane.b32.xlu1 %v8692_v53, %s5666_s9  ;;  %v8719_v53 = vld [vmem:[#allocation26_spill] sm:$0xff] }
 0x1d2   : > { %1020 = vrot.lane.b32.xlu0 %v6132_v2, %s5666_s9 }
 0x1d4   : > { %1026 = vrot.lane.b32.xlu1 %v6140_v8, %s5666_s9 }
 0x1d6   : > { %1034 = vrot.lane.b32.xlu0 %v8693_v17, %s5666_s9  ;;  %v8720_v17 = vld [vmem:[#allocation38_spill] sm:$0xff] }
 0x1d8   : > { %1036 = vrot.lane.b32.xlu1 %v8694_v18, %s5666_s9  ;;  %v8721_v18 = vmax.f32 %v8719_v53, %v8720_v17 }
 0x1da   : > { %1040 = vrot.lane.b32.xlu0 %v8695_v34, %s5666_s9 }
 0x1dc   : > { %1042 = vrot.lane.b32.xlu1 %v8696_v36, %s5666_s9 }
 0x1de   : > { %1032 = vrot.lane.b32.xlu0 %v6148_v14, %s5666_s9 }
 0x1e0   : > { %1038 = vrot.lane.b32.xlu1 %v6156_v21, %s5666_s9 }
 0x1e2   : > { %1046 = vrot.lane.b32.xlu0 %v8697_v63, %s5666_s9 }
 0x1e4   : > { %1048 = vrot.lane.b32.xlu1 %v8698_v16, %s5666_s9 }
 0x1e6   : > { %1052 = vrot.lane.b32.xlu0 %v8699_v15, %s5666_s9 }
 0x1e8   : > { %1054 = vrot.lane.b32.xlu1 %v8700_v23, %s5666_s9 }
 0x1ea   : > { %1044 = vrot.lane.b32.xlu0 %v6164_v27, %s5666_s9 }
 0x1ec   : > { %1050 = vrot.lane.b32.xlu1 %v8701_v24, %s5666_s9 }
 0x1ee   : > { %1058 = vrot.lane.b32.xlu0 %v8704_v48, %s5666_s9 }
 0x1f0   : > { %1060 = vrot.lane.b32.xlu1 %v8707_v52, %s5666_s9  ;;  %v5398_v52 = vld [vmem:[%s8535_s3] ss:$12 sps:$4 sm:$0xff]  }
 0x1f2   : > { %1064 = vrot.lane.b32.xlu0 %v8710_v56, %s5666_s9 }
 0x1f4   : > { %1066 = vrot.lane.b32.xlu1 %v8713_v1, %s5666_s9  ;;  %v5404_v1 = vld [vmem:[%s8535_s3 + $0x1c] ss:$12 sps:$4 sm:$0xff]  }
 0x1f6   : > { %1056 = vrot.lane.b32.xlu0 %v8714_v7, %s5666_s9 }
 0x1f8   : > { %1062 = vrot.lane.b32.xlu1 %v8715_v13, %s5666_s9 }
 0x20c   : > { %v1594_v26 = vpop.permute.xlu0 %1593 }
 0x20e   : > { %v1600_v51 = vpop.permute.xlu1 %1599 }
 0x210   : > { %v1596_v55 = vpop.permute.xlu0 %1595 }
 0x211   : > { %v1640_v40 = vsel %vm1068_vm2, %v1594_v26, %v1596_v55 }
 0x212   : > { %v1672_v25 = vmax.f32 %v6256_v41, %v1640_v40  ;;  %v1602_v0 = vpop.permute.xlu1 %1601  ;;  %v8718_v41 = vmax.f32 %v8716_v42, %v8717_v39  ;;  %v5408_v40 = vld [vmem:[%s8535_s3 + $0x34] ss:$12 sps:$4 sm:$0xff]   ;;  %v5412_v42 = vld [vmem:[%s8535_s3 + $0x4c] ss:$12 sps:$4 sm:$0xff]  }
 0x213   : > { %v1642_v32 = vsel %vm1068_vm2, %v1600_v51, %v1602_v0 }
 0x214   : > { %v1688_v30 = vadd.f32 %v1672_v25, %v6657_v38  ;;  %v1674_v22 = vmax.f32 %v6268_v28, %v1642_v32  ;;  %v1592_v11 = vpop.permute.xlu0 %1591  ;;  %v5406_v32 = vld [vmem:[%s8535_s3 + $0x30] ss:$12 sps:$4 sm:$0xff]  }
 0x215   : > { %v1639_v45 = vsel %vm1068_vm2, %v1592_v11, %v1594_v26  ;;  %v8724_v11 = vld [vmem:[#allocation39_spill] sm:$0xff] }
 0x216   : > { %v1704_v3 = vmax.f32 %v1688_v30, 0.0  ;;  %v1690_v49 = vadd.f32 %v1674_v22, %v6657_v38  ;;  %v1671_v12 = vmax.f32 %v8718_v41, %v1639_v45  ;;  %v1598_v59 = vpop.permute.xlu1 %1597  ;;  %v5409_v30 = vld [vmem:[%s8535_s3 + $0x38] ss:$12 sps:$4 sm:$0xff]  }
 0x217   : > { %v1641_v44 = vsel %vm1068_vm2, %v1598_v59, %v1600_v51  ;;  %v5405_v51 = vld [vmem:[%s8535_s3 + $0x20] ss:$12 sps:$4 sm:$0xff]   ;;  %v8723_v22 = vld [vmem:[#allocation27_spill] sm:$0xff] }
 0x218   : > { %v1706_v19 = vmax.f32 %v1690_v49, 0.0  ;;  %v1687_v28 = vadd.f32 %v1671_v12, %v6667_v47  ;;  %v1673_v34 = vmax.f32 %v8721_v18, %v1641_v44  ;;  %v1604_v36 = vpop.permute.xlu0 %1603  ;;  %v6680_v63 = vrot.slane %v1704_v3, 1  ;;  %v8726_v18 = vld [vmem:[#allocation28_spill] sm:$0xff] }
 0x219   : > { %v8725_v45 = vmax.f32 %v8723_v22, %v8724_v11  ;;  %v8729_v11 = vld [vmem:[#allocation29_spill] sm:$0xff] }
 0x21a   : > { %v6682_v16 = vrot.slane %v1706_v19, 1  ;;  %v6684_v15 = vpack.c.bf16 %v1706_v19, %v1704_v3  ;;  %v1703_v23 = vmax.f32 %v1687_v28, 0.0  ;;  %v1689_v46 = vadd.f32 %v1673_v34, %v6667_v47  ;;  %v1610_v4 = vpop.permute.xlu1 %1609  ;;  %v6752_v19 = vld [vmem:[%s8535_s3 + $0x48] ss:$12 sps:$4 sm:$0xff]   ;;  %v6757_v28 = vld [vmem:[%s8535_s3 + $0x50] ss:$12 sps:$4 sm:$0xff]  }
 0x21c   : > { %v1705_v48 = vmax.f32 %v1689_v46, 0.0  ;;  %v1616_v50 = vpop.permute.xlu0 %1615  ;;  %4807 = vmatprep.mubr.msk.bf16.mxu0 %vm2131_vm4, %v6684_v15  ;;  %4811 = vmatprep.mubr.msk.bf16.mxu1 %vm2131_vm4, %v6684_v15  ;;  %v6695_v62 = vsel %vm1737_vm3, %v6680_v63, %v6682_v16  ;;  %v6703_v61 = vrot.slane %v1703_v23, 1  ;;  %v6767_v46 = vld [vmem:[%s8535_s3 + $0x64] ss:$12 sps:$4 sm:$0xff]  }
 0x21e   : > { %v1756_v56 = vrot.slane %v1705_v48, 1  ;;  %v6705_v58 = vpack.c.bf16 %v1705_v48, %v1703_v23  ;;  %v6707_v60 = vpop.permute.xlu1 %1621 }
 0x220   : > { %8722 = vst [vmem:[#allocation18_spill] sm:$0xff] %v6705_v58  ;;  %v1782_v20 = vsel %vm1737_vm3, %v6703_v61, %v1756_v56  ;;  %v6715_v26 = vpop.permute.xlu0 %1627  ;;  %2177 = vmatmul.mubr.bf16.vlgmr.msra.gmra.mrb[48].mxu0 %v6705_v58  ;;  %2250 = vmatmul.mubr.bf16.vlgmr.msra.gmra.mrb[80].mxu1 %v6705_v58 }
 0x221   : > { %2503 = vmatpush1.bf16.msra.mxu0 %v5398_v52  ;;  %2576 = vmatpush1.bf16.msra.mxu1 %v5401_v54 }
 0x222   : > { %v6725_v55 = vpop.permute.xlu1 %1633  ;;  %2504 = vmatprep.subr.bf16.mxu0 %v5404_v1  ;;  %2577 = vmatprep.subr.bf16.mxu1 %v8682_v57 }
 0x224   : > { %v1606_v25 = vpop.permute.xlu0 %1605 }
 0x225   : > { %2505 = vmatpush1.bf16.msra.mxu0 %v5402_v35  ;;  %2578 = vmatpush1.bf16.msra.mxu1 %v5405_v51  ;;  %v1643_v0 = vsel %vm1068_vm2, %v1604_v36, %v1606_v25 }
 0x226   : > { %v1675_v3 = vmax.f32 %v8725_v45, %v1643_v0  ;;  %v1608_v49 = vpop.permute.xlu1 %1607  ;;  %2506 = vmatprep.subr.bf16.mxu0 %v5408_v40  ;;  %2579 = vmatprep.subr.bf16.mxu1 %v8682_v57  ;;  %v6778_v40 = vld [vmem:[%s8535_s3 + $0x60] ss:$12 sps:$4 sm:$0xff]  }
 0x227   : > { %v1644_v39 = vsel %vm1068_vm2, %v1606_v25, %v1608_v49  ;;  %v6783_v25 = vld [vmem:[%s8535_s3 + $0x68] ss:$12 sps:$4 sm:$0xff]  }
 0x228   : > { %v1691_v41 = vadd.f32 %v1675_v3, %v6667_v47  ;;  %v1676_v12 = vmax.f32 %v6284_v29, %v1644_v39  ;;  %v1612_v59 = vpop.permute.xlu0 %1611  ;;  %v8727_v29 = vld [vmem:[#allocation40_spill] sm:$0xff]  ;;  %v8730_v45 = vld [vmem:[#allocation41_spill] sm:$0xff] }
 0x229   : > { %2507 = vmatpush1.bf16.msra.mxu0 %v5406_v32  ;;  %2580 = vmatpush1.bf16.msra.mxu1 %v5409_v30  ;;  %v1645_v44 = vsel %vm1068_vm2, %v1610_v4, %v1612_v59  ;;  %v8728_v34 = vmax.f32 %v8726_v18, %v8727_v29  ;;  %v8731_v3 = vmax.f32 %v8729_v11, %v8730_v45 }
 0x22a   : > { %v1707_v53 = vmax.f32 %v1691_v41, 0.0  ;;  %v1692_v17 = vadd.f32 %v1676_v12, %v6657_v38  ;;  %v1614_v23 = vpop.permute.xlu1 %1613  ;;  %2508 = vmatprep.subr.bf16.mxu0 %v5412_v42  ;;  %2581 = vmatprep.subr.bf16.mxu1 %v8682_v57 }
 0x22b   : > { %v1677_v36 = vmax.f32 %v8728_v34, %v1645_v44  ;;  %v1646_v4 = vsel %vm1068_vm2, %v1612_v59, %v1614_v23  ;;  %v8736_v23 = vld [vmem:[#allocation42_spill] sm:$0xff] }
 0x22c   : > { %v1758_v48 = vrot.slane %v1707_v53, 1  ;;  %v1708_v52 = vmax.f32 %v1692_v17, 0.0  ;;  %v1678_v1 = vmax.f32 %v6296_v9, %v1646_v4  ;;  %v1618_v35 = vpop.permute.xlu0 %1617 }
 0x22d   : > { %v1693_v54 = vadd.f32 %v1677_v36, %v6667_v47  ;;  %2509 = vmatpush1.bf16.msra.mxu0 %v6752_v19  ;;  %2582 = vmatpush1.bf16.msra.mxu1 %v6757_v28  ;;  %v1647_v51 = vsel %vm1068_vm2, %v1616_v50, %v1618_v35  ;;  %v6793_v50 = vld [vmem:[%s8535_s3 + $0x7c] ss:$12 sps:$4 sm:$0xff]  }
 0x22e   : > { %v1780_v9 = vsel %vm1737_vm3, %v1756_v56, %v1758_v48  ;;  %v1759_v0 = vrot.slane %v1708_v52, 1  ;;  %v1694_v30 = vadd.f32 %v1678_v1, %v6657_v38  ;;  %v1620_v22 = vpop.permute.xlu1 %1619  ;;  %2510 = vmatprep.subr.bf16.mxu0 %v6767_v46  ;;  %2583 = vmatprep.subr.bf16.mxu1 %v8682_v57  ;;  %v1679_v49 = vmax.f32 %v8731_v3, %v1647_v51  ;;  %v6861_v3 = vld [vmem:[%s8535_s3 + $0x98] ss:$12 sps:$4 sm:$0xff]  }
 0x22f   : > { %v1709_v32 = vmax.f32 %v1693_v54, 0.0  ;;  %v1648_v56 = vsel %vm1068_vm2, %v1618_v35, %v1620_v22  ;;  %v6799_v42 = vpack.c.bf16 %v1780_v9, %v1782_v20  ;;  %v6812_v20 = vld [vmem:[%s8535_s3 + $0x78] ss:$12 sps:$4 sm:$0xff]  }
 0x230   : > { %v1710_v12 = vmax.f32 %v1694_v30, 0.0  ;;  %v1680_v59 = vmax.f32 %v6312_v10, %v1648_v56  ;;  %v1624_v44 = vpop.permute.xlu0 %1623  ;;  %v1695_v17 = vadd.f32 %v1679_v49, %v6667_v47  ;;  %v1781_v10 = vsel %vm1737_vm3, %v6682_v16, %v1759_v0  ;;  %v6834_v16 = vld [vmem:[%s8535_s3 + $0x94] ss:$12 sps:$4 sm:$0xff]  }
 0x231   : > { %8732 = vst [vmem:[#allocation31_spill] sm:$0xff] %v6799_v42  ;;  %v1760_v39 = vrot.slane %v1709_v32, 1  ;;  %v6801_v41 = vpack.c.bf16 %v1709_v32, %v1707_v53  ;;  %2511 = vmatpush1.bf16.msra.mxu0 %v6778_v40  ;;  %2584 = vmatpush1.bf16.msra.mxu1 %v6783_v25  ;;  %v1649_v18 = vsel %vm1068_vm2, %v6707_v60, %v1624_v44  ;;  %v6817_v53 = vld [vmem:[%s8535_s3 + $0x80] ss:$12 sps:$4 sm:$0xff]   ;;  %v8735_v60 = vld [vmem:[#allocation30_spill] sm:$0xff] }
 0x232   : > { %v1761_v29 = vrot.slane %v1710_v12, 1  ;;  %v6822_v34 = vpack.c.bf16 %v1710_v12, %v1708_v52  ;;  %v1696_v36 = vadd.f32 %v1680_v59, %v6657_v38  ;;  %v8737_v4 = vmax.f32 %v8735_v60, %v8736_v23  ;;  %v1626_v1 = vpop.permute.xlu1 %1625  ;;  %2512 = vmatprep.subr.bf16.mxu0 %v6793_v50  ;;  %2585 = vmatprep.subr.bf16.mxu1 %v8682_v57  ;;  %v8739_v12 = vld [vmem:[#allocation32_spill] sm:$0xff] }
 0x233   : > { %8733 = vst [vmem:[#allocation43_spill] sm:$0xff] %v6801_v41  ;;  %v1711_v35 = vmax.f32 %v1695_v17, 0.0  ;;  %v1650_v51 = vsel %vm1068_vm2, %v1624_v44, %v1626_v1  ;;  %v6837_v52 = vpack.c.bf16 %v1781_v10, %v6695_v62  ;;  %v1778_v9 = vsel %vm1737_vm3, %v1758_v48, %v1760_v39  ;;  %v8740_v59 = vld [vmem:[#allocation44_spill] sm:$0xff] }
 0x234   : > { %8734 = vst [vmem:[#allocation33_spill] sm:$0xff] %v6822_v34  ;;  %v1681_v54 = vmax.f32 %v8737_v4, %v1649_v18  ;;  %v1712_v32 = vmax.f32 %v1696_v36, 0.0  ;;  %v1682_v22 = vmax.f32 %v6333_v6, %v1650_v51  ;;  %4808 = vmatprep.mubr.msk.bf16.mxu0 %vm2131_vm4, %v6822_v34  ;;  %4812 = vmatprep.mubr.msk.bf16.mxu1 %vm2131_vm4, %v6822_v34  ;;  %v1630_v11 = vpop.permute.xlu0 %1629  ;;  %v6856_v6 = vld [vmem:[%s8535_s3 + $0x90] ss:$12 sps:$4 sm:$0xff]   ;;  %v6872_v18 = vld [vmem:[%s8535_s3 + $0xac] ss:$12 sps:$4 sm:$0xff]  }
 0x235   : > { %8738 = vst [vmem:[#allocation45_spill] sm:$0xff] %v6837_v52  ;;  %v1779_v45 = vsel %vm1737_vm3, %v1759_v0, %v1761_v29  ;;  %v1762_v62 = vrot.slane %v1711_v35, 1  ;;  %2513 = vmatpush1.bf16.msra.mxu0 %v6812_v20  ;;  %2586 = vmatpush1.bf16.msra.mxu1 %v6817_v53  ;;  %v1651_v48 = vsel %vm1068_vm2, %v6715_v26, %v1630_v11  ;;  %v7108_v42 = vld [vmem:[%s8535_s3 + $0x278] ss:$12 sps:$4 sm:$0xff]  }
 0x236   : > { %v1697_v30 = vadd.f32 %v1681_v54, %v6667_v47  ;;  %v1763_v49 = vrot.slane %v1712_v32, 1  ;;  %v1698_v56 = vadd.f32 %v1682_v22, %v6657_v38  ;;  %v8741_v44 = vmax.f32 %v8739_v12, %v8740_v59  ;;  %2187 = vmatmul.mubr.bf16.gmra.mrb[52].mxu0 %v6801_v41  ;;  %2258 = vmatmul.mubr.bf16.gmra.mrb[84].mxu1 %v6801_v41  ;;  %v1632_v26 = vpop.permute.xlu1 %1631 }
 0x237   : > { %v1652_v10 = vsel %vm1068_vm2, %v1630_v11, %v1632_v26  ;;  %2514 = vmatprep.subr.bf16.mxu0 %v6834_v16  ;;  %2587 = vmatprep.subr.bf16.mxu1 %v8682_v57  ;;  %v1776_v36 = vsel %vm1737_vm3, %v1760_v39, %v1762_v62  ;;  %v6890_v39 = vld [vmem:[%s8535_s3 + $0xa8] ss:$12 sps:$4 sm:$0xff]   ;;  %8762 = vst [vmem:[#allocation39_spill] sm:$0xff] %v7108_v42 }
 0x238   : > { %v1713_v0 = vmax.f32 %v1697_v30, 0.0  ;;  %v1683_v17 = vmax.f32 %v8741_v44, %v1651_v48  ;;  %v1714_v23 = vmax.f32 %v1698_v56, 0.0  ;;  %v1636_v54 = vpop.permute.xlu0 %1635  ;;  %v1684_v51 = vmax.f32 %v6360_v5, %v1652_v10  ;;  %v8745_v56 = vld [vmem:[#allocation47_spill] sm:$0xff] }
 0x239   : > { %2515 = vmatpush1.bf16.msra.mxu0 %v6856_v6  ;;  %2588 = vmatpush1.bf16.msra.mxu1 %v6861_v3  ;;  %v1653_v30 = vsel %vm1068_vm2, %v6725_v55, %v1636_v54  ;;  %v1777_v5 = vsel %vm1737_vm3, %v1761_v29, %v1763_v49  ;;  %v6911_v29 = vld [vmem:[%s8535_s3 + $0xc4] ss:$12 sps:$4 sm:$0xff]   ;;  %v6915_v26 = vpack.c.bf16 %v1776_v36, %v1778_v9  ;;  %v6930_v9 = vld [vmem:[%s8535_s3 + $0xc0] ss:$12 sps:$4 sm:$0xff]  }
 0x23a   : > { %v6879_v60 = vpack.c.bf16 %v1713_v0, %v1711_v35  ;;  %v1699_v4 = vadd.f32 %v1683_v17, %v6667_v47  ;;  %v1764_v1 = vrot.slane %v1713_v0, 1  ;;  %v6895_v35 = vld [vmem:[%s8535_s3 + $0xb0] ss:$12 sps:$4 sm:$0xff]   ;;  %v1765_v22 = vrot.slane %v1714_v23, 1  ;;  %v1638_v59 = vpop.permute.xlu1 %1637  ;;  %2516 = vmatprep.subr.bf16.mxu0 %v6872_v18  ;;  %2589 = vmatprep.subr.bf16.mxu1 %v8682_v57 }
 0x23b   : > { %v6899_v11 = vpack.c.bf16 %v1714_v23, %v1712_v32  ;;  %v8744_v0 = vld [vmem:[#allocation35_spill] sm:$0xff]  ;;  %v1700_v44 = vadd.f32 %v1684_v51, %v6657_v38  ;;  %v1654_v17 = vsel %vm1068_vm2, %v1636_v54, %v1638_v59  ;;  %v6913_v32 = vpack.c.bf16 %v1777_v5, %v1779_v45  ;;  %8748 = vst [vmem:[#allocation48_spill] sm:$0xff] %v6915_v26 }
 0x23c   : > { %8742 = vst [vmem:[#allocation34_spill] sm:$0xff] %v6879_v60  ;;  %v1715_v48 = vmax.f32 %v1699_v4, 0.0  ;;  %v8746_v55 = vmax.f32 %v8744_v0, %v8745_v56  ;;  %v1686_v4 = vmax.f32 %v6383_v31, %v1654_v17  ;;  %v1023_v54 = vpop.permute.xlu0 %1022  ;;  %v1775_v51 = vsel %vm1737_vm3, %v1763_v49, %v1765_v22  ;;  %v6935_v31 = vld [vmem:[%s8535_s3 + $0xc8] ss:$12 sps:$4 sm:$0xff]  }
 0x23d   : > { %8743 = vst [vmem:[#allocation46_spill] sm:$0xff] %v6899_v11  ;;  %8747 = vst [vmem:[#allocation36_spill] sm:$0xff] %v6913_v32  ;;  %4809 = vmatprep.mubr.msk.bf16.mxu0 %vm2131_vm4, %v6899_v11  ;;  %4813 = vmatprep.mubr.msk.bf16.mxu1 %vm2131_vm4, %v6899_v11  ;;  %v1774_v45 = vsel %vm1737_vm3, %v1762_v62, %v1764_v1  ;;  %v6945_v0 = vld [vmem:[%s8535_s3 + $0xdc] ss:$12 sps:$4 sm:$0xff]  }
 0x23e   : > { %v1685_v12 = vmax.f32 %v8746_v55, %v1653_v30  ;;  %v1766_v10 = vrot.slane %v1715_v48, 1  ;;  %v1716_v30 = vmax.f32 %v1700_v44, 0.0  ;;  %2517 = vmatpush1.bf16.msra.mxu0 %v6890_v39  ;;  %2590 = vmatpush1.bf16.msra.mxu1 %v6895_v35  ;;  %v1702_v49 = vadd.f32 %v1686_v4, %v6657_v38  ;;  %v1025_v5 = vpop.permute.xlu1 %1024 }
 0x23f   : > { %2197 = vmatmul.mubr.bf16.gmra.mrb[56].mxu0 %v6879_v60  ;;  %2266 = vmatmul.mubr.bf16.gmra.mrb[88].mxu1 %v6879_v60 }
 0x240   : > { %v1701_v23 = vadd.f32 %v1685_v12, %v6667_v47  ;;  %v1772_v56 = vsel %vm1737_vm3, %v1764_v1, %v1766_v10  ;;  %v1767_v55 = vrot.slane %v1716_v30, 1  ;;  %v1070_v12 = vsel %vm1068_vm2, %v1023_v54, %v1025_v5  ;;  %2518 = vmatprep.subr.bf16.mxu0 %v6911_v29  ;;  %2591 = vmatprep.subr.bf16.mxu1 %v8682_v57  ;;  %v1029_v4 = vpop.permute.xlu0 %1028  ;;  %v6962_v1 = vld [vmem:[%s8535_s3 + $0xd8] ss:$12 sps:$4 sm:$0xff]  }
 0x241   : > { %v6952_v62 = vpack.c.bf16 %v1772_v56, %v1774_v45  ;;  %v1718_v17 = vmax.f32 %v1702_v49, 0.0  ;;  %v6967_v45 = vld [vmem:[%s8535_s3 + $0xe0] ss:$12 sps:$4 sm:$0xff]  }
 0x242   : > { %v1717_v36 = vmax.f32 %v1701_v23, 0.0  ;;  %v1102_v23 = vmax.f32 %v6132_v2, %v1070_v12  ;;  %2519 = vmatpush1.bf16.msra.mxu0 %v6930_v9  ;;  %2592 = vmatpush1.bf16.msra.mxu1 %v6935_v31  ;;  %v1031_v49 = vpop.permute.xlu1 %1030 }
 0x243   : > { %8749 = vst [vmem:[#allocation21_spill] sm:$0xff] %v6952_v62  ;;  %v6971_v2 = vpack.c.bf16 %v1718_v17, %v1716_v30  ;;  %2520 = vmatprep.subr.bf16.mxu0 %v6945_v0  ;;  %2593 = vmatprep.subr.bf16.mxu1 %v8682_v57  ;;  %v1072_v12 = vsel %vm1068_vm2, %v1029_v4, %v1031_v49  ;;  %v8756_v49 = vld [vmem:[#allocation7_spill] sm:$0xff] }
 0x244   : > { %v1768_v59 = vrot.slane %v1717_v36, 1  ;;  %v6954_v44 = vpack.c.bf16 %v1717_v36, %v1715_v48  ;;  %v1773_v48 = vsel %vm1737_vm3, %v1765_v22, %v1767_v55  ;;  %v1769_v36 = vrot.slane %v1718_v17, 1  ;;  %v1021_v17 = vpop.permute.xlu0 %1020 }
 0x245   : > { %8751 = vst [vmem:[#allocation25_spill] sm:$0xff] %v6971_v2  ;;  %v6975_v5 = vpack.c.bf16 %v1773_v48, %v1775_v51  ;;  %v6978_v56 = vadd.f32 %v6657_v38, %v1102_v23  ;;  %v1104_v51 = vmax.f32 %v6140_v8, %v1072_v12  ;;  %4810 = vmatprep.mubr.msk.bf16.mxu0 %vm2131_vm4, %v6971_v2 }
 0x246   : > { %8750 = vst [vmem:[#allocation24_spill] sm:$0xff] %v6954_v44  ;;  %v1770_v22 = vsel %vm1737_vm3, %v1766_v10, %v1768_v59  ;;  %v1784_v30 = vsel %vm1737_vm3, %v1768_v59, %v6703_v61  ;;  %4814 = vmatprep.mubr.msk.bf16.mxu1 %vm2131_vm4, %v6971_v2  ;;  %v1771_v23 = vsel %vm1737_vm3, %v1767_v55, %v1769_v36  ;;  %v7007_v61 = vld [vmem:[%s8535_s3 + $0xf0] ss:$12 sps:$4 sm:$0xff]   ;;  %v7012_v59 = vld [vmem:[%s8535_s3 + $0xf8] ss:$12 sps:$4 sm:$0xff]  }
 0x247   : > { %8752 = vst [vmem:[#allocation37_spill] sm:$0xff] %v6975_v5  ;;  %v1785_v10 = vsel %vm1737_vm3, %v1769_v36, %v6680_v63  ;;  %2521 = vmatpush1.bf16.msra.mxu0 %v6962_v1  ;;  %2594 = vmatpush1.bf16.msra.mxu1 %v6967_v45  ;;  %v1069_v8 = vsel %vm1068_vm2, %v1021_v17, %v1023_v54  ;;  %v8755_v36 = vld [vmem:[#allocation6_spill] sm:$0xff]  ;;  %v1027_v17 = vpop.permute.xlu1 %1026 }
 0x248   : > { %v7014_v55 = vpack.c.bf16 %v1785_v10, %v1771_v23  ;;  %v7016_v48 = vpack.c.bf16 %v1784_v30, %v1770_v22  ;;  %v7019_v63 = vadd.f32 %v6657_v38, %v1104_v51  ;;  %v8757_v54 = vmax.f32 %v8755_v36, %v8756_v49  ;;  %2207 = vmatmul.mubr.bf16.gmra.mrb[60].mxu0 %v6954_v44  ;;  %v8758_v10 = vld [vmem:[#allocation8_spill] sm:$0xff] }
 0x249   : > { %2274 = vmatmul.mubr.bf16.gmra.mrb[92].mxu1 %v6954_v44  ;;  %v1071_v22 = vsel %vm1068_vm2, %v1027_v17, %v1029_v4  ;;  %2522 = vmatprep.subr.bf16.mxu0 %v6984_v43  ;;  %v8591_v30 = vmax.f32 %v6978_v56, 0.0  ;;  %v7045_v4 = vld [vmem:[%s8535_s3 + $0x108] ss:$12 sps:$4 sm:$0xff]   ;;  %v7050_v17 = vld [vmem:[%s8535_s3 + $0x110] ss:$12 sps:$4 sm:$0xff]  }
 0x24a   : > { %8753 = vst [vmem:[#allocation26_spill] sm:$0xff] %v7014_v55  ;;  %8754 = vst [vmem:[#allocation38_spill] sm:$0xff] %v7016_v48  ;;  %v1101_v12 = vmax.f32 %v8757_v54, %v1069_v8  ;;  %2595 = vmatprep.subr.bf16.mxu1 %v8682_v57  ;;  %v8592_v51 = vmax.f32 %v7019_v63, 0.0  ;;  %v8759_v8 = vld [vmem:[#allocation9_spill] sm:$0xff]  ;;  %v1035_v54 = vpop.permute.xlu0 %1034 }
 0x24b   : > { %v8760_v36 = vmax.f32 %v8758_v10, %v8759_v8  ;;  %2523 = vmatpush1.bf16.msra.mxu0 %v7007_v61  ;;  %2596 = vmatpush1.bf16.msra.mxu1 %v7012_v59  ;;  %v1037_v8 = vpop.permute.xlu1 %1036 }
 0x24c   : > { %v1129_v23 = vadd.f32 %v6667_v47, %v1101_v12  ;;  %v1787_v12 = vpack.c.bf16 %v8592_v51, %v8591_v30  ;;  %2524 = vmatprep.subr.bf16.mxu0 %v7029_v33  ;;  %2597 = vmatprep.subr.bf16.mxu1 %v8682_v57  ;;  %v1074_v48 = vsel %vm1068_vm2, %v1035_v54, %v1037_v8 }
 0x24d   : > { %v1103_v49 = vmax.f32 %v8760_v36, %v1071_v22  ;;  %v7062_v36 = vld [vmem:[%s8535_s3 + $0x124] ss:$12 sps:$4 sm:$0xff]   ;;  %v1106_v62 = vmax.f32 %v6148_v14, %v1074_v48 }
 0x24e   : > { %v1145_v22 = vmax.f32 %v1129_v23, 0.0  ;;  %v1041_v5 = vpop.permute.xlu0 %1040  ;;  %4854 = vmatprep.mubr.msk.bf16.mxu0 %vm2131_vm4, %v1787_v12  ;;  %4858 = vmatprep.mubr.msk.bf16.mxu1 %vm2131_vm4, %v1787_v12  ;;  %v7073_v23 = vld [vmem:[%s8535_s3 + $0x120] ss:$12 sps:$4 sm:$0xff]  }
 0x24f   : > { %v1131_v10 = vadd.f32 %v6667_v47, %v1103_v49  ;;  %2525 = vmatpush1.bf16.msra.mxu0 %v7045_v4  ;;  %2598 = vmatpush1.bf16.msra.mxu1 %v7050_v17  ;;  %v7078_v49 = vld [vmem:[%s8535_s3 + $0x128] ss:$12 sps:$4 sm:$0xff]   ;;  %v1043_v8 = vpop.permute.xlu1 %1042  ;;  %v7094_v26 = vadd.f32 %v6657_v38, %v1106_v62 }
 0x250   : > { %v7080_v14 = vrot.slane %v1145_v22, 1  ;;  %2526 = vmatprep.subr.bf16.mxu0 %v7062_v36  ;;  %2599 = vmatprep.subr.bf16.mxu1 %v8682_v57  ;;  %v7087_v12 = vld [vmem:[%s8535_s3 + $0x274] ss:$12 sps:$4 sm:$0xff]   ;;  %v1076_v30 = vsel %vm1068_vm2, %v1041_v5, %v1043_v8  ;;  %v7103_v8 = vld [vmem:[%s8535_s3 + $0x270] ss:$12 sps:$4 sm:$0xff]  }
 0x251   : > { %v1147_v55 = vmax.f32 %v1131_v10, 0.0  ;;  %8761 = vst [vmem:[#allocation27_spill] sm:$0xff] %v7103_v8  ;;  %v8612_v60 = vmax.f32 %v7094_v26, 0.0 }
 0x253   : > { %v1721_v48 = vrot.slane %v1147_v55, 1  ;;  %v1786_v10 = vpack.c.bf16 %v1147_v55, %v1145_v22  ;;  %v1108_v55 = vmax.f32 %v6156_v21, %v1076_v30  ;;  %v1033_v22 = vpop.permute.xlu0 %1032  ;;  %2527 = vmatpush1.bf16.msra.mxu0 %v7073_v23  ;;  %2600 = vmatpush1.bf16.msra.mxu1 %v7078_v49  ;;  %v8763_v21 = vld [vmem:[#allocation10_spill] sm:$0xff]  ;;  %v8764_v30 = vld [vmem:[#allocation11_spill] sm:$0xff]  ;;  %v1039_v2 = vpop.permute.xlu1 %1038 }
 0x254   : > { %v1073_v32 = vsel %vm1068_vm2, %v1033_v22, %v1035_v54  ;;  %v8765_v52 = vmax.f32 %v8763_v21, %v8764_v30  ;;  %2913 = vmatprep.subr.bf16.mxu0 %v7087_v12  ;;  %2986 = vmatprep.subr.bf16.mxu1 %v8682_v57  ;;  %v7121_v54 = vld [vmem:[%s8535_s3 + $0x28c] ss:$12 sps:$4 sm:$0xff]   ;;  %v1075_v22 = vsel %vm1068_vm2, %v1039_v2, %v1041_v5  ;;  %v8767_v21 = vld [vmem:[#allocation12_spill] sm:$0xff]  ;;  %v7135_v2 = vld [vmem:[%s8535_s3 + $0x288] ss:$12 sps:$4 sm:$0xff]  }
 0x255   : > { %v1750_v51 = vsel %vm1737_vm3, %v7080_v14, %v1721_v48  ;;  %v7111_v62 = vadd.f32 %v6657_v38, %v1108_v55  ;;  %8766 = vst [vmem:[#allocation28_spill] sm:$0xff] %v7121_v54  ;;  %8770 = vst [vmem:[#allocation40_spill] sm:$0xff] %v7135_v2 }
 0x256   : > { %v1105_v44 = vmax.f32 %v8765_v52, %v1073_v32  ;;  %v8768_v52 = vld [vmem:[#allocation13_spill] sm:$0xff]  ;;  %2535 = vmatmul.mubr.bf16.vlgmr.msra.gmra.mrb[48].mxu0 %v1786_v10  ;;  %2608 = vmatmul.mubr.bf16.vlgmr.msra.gmra.mrb[80].mxu1 %v1786_v10 }
 0x257   : > { %v8611_v55 = vmax.f32 %v7111_v62, 0.0  ;;  %v8769_v32 = vmax.f32 %v8767_v21, %v8768_v52  ;;  %v1047_v41 = vpop.permute.xlu0 %1046  ;;  %2914 = vmatpush1.bf16.msra.mxu0 %v7103_v8  ;;  %2987 = vmatpush1.bf16.msra.mxu1 %v7108_v42  ;;  %v1049_v21 = vpop.permute.xlu1 %1048  ;;  %v7152_v52 = vld [vmem:[%s8535_s3 + $0x2a4] ss:$12 sps:$4 sm:$0xff]  }
 0x258   : > { %v1133_v11 = vadd.f32 %v6667_v47, %v1105_v44  ;;  %v7140_v44 = vld [vmem:[%s8535_s3 + $0x290] ss:$12 sps:$4 sm:$0xff]   ;;  %2915 = vmatprep.subr.bf16.mxu0 %v7121_v54  ;;  %2988 = vmatprep.subr.bf16.mxu1 %v8682_v57  ;;  %8772 = vst [vmem:[#allocation41_spill] sm:$0xff] %v7152_v52 }
 0x259   : > { %v1107_v30 = vmax.f32 %v8769_v32, %v1075_v22  ;;  %8771 = vst [vmem:[#allocation29_spill] sm:$0xff] %v7140_v44  ;;  %v1789_v5 = vpack.c.bf16 %v8611_v55, %v8612_v60  ;;  %v1078_v32 = vsel %vm1068_vm2, %v1047_v41, %v1049_v21 }
 0x25a   : > { %v1149_v10 = vmax.f32 %v1133_v11, 0.0  ;;  %v1110_v34 = vmax.f32 %v6164_v27, %v1078_v32  ;;  %v7163_v11 = vld [vmem:[%s8535_s3 + $0x2a0] ss:$12 sps:$4 sm:$0xff]   ;;  %v7177_v32 = vld [vmem:[%s8535_s3 + $0x2bc] ss:$12 sps:$4 sm:$0xff]  }
 0x25b   : > { %v1135_v22 = vadd.f32 %v6667_v47, %v1107_v30  ;;  %v1053_v55 = vpop.permute.xlu0 %1052  ;;  %4855 = vmatprep.mubr.msk.bf16.mxu0 %vm2131_vm4, %v1789_v5  ;;  %4859 = vmatprep.mubr.msk.bf16.mxu1 %vm2131_vm4, %v1789_v5  ;;  %8773 = vst [vmem:[#allocation30_spill] sm:$0xff] %v7163_v11  ;;  %v7168_v30 = vld [vmem:[%s8535_s3 + $0x2a8] ss:$12 sps:$4 sm:$0xff]   ;;  %v1055_v21 = vpop.permute.xlu1 %1054  ;;  %8775 = vst [vmem:[#allocation32_spill] sm:$0xff] %v7177_v32 }
 0x25c   : > { %v1723_v42 = vrot.slane %v1149_v10, 1  ;;  %2916 = vmatpush1.bf16.msra.mxu0 %v7135_v2  ;;  %2989 = vmatpush1.bf16.msra.mxu1 %v7140_v44  ;;  %8774 = vst [vmem:[#allocation42_spill] sm:$0xff] %v7168_v30  ;;  %v1080_v60 = vsel %vm1068_vm2, %v1053_v55, %v1055_v21  ;;  %v7183_v2 = vadd.f32 %v6657_v38, %v1110_v34  ;;  %v7212_v21 = vld [vmem:[%s8535_s3 + $0x2d4] ss:$12 sps:$4 sm:$0xff]  }
 0x25d   : > { %v1151_v8 = vmax.f32 %v1135_v22, 0.0  ;;  %2917 = vmatprep.subr.bf16.mxu0 %v7152_v52  ;;  %2990 = vmatprep.subr.bf16.mxu1 %v8682_v57  ;;  %8781 = vst [vmem:[#allocation47_spill] sm:$0xff] %v7212_v21  ;;  %v7226_v52 = vld [vmem:[%s8535_s3 + $0x2d0] ss:$12 sps:$4 sm:$0xff]  }
 0x25e   : > { %v1748_v27 = vsel %vm1737_vm3, %v1721_v48, %v1723_v42  ;;  %v1112_v48 = vmax.f32 %v8701_v24, %v1080_v60  ;;  %v7199_v24 = vld [vmem:[%s8535_s3 + $0x2c0] ss:$12 sps:$4 sm:$0xff]   ;;  %v8779_v60 = vld [vmem:[#allocation15_spill] sm:$0xff]  ;;  %8785 = vst [vmem:[#allocation6_spill] sm:$0xff] %v7226_v52 }
 0x25f   : > { %v1725_v22 = vrot.slane %v1151_v8, 1  ;;  %v1788_v5 = vpack.c.bf16 %v1151_v8, %v1149_v10  ;;  %v7180_v44 = vpack.c.bf16 %v1748_v27, %v1750_v51  ;;  %v1045_v54 = vpop.permute.xlu0 %1044  ;;  %v7194_v51 = vld [vmem:[%s8535_s3 + $0x2b8] ss:$12 sps:$4 sm:$0xff]   ;;  %8777 = vst [vmem:[#allocation35_spill] sm:$0xff] %v7199_v24  ;;  %v1051_v27 = vpop.permute.xlu1 %1050 }
 0x260   : > { %v1077_v10 = vsel %vm1068_vm2, %v1045_v54, %v1047_v41  ;;  %2918 = vmatpush1.bf16.msra.mxu0 %v7163_v11  ;;  %2991 = vmatpush1.bf16.msra.mxu1 %v7168_v30  ;;  %8776 = vst [vmem:[#allocation44_spill] sm:$0xff] %v7194_v51  ;;  %v7202_v34 = vadd.f32 %v6657_v38, %v1112_v48  ;;  %v8625_v30 = vmax.f32 %v7183_v2, 0.0 }
 0x261   : > { %2545 = vmatmul.mubr.bf16.gmra.mrb[52].mxu0 %v1788_v5  ;;  %2616 = vmatmul.mubr.bf16.gmra.mrb[84].mxu1 %v1788_v5  ;;  %v1746_v8 = vsel %vm1737_vm3, %v1723_v42, %v1725_v22  ;;  %v8778_v42 = vld [vmem:[#allocation14_spill] sm:$0xff]  ;;  %v1079_v5 = vsel %vm1068_vm2, %v1051_v27, %v1053_v55  ;;  %v7231_v55 = vld [vmem:[%s8535_s3 + $0x2d8] ss:$12 sps:$4 sm:$0xff]  }
 0x262   : > { %v8780_v41 = vmax.f32 %v8778_v42, %v8779_v60  ;;  %2919 = vmatprep.subr.bf16.mxu0 %v7177_v32  ;;  %2992 = vmatprep.subr.bf16.mxu1 %v8682_v57  ;;  %v8624_v48 = vmax.f32 %v7202_v34, 0.0  ;;  %v8782_v42 = vld [vmem:[#allocation16_spill] sm:$0xff]  ;;  %8786 = vst [vmem:[#allocation7_spill] sm:$0xff] %v7231_v55 }
 0x263   : > { %v1059_v32 = vpop.permute.xlu0 %1058 }
 0x264   : > { %v1109_v54 = vmax.f32 %v8780_v41, %v1077_v10  ;;  %v8783_v10 = vld [vmem:[#allocation17_spill] sm:$0xff]  ;;  %2920 = vmatpush1.bf16.msra.mxu0 %v7194_v51  ;;  %2993 = vmatpush1.bf16.msra.mxu1 %v7199_v24 }
 0x265   : > { %v8784_v60 = vmax.f32 %v8782_v42, %v8783_v10  ;;  %v1061_v42 = vpop.permute.xlu1 %1060  ;;  %2921 = vmatprep.subr.bf16.mxu0 %v7212_v21  ;;  %2994 = vmatprep.subr.bf16.mxu1 %v8682_v57  ;;  %v7243_v10 = vld [vmem:[%s8535_s3 + $0x2ec] ss:$12 sps:$4 sm:$0xff]  }
 0x266   : > { %v1137_v11 = vadd.f32 %v6667_v47, %v1109_v54  ;;  %v1791_v54 = vpack.c.bf16 %v8624_v48, %v8625_v30  ;;  %8787 = vst [vmem:[#allocation8_spill] sm:$0xff] %v7243_v10 }
 0x267   : > { %v1111_v41 = vmax.f32 %v8784_v60, %v1079_v5  ;;  %v1082_v60 = vsel %vm1068_vm2, %v1059_v32, %v1061_v42  ;;  %v1065_v48 = vpop.permute.xlu0 %1064  ;;  %v7266_v42 = vld [vmem:[%s8535_s3 + $0x304] ss:$12 sps:$4 sm:$0xff]  }
 0x268   : > { %v1153_v27 = vmax.f32 %v1137_v11, 0.0  ;;  %v1114_v58 = vmax.f32 %v8714_v7, %v1082_v60  ;;  %4856 = vmatprep.mubr.msk.bf16.mxu0 %vm2131_vm4, %v1791_v54  ;;  %4860 = vmatprep.mubr.msk.bf16.mxu1 %vm2131_vm4, %v1791_v54  ;;  %v7254_v11 = vld [vmem:[%s8535_s3 + $0x2e8] ss:$12 sps:$4 sm:$0xff]   ;;  %8789 = vst [vmem:[#allocation10_spill] sm:$0xff] %v7266_v42 }
 0x269   : > { %v1139_v5 = vadd.f32 %v6667_v47, %v1111_v41  ;;  %2922 = vmatpush1.bf16.msra.mxu0 %v7226_v52  ;;  %2995 = vmatpush1.bf16.msra.mxu1 %v7231_v55  ;;  %v7259_v41 = vld [vmem:[%s8535_s3 + $0x2f0] ss:$12 sps:$4 sm:$0xff]  }
 0x26a   : > { %v1727_v24 = vrot.slane %v1153_v27, 1  ;;  %8788 = vst [vmem:[#allocation9_spill] sm:$0xff] %v7259_v41  ;;  %2923 = vmatprep.subr.bf16.mxu0 %v7243_v10  ;;  %2996 = vmatprep.subr.bf16.mxu1 %v8682_v57  ;;  %v7274_v52 = vadd.f32 %v6657_v38, %v1114_v58 }
 0x26b   : > { %v1155_v51 = vmax.f32 %v1139_v5, 0.0  ;;  %v1067_v5 = vpop.permute.xlu1 %1066  ;;  %v1057_v21 = vpop.permute.xlu0 %1056 }
 0x26c   : > { %v1744_v60 = vsel %vm1737_vm3, %v1725_v22, %v1727_v24  ;;  %v1084_v30 = vsel %vm1068_vm2, %v1065_v48, %v1067_v5  ;;  %v7285_v22 = vld [vmem:[%s8535_s3 + $0x300] ss:$12 sps:$4 sm:$0xff]   ;;  %v7303_v5 = vld [vmem:[%s8535_s3 + $0x31c] ss:$12 sps:$4 sm:$0xff]  }
 0x26d   : > { %v1729_v7 = vrot.slane %v1155_v51, 1  ;;  %v1790_v54 = vpack.c.bf16 %v1155_v51, %v1153_v27  ;;  %v7271_v55 = vpack.c.bf16 %v1744_v60, %v1746_v8  ;;  %v1116_v10 = vmax.f32 %v8715_v13, %v1084_v30  ;;  %2924 = vmatpush1.bf16.msra.mxu0 %v7254_v11  ;;  %2997 = vmatpush1.bf16.msra.mxu1 %v7259_v41  ;;  %v7290_v13 = vld [vmem:[%s8535_s3 + $0x308] ss:$12 sps:$4 sm:$0xff]   ;;  %v8791_v30 = vld [vmem:[#allocation19_spill] sm:$0xff]  ;;  %v8792_v8 = vld [vmem:[#allocation20_spill] sm:$0xff] }
 0x26e   : > { %v1081_v27 = vsel %vm1068_vm2, %v1057_v21, %v1059_v32  ;;  %8790 = vst [vmem:[#allocation11_spill] sm:$0xff] %v7290_v13  ;;  %v8793_v32 = vmax.f32 %v8791_v30, %v8792_v8  ;;  %2925 = vmatprep.subr.bf16.mxu0 %v7266_v42  ;;  %2998 = vmatprep.subr.bf16.mxu1 %v8682_v57  ;;  %v8634_v60 = vmax.f32 %v7274_v52, 0.0  ;;  %v8794_v30 = vld [vmem:[#allocation22_spill] sm:$0xff]  ;;  %v8797_v42 = vmax.f32 %v7094_v26, 0.0 }
 0x26f   : > { %2555 = vmatmul.mubr.bf16.gmra.mrb[56].mxu0 %v1790_v54  ;;  %2624 = vmatmul.mubr.bf16.gmra.mrb[88].mxu1 %v1790_v54  ;;  %v1742_v51 = vsel %vm1737_vm3, %v1727_v24, %v1729_v7  ;;  %v7293_v58 = vadd.f32 %v6657_v38, %v1116_v10  ;;  %v1063_v21 = vpop.permute.xlu1 %1062 }
 0x270   : > { %v1113_v24 = vmax.f32 %v8793_v32, %v1081_v27  ;;  %v1083_v54 = vsel %vm1068_vm2, %v1063_v21, %v1065_v48  ;;  %v8795_v27 = vld [vmem:[#allocation23_spill] sm:$0xff]  ;;  %v7314_v41 = vrot.slane %v8797_v42, 1 }
 0x271   : > { %v8633_v38 = vmax.f32 %v7293_v58, 0.0  ;;  %v8796_v8 = vmax.f32 %v8794_v30, %v8795_v27  ;;  %2926 = vmatpush1.bf16.msra.mxu0 %v7285_v22  ;;  %2999 = vmatpush1.bf16.msra.mxu1 %v7290_v13  ;;  %v7321_v48 = vld [vmem:[%s8535_s3 + $0x318] ss:$12 sps:$4 sm:$0xff]   ;;  %v8799_v30 = vmax.f32 %v7019_v63, 0.0 }
 0x272   : > { %v1141_v10 = vadd.f32 %v6667_v47, %v1113_v24  ;;  %v7326_v24 = vld [vmem:[%s8535_s3 + $0x320] ss:$12 sps:$4 sm:$0xff]   ;;  %2927 = vmatprep.subr.bf16.mxu0 %v7303_v5  ;;  %3000 = vmatprep.subr.bf16.mxu1 %v8682_v57  ;;  %v7358_v63 = vld [vmem:[%s8535_s3 + $0x338] ss:$12 sps:$4 sm:$0xff]  }
 0x273   : > { %v1115_v32 = vmax.f32 %v8796_v8, %v1083_v54  ;;  %v1793_v26 = vpack.c.bf16 %v8633_v38, %v8634_v60  ;;  %v7338_v54 = vld [vmem:[%s8535_s3 + $0x334] ss:$12 sps:$4 sm:$0xff]   ;;  %v1722_v27 = vrot.slane %v8799_v30, 1  ;;  %v7373_v38 = vld [vmem:[%s8535_s3 + $0x34c] ss:$12 sps:$4 sm:$0xff]  }
 0x274   : > { %v1157_v42 = vmax.f32 %v1141_v10, 0.0  ;;  %8798 = vst [vmem:[#allocation12_spill] sm:$0xff] %v7338_v54 }
 0x275   : > { %v1143_v21 = vadd.f32 %v6667_v47, %v1115_v32  ;;  %4857 = vmatprep.mubr.msk.bf16.mxu0 %vm2131_vm4, %v1793_v26  ;;  %4861 = vmatprep.mubr.msk.bf16.mxu1 %vm2131_vm4, %v1793_v26  ;;  %v8800_v47 = vmax.f32 %v6978_v56, 0.0  ;;  %v7353_v32 = vld [vmem:[%s8535_s3 + $0x330] ss:$12 sps:$4 sm:$0xff]   ;;  %v1749_v56 = vsel %vm1737_vm3, %v1722_v27, %v7314_v41 }
 0x276   : > { %v1731_v8 = vrot.slane %v1157_v42, 1  ;;  %2928 = vmatpush1.bf16.msra.mxu0 %v7321_v48  ;;  %3001 = vmatpush1.bf16.msra.mxu1 %v7326_v24 }
 0x277   : > { %v1159_v13 = vmax.f32 %v1143_v21, 0.0  ;;  %v7346_v10 = vrot.slane %v8800_v47, 1  ;;  %2929 = vmatprep.subr.bf16.mxu0 %v7338_v54  ;;  %3002 = vmatprep.subr.bf16.mxu1 %v8682_v57 }
 0x278   : > { %v1740_v30 = vsel %vm1737_vm3, %v1729_v7, %v1731_v8 }
 0x279   : > { %v1733_v26 = vrot.slane %v1159_v13, 1  ;;  %v1792_v21 = vpack.c.bf16 %v1159_v13, %v1157_v42  ;;  %v1751_v47 = vsel %vm1737_vm3, %v7346_v10, %v1722_v27  ;;  %v7375_v60 = vpack.c.bf16 %v1740_v30, %v1742_v51  ;;  %v7389_v51 = vld [vmem:[%s8535_s3 + $0x348] ss:$12 sps:$4 sm:$0xff]   ;;  %v7394_v42 = vld [vmem:[%s8535_s3 + $0x350] ss:$12 sps:$4 sm:$0xff]  }
 0x27a   : > { %v7377_v54 = vpack.c.bf16 %v1749_v56, %v1751_v47  ;;  %2930 = vmatpush1.bf16.msra.mxu0 %v7353_v32  ;;  %3003 = vmatpush1.bf16.msra.mxu1 %v7358_v63  ;;  %v7419_v56 = vld [vmem:[%s8535_s3 + $0x368] ss:$12 sps:$4 sm:$0xff]   ;;  %v7438_v30 = vld [vmem:[%s8535_s3 + $0x380] ss:$12 sps:$4 sm:$0xff]  }
 0x27b   : > { %2565 = vmatmul.mubr.bf16.gmra.mrb[60].mxu0 %v1792_v21  ;;  %2632 = vmatmul.mubr.bf16.gmra.mrb[92].mxu1 %v1792_v21  ;;  %v1738_v13 = vsel %vm1737_vm3, %v1731_v8, %v1733_v26  ;;  %v1752_v7 = vsel %vm1737_vm3, %v1733_v26, %v7080_v14  ;;  %v7405_v14 = vld [vmem:[%s8535_s3 + $0x364] ss:$12 sps:$4 sm:$0xff]   ;;  %v7414_v8 = vld [vmem:[%s8535_s3 + $0x360] ss:$12 sps:$4 sm:$0xff]   ;;  %8803 = vst [vmem:[#allocation15_spill] sm:$0xff] %v7419_v56  ;;  %8805 = vst [vmem:[#allocation17_spill] sm:$0xff] %v7438_v30 }
 0x27c   : > { %v7396_v27 = vpack.c.bf16 %v1752_v7, %v1738_v13  ;;  %4953 = vmatprep.mubr.msk.bf16.mxu0 %vm2131_vm4, %v7377_v54  ;;  %4957 = vmatprep.mubr.msk.bf16.mxu1 %vm2131_vm4, %v7377_v54  ;;  %8801 = vst [vmem:[#allocation13_spill] sm:$0xff] %v7405_v14  ;;  %8802 = vst [vmem:[#allocation14_spill] sm:$0xff] %v7414_v8  ;;  %v7426_v26 = vld [vmem:[%s8535_s3 + $0x37c] ss:$12 sps:$4 sm:$0xff]   ;;  %v7433_v21 = vld [vmem:[%s8535_s3 + $0x378] ss:$12 sps:$4 sm:$0xff]  }
 0x27d   : > { %2931 = vmatprep.subr.bf16.mxu0 %v7373_v38  ;;  %3004 = vmatprep.subr.bf16.mxu1 %v8682_v57  ;;  %8804 = vst [vmem:[#allocation16_spill] sm:$0xff] %v7426_v26  ;;  %v7445_v47 = vld [vmem:[%s8535_s3 + $0x394] ss:$12 sps:$4 sm:$0xff]   ;;  %v8807_v13 = vmax.f32 %v7183_v2, 0.0 }
 0x27e   : > { %2932 = vmatpush1.bf16.msra.mxu0 %v7389_v51  ;;  %3005 = vmatpush1.bf16.msra.mxu1 %v7394_v42  ;;  %8806 = vst [vmem:[#allocation19_spill] sm:$0xff] %v7445_v47 }
 0x27f   : > { %2933 = vmatprep.subr.bf16.mxu0 %v7405_v14  ;;  %3006 = vmatprep.subr.bf16.mxu1 %v8682_v57  ;;  %v1728_v7 = vrot.slane %v8807_v13, 1  ;;  %v5552_v13 = vld [vmem:[%s8535_s3 + $0x13c] ss:$12 sps:$4 sm:$0xff]  }
 0x282   : > { %2934 = vmatpush1.bf16.msra.mxu0 %v7414_v8  ;;  %3007 = vmatpush1.bf16.msra.mxu1 %v7419_v56  ;;  %v7454_v56 = vld [vmem:[%s8535_s3 + $0x390] ss:$12 sps:$4 sm:$0xff]   ;;  %v8809_v8 = vmax.f32 %v7111_v62, 0.0 }
 0x283   : > { %2935 = vmatprep.subr.bf16.mxu0 %v7426_v26  ;;  %3008 = vmatprep.subr.bf16.mxu1 %v8682_v57  ;;  %v7459_v26 = vld [vmem:[%s8535_s3 + $0x398] ss:$12 sps:$4 sm:$0xff]  }
 0x284   : > { %8808 = vst [vmem:[#allocation20_spill] sm:$0xff] %v7459_v26  ;;  %v1726_v14 = vrot.slane %v8809_v8, 1 }
 0x286   : > { %2936 = vmatpush1.bf16.msra.mxu0 %v7433_v21  ;;  %3009 = vmatpush1.bf16.msra.mxu1 %v7438_v30  ;;  %v1745_v2 = vsel %vm1737_vm3, %v1726_v14, %v1728_v7  ;;  %v1747_v62 = vsel %vm1737_vm3, %v7314_v41, %v1726_v14  ;;  %v5553_v41 = vld [vmem:[%s8535_s3 + $0x138] ss:$12 sps:$4 sm:$0xff]   ;;  %v5555_v14 = vld [vmem:[%s8535_s3 + $0x154] ss:$12 sps:$4 sm:$0xff]  }
 0x287   : > { %2937 = vmatprep.subr.bf16.mxu0 %v7445_v47  ;;  %3010 = vmatprep.subr.bf16.mxu1 %v8682_v57  ;;  %v7476_v8 = vpack.c.bf16 %v1745_v2, %v1747_v62  ;;  %v8810_v47 = vmax.f32 %v7274_v52, 0.0  ;;  %v5554_v52 = vld [vmem:[%s8535_s3 + $0x140] ss:$12 sps:$4 sm:$0xff]   ;;  %v5557_v2 = vld [vmem:[%s8535_s3 + $0x158] ss:$12 sps:$4 sm:$0xff]  }
 0x289   : > { %v1732_v30 = vrot.slane %v8810_v47, 1  ;;  %v5556_v47 = vld [vmem:[%s8535_s3 + $0x150] ss:$12 sps:$4 sm:$0xff]  }
 0x28a   : > { %2938 = vmatpush1.bf16.msra.mxu0 %v7454_v56  ;;  %3011 = vmatpush1.bf16.msra.mxu1 %v7459_v26 }
 0x28b   : > { %3075 = vmatprep.subr.bf16.mxu0 %v5552_v13  ;;  %3148 = vmatprep.subr.bf16.mxu1 %v8682_v57  ;;  %v8811_v13 = vmax.f32 %v7202_v34, 0.0 }
 0x28d   : > { %2946 = vmatmul.mubr.bf16.vlgmr.msra.gmra.mrb[48].mxu0 %v7180_v44  ;;  %3019 = vmatmul.mubr.bf16.vlgmr.msra.gmra.mrb[80].mxu1 %v7180_v44  ;;  %v1730_v26 = vrot.slane %v8811_v13, 1  ;;  %v5558_v13 = vld [vmem:[%s8535_s3 + $0x16c] ss:$12 sps:$4 sm:$0xff]  }
 0x28e   : > { %4954 = vmatprep.mubr.msk.bf16.mxu0 %vm2131_vm4, %v7476_v8  ;;  %4958 = vmatprep.mubr.msk.bf16.mxu1 %vm2131_vm4, %v7476_v8 }
 0x28f   : > { %3076 = vmatpush1.bf16.msra.mxu0 %v5553_v41  ;;  %3149 = vmatpush1.bf16.msra.mxu1 %v5554_v52  ;;  %v1741_v34 = vsel %vm1737_vm3, %v1730_v26, %v1732_v30  ;;  %v1743_v62 = vsel %vm1737_vm3, %v1728_v7, %v1730_v26  ;;  %v8812_v52 = vmax.f32 %v7293_v58, 0.0  ;;  %v5559_v26 = vld [vmem:[%s8535_s3 + $0x168] ss:$12 sps:$4 sm:$0xff]   ;;  %v5560_v58 = vld [vmem:[%s8535_s3 + $0x170] ss:$12 sps:$4 sm:$0xff]  }
 0x290   : > { %3077 = vmatprep.subr.bf16.mxu0 %v5555_v14  ;;  %3150 = vmatprep.subr.bf16.mxu1 %v8682_v57  ;;  %v7512_v41 = vpack.c.bf16 %v1741_v34, %v1743_v62  ;;  %v5561_v7 = vld [vmem:[%s8535_s3 + $0x184] ss:$12 sps:$4 sm:$0xff]   ;;  %v5563_v62 = vld [vmem:[%s8535_s3 + $0x188] ss:$12 sps:$4 sm:$0xff]  }
 0x291   : > { %v1734_v14 = vrot.slane %v8812_v52, 1  ;;  %v5566_v52 = vld [vmem:[%s8535_s3 + $0x1a0] ss:$12 sps:$4 sm:$0xff]  }
 0x293   : > { %3078 = vmatpush1.bf16.msra.mxu0 %v5556_v47  ;;  %3151 = vmatpush1.bf16.msra.mxu1 %v5557_v2  ;;  %v1739_v34 = vsel %vm1737_vm3, %v1732_v30, %v1734_v14  ;;  %v1753_v47 = vsel %vm1737_vm3, %v1734_v14, %v7346_v10  ;;  %v5562_v2 = vld [vmem:[%s8535_s3 + $0x180] ss:$12 sps:$4 sm:$0xff]   ;;  %v5565_v10 = vld [vmem:[%s8535_s3 + $0x198] ss:$12 sps:$4 sm:$0xff]  }
 0x294   : > { %3079 = vmatprep.subr.bf16.mxu0 %v5558_v13  ;;  %3152 = vmatprep.subr.bf16.mxu1 %v8682_v57  ;;  %v5564_v13 = vld [vmem:[%s8535_s3 + $0x19c] ss:$12 sps:$4 sm:$0xff]   ;;  %v7547_v30 = vpack.c.bf16 %v1753_v47, %v1739_v34  ;;  %v5567_v14 = vld [vmem:[%s8535_s3 + $0x1b4] ss:$12 sps:$4 sm:$0xff]  }
 0x295   : > { %2956 = vmatmul.mubr.bf16.gmra.mrb[52].mxu0 %v7271_v55  ;;  %3027 = vmatmul.mubr.bf16.gmra.mrb[84].mxu1 %v7271_v55  ;;  %v5571_v34 = vld [vmem:[%s8535_s3 + $0x1c8] ss:$12 sps:$4 sm:$0xff]   ;;  %v5572_v47 = vld [vmem:[%s8535_s3 + $0x1d0] ss:$12 sps:$4 sm:$0xff]  }
 0x296   : > { %4955 = vmatprep.mubr.msk.bf16.mxu0 %vm2131_vm4, %v7512_v41  ;;  %4959 = vmatprep.mubr.msk.bf16.mxu1 %vm2131_vm4, %v7512_v41 }
 0x297   : > { %3080 = vmatpush1.bf16.msra.mxu0 %v5559_v26  ;;  %3153 = vmatpush1.bf16.msra.mxu1 %v5560_v58  ;;  %v5568_v26 = vld [vmem:[%s8535_s3 + $0x1b0] ss:$12 sps:$4 sm:$0xff]   ;;  %v5569_v58 = vld [vmem:[%s8535_s3 + $0x1b8] ss:$12 sps:$4 sm:$0xff]  }
 0x298   : > { %3081 = vmatprep.subr.bf16.mxu0 %v5561_v7  ;;  %3154 = vmatprep.subr.bf16.mxu1 %v8682_v57  ;;  %v5570_v7 = vld [vmem:[%s8535_s3 + $0x1cc] ss:$12 sps:$4 sm:$0xff]  }
 0x29b   : > { %3082 = vmatpush1.bf16.msra.mxu0 %v5562_v2  ;;  %3155 = vmatpush1.bf16.msra.mxu1 %v5563_v62  ;;  %v5573_v2 = vld [vmem:[%s8535_s3 + $0x1e4] ss:$12 sps:$4 sm:$0xff]   ;;  %v5575_v62 = vld [vmem:[%s8535_s3 + $0x1e8] ss:$12 sps:$4 sm:$0xff]  }
 0x29c   : > { %3083 = vmatprep.subr.bf16.mxu0 %v5564_v13  ;;  %3156 = vmatprep.subr.bf16.mxu1 %v8682_v57  ;;  %v5576_v13 = vld [vmem:[%s8535_s3 + $0x1fc] ss:$12 sps:$4 sm:$0xff]  }
 0x29d   : > { %2966 = vmatmul.mubr.bf16.gmra.mrb[56].mxu0 %v7375_v60  ;;  %3035 = vmatmul.mubr.bf16.gmra.mrb[88].mxu1 %v7375_v60 }
 0x29e   : > { %4956 = vmatprep.mubr.msk.bf16.mxu0 %vm2131_vm4, %v7547_v30  ;;  %4960 = vmatprep.mubr.msk.bf16.mxu1 %vm2131_vm4, %v7547_v30 }
 0x29f   : > { %3084 = vmatpush1.bf16.msra.mxu0 %v5565_v10  ;;  %3157 = vmatpush1.bf16.msra.mxu1 %v5566_v52  ;;  %v5577_v10 = vld [vmem:[%s8535_s3 + $0x1f8] ss:$12 sps:$4 sm:$0xff]   ;;  %v5578_v52 = vld [vmem:[%s8535_s3 + $0x200] ss:$12 sps:$4 sm:$0xff]  }
 0x2a0   : > { %3085 = vmatprep.subr.bf16.mxu0 %v5567_v14  ;;  %3158 = vmatprep.subr.bf16.mxu1 %v8682_v57  ;;  %v5579_v14 = vld [vmem:[%s8535_s3 + $0x214] ss:$12 sps:$4 sm:$0xff]  }
 0x2a3   : > { %3086 = vmatpush1.bf16.msra.mxu0 %v5568_v26  ;;  %3159 = vmatpush1.bf16.msra.mxu1 %v5569_v58  ;;  %v5580_v26 = vld [vmem:[%s8535_s3 + $0x210] ss:$12 sps:$4 sm:$0xff]   ;;  %v5581_v58 = vld [vmem:[%s8535_s3 + $0x218] ss:$12 sps:$4 sm:$0xff]  }
 0x2a4   : > { %3087 = vmatprep.subr.bf16.mxu0 %v5570_v7  ;;  %3160 = vmatprep.subr.bf16.mxu1 %v8682_v57  ;;  %v5582_v7 = vld [vmem:[%s8535_s3 + $0x22c] ss:$12 sps:$4 sm:$0xff]  }
 0x2a5   : > { %2976 = vmatmul.mubr.bf16.gmra.mrb[60].mxu0 %v7396_v27  ;;  %3043 = vmatmul.mubr.bf16.gmra.mrb[92].mxu1 %v7396_v27 }
 0x2a6   : > { %4961 = vmatprep.mubr.msk.bf16.mxu0 %vm2131_vm4, %v7377_v54  ;;  %4965 = vmatprep.mubr.msk.bf16.mxu1 %vm2131_vm4, %v7377_v54  ;;  %v5574_v54 = vld [vmem:[%s8535_s3 + $0x1e0] ss:$12 sps:$4 sm:$0xff]  }
 0x2a7   : > { %3088 = vmatpush1.bf16.msra.mxu0 %v5571_v34  ;;  %3161 = vmatpush1.bf16.msra.mxu1 %v5572_v47  ;;  %v5583_v34 = vld [vmem:[%s8535_s3 + $0x228] ss:$12 sps:$4 sm:$0xff]   ;;  %v5584_v47 = vld [vmem:[%s8535_s3 + $0x230] ss:$12 sps:$4 sm:$0xff]  }
 0x2a8   : > { %3089 = vmatprep.subr.bf16.mxu0 %v5573_v2  ;;  %3162 = vmatprep.subr.bf16.mxu1 %v8682_v57  ;;  %v5585_v2 = vld [vmem:[%s8535_s3 + $0x244] ss:$12 sps:$4 sm:$0xff]  }
 0x2ab   : > { %3090 = vmatpush1.bf16.msra.mxu0 %v5574_v54  ;;  %3163 = vmatpush1.bf16.msra.mxu1 %v5575_v62  ;;  %v5586_v54 = vld [vmem:[%s8535_s3 + $0x240] ss:$12 sps:$4 sm:$0xff]   ;;  %v5587_v62 = vld [vmem:[%s8535_s3 + $0x248] ss:$12 sps:$4 sm:$0xff]  }
 0x2ac   : > { %3091 = vmatprep.subr.bf16.mxu0 %v5576_v13  ;;  %3164 = vmatprep.subr.bf16.mxu1 %v8682_v57  ;;  %v5588_v13 = vld [vmem:[%s8535_s3 + $0x25c] ss:$12 sps:$4 sm:$0xff]  }
 0x2af   : > { %3092 = vmatpush1.bf16.msra.mxu0 %v5577_v10  ;;  %3165 = vmatpush1.bf16.msra.mxu1 %v5578_v52  ;;  %v5589_v10 = vld [vmem:[%s8535_s3 + $0x258] ss:$12 sps:$4 sm:$0xff]   ;;  %v5590_v52 = vld [vmem:[%s8535_s3 + $0x260] ss:$12 sps:$4 sm:$0xff]  }
 0x2b0   : > { %3093 = vmatprep.subr.bf16.mxu0 %v5579_v14  ;;  %3166 = vmatprep.subr.bf16.mxu1 %v8682_v57  ;;  %v5591_v14 = vld [vmem:[%s8535_s3 + $0x4] ss:$12 sps:$4 sm:$0xff]  }
 0x2b3   : > { %3094 = vmatpush1.bf16.msra.mxu0 %v5580_v26  ;;  %3167 = vmatpush1.bf16.msra.mxu1 %v5581_v58  ;;  %v5592_v26 = vld [vmem:[%s8535_s3] ss:$12 sps:$4 sm:$0xff]   ;;  %v5593_v58 = vld [vmem:[%s8535_s3 + $0x8] ss:$12 sps:$4 sm:$0xff]  }
 0x2b4   : > { %3095 = vmatprep.subr.bf16.mxu0 %v5582_v7  ;;  %3168 = vmatprep.subr.bf16.mxu1 %v8682_v57  ;;  %v5596_v7 = vld [vmem:[%s8535_s3 + $0x20] ss:$12 sps:$4 sm:$0xff]  }
 0x2b7   : > { %3096 = vmatpush1.bf16.msra.mxu0 %v5583_v34  ;;  %3169 = vmatpush1.bf16.msra.mxu1 %v5584_v47  ;;  %v5597_v34 = vld [vmem:[%s8535_s3 + $0x34] ss:$12 sps:$4 sm:$0xff]   ;;  %v5598_v47 = vld [vmem:[%s8535_s3 + $0x30] ss:$12 sps:$4 sm:$0xff]  }
 0x2b8   : > { %3097 = vmatprep.subr.bf16.mxu0 %v5585_v2  ;;  %3170 = vmatprep.subr.bf16.mxu1 %v8682_v57  ;;  %v5599_v2 = vld [vmem:[%s8535_s3 + $0x38] ss:$12 sps:$4 sm:$0xff]  }
 0x2bb   : > { %3098 = vmatpush1.bf16.msra.mxu0 %v5586_v54  ;;  %3171 = vmatpush1.bf16.msra.mxu1 %v5587_v62 }
 0x2bc   : > { %3099 = vmatprep.subr.bf16.mxu0 %v5588_v13  ;;  %3172 = vmatprep.subr.bf16.mxu1 %v8682_v57 }
 0x2bf   : > { %3100 = vmatpush1.bf16.msra.mxu0 %v5589_v10  ;;  %3173 = vmatpush1.bf16.msra.mxu1 %v5590_v52 }
 0x2c0   : > { %3213 = vmatprep.subr.bf16.mxu0 %v5591_v14  ;;  %3286 = vmatprep.subr.bf16.mxu1 %v8682_v57 }
 0x2c2   : > { %3108 = vmatmul.mubr.bf16.vlgmr.msra.gmra.mrb[64].mxu0 %v7180_v44  ;;  %3181 = vmatmul.mubr.bf16.vlgmr.msra.gmra.mrb[96].mxu1 %v7180_v44  ;;  %v5594_v44 = vld [vmem:[%s8535_s3 + $0x1c] ss:$12 sps:$4 sm:$0xff]  }
 0x2c3   : > { %4962 = vmatprep.mubr.msk.bf16.mxu0 %vm2131_vm4, %v7476_v8  ;;  %4966 = vmatprep.mubr.msk.bf16.mxu1 %vm2131_vm4, %v7476_v8  ;;  %v5595_v8 = vld [vmem:[%s8535_s3 + $0x18] ss:$12 sps:$4 sm:$0xff]  }
 0x2c4   : > { %3214 = vmatpush1.bf16.msra.mxu0 %v5592_v26  ;;  %3287 = vmatpush1.bf16.msra.mxu1 %v5593_v58 }
 0x2c5   : > { %3215 = vmatprep.subr.bf16.mxu0 %v5594_v44  ;;  %3288 = vmatprep.subr.bf16.mxu1 %v8682_v57 }
 0x2c8   : > { %3216 = vmatpush1.bf16.msra.mxu0 %v5595_v8  ;;  %3289 = vmatpush1.bf16.msra.mxu1 %v5596_v7 }
 0x2c9   : > { %3217 = vmatprep.subr.bf16.mxu0 %v5597_v34  ;;  %3290 = vmatprep.subr.bf16.mxu1 %v8682_v57 }
 0x2ca   : > { %3118 = vmatmul.mubr.bf16.gmra.mrb[68].mxu0 %v7271_v55  ;;  %3189 = vmatmul.mubr.bf16.gmra.mrb[100].mxu1 %v7271_v55  ;;  %v5600_v55 = vld [vmem:[%s8535_s3 + $0x4c] ss:$12 sps:$4 sm:$0xff]  }
 0x2cb   : > { %4963 = vmatprep.mubr.msk.bf16.mxu0 %vm2131_vm4, %v7512_v41  ;;  %4967 = vmatprep.mubr.msk.bf16.mxu1 %vm2131_vm4, %v7512_v41 }
 0x2cc   : > { %3218 = vmatpush1.bf16.msra.mxu0 %v5598_v47  ;;  %3291 = vmatpush1.bf16.msra.mxu1 %v5599_v2 }
 0x2cd   : > { %3219 = vmatprep.subr.bf16.mxu0 %v5600_v55  ;;  %3292 = vmatprep.subr.bf16.mxu1 %v8682_v57 }
 0x2d0   : > { %3220 = vmatpush1.bf16.msra.mxu0 %v6752_v19  ;;  %3293 = vmatpush1.bf16.msra.mxu1 %v6757_v28  ;;  %v8816_v19 = vld [vmem:[#allocation39_spill] sm:$0xff]  ;;  %v8817_v28 = vld [vmem:[#allocation28_spill] sm:$0xff] }
 0x2d1   : > { %3221 = vmatprep.subr.bf16.mxu0 %v6767_v46  ;;  %3294 = vmatprep.subr.bf16.mxu1 %v8682_v57  ;;  %v8818_v46 = vld [vmem:[#allocation40_spill] sm:$0xff] }
 0x2d2   : > { %3128 = vmatmul.mubr.bf16.gmra.mrb[72].mxu0 %v7375_v60  ;;  %3197 = vmatmul.mubr.bf16.gmra.mrb[104].mxu1 %v7375_v60  ;;  %v8847_v60 = vld [vmem:[#allocation31_spill] sm:$0xff] }
 0x2d3   : > { %4964 = vmatprep.mubr.msk.bf16.mxu0 %vm2131_vm4, %v7547_v30  ;;  %4968 = vmatprep.mubr.msk.bf16.mxu1 %vm2131_vm4, %v7547_v30 }
 0x2d4   : > { %3222 = vmatpush1.bf16.msra.mxu0 %v6778_v40  ;;  %3295 = vmatpush1.bf16.msra.mxu1 %v6783_v25  ;;  %v8819_v40 = vld [vmem:[#allocation29_spill] sm:$0xff] }
 0x2d5   : > { %3223 = vmatprep.subr.bf16.mxu0 %v6793_v50  ;;  %3296 = vmatprep.subr.bf16.mxu1 %v8682_v57  ;;  %v8820_v25 = vld [vmem:[#allocation41_spill] sm:$0xff]  ;;  %v8821_v50 = vld [vmem:[#allocation43_spill] sm:$0xff] }
 0x2d8   : > { %3224 = vmatpush1.bf16.msra.mxu0 %v6812_v20  ;;  %3297 = vmatpush1.bf16.msra.mxu1 %v6817_v53  ;;  %v8822_v20 = vld [vmem:[#allocation46_spill] sm:$0xff] }
 0x2d9   : > { %3225 = vmatprep.subr.bf16.mxu0 %v6834_v16  ;;  %3298 = vmatprep.subr.bf16.mxu1 %v8682_v57  ;;  %v8823_v53 = vld [vmem:[#allocation30_spill] sm:$0xff] }
 0x2da   : > { %3138 = vmatmul.mubr.bf16.gmra.mrb[76].mxu0 %v7396_v27  ;;  %3205 = vmatmul.mubr.bf16.gmra.mrb[108].mxu1 %v7396_v27  ;;  %v8824_v16 = vld [vmem:[#allocation42_spill] sm:$0xff] }
 0x2db   : > { %4969 = vmatprep.mubr.msk.bf16.mxu0 %vm2131_vm4, %v6684_v15  ;;  %4973 = vmatprep.mubr.msk.bf16.mxu1 %vm2131_vm4, %v6684_v15  ;;  %v8815_v15 = vld [vmem:[#allocation27_spill] sm:$0xff] }
 0x2dc   : > { %3226 = vmatpush1.bf16.msra.mxu0 %v6856_v6  ;;  %3299 = vmatpush1.bf16.msra.mxu1 %v6861_v3  ;;  %v8825_v6 = vld [vmem:[#allocation32_spill] sm:$0xff] }
 0x2dd   : > { %3227 = vmatprep.subr.bf16.mxu0 %v6872_v18  ;;  %3300 = vmatprep.subr.bf16.mxu1 %v8682_v57  ;;  %v8826_v3 = vld [vmem:[#allocation44_spill] sm:$0xff]  ;;  %v8827_v18 = vld [vmem:[#allocation35_spill] sm:$0xff] }
 0x2e0   : > { %3228 = vmatpush1.bf16.msra.mxu0 %v6890_v39  ;;  %3301 = vmatpush1.bf16.msra.mxu1 %v6895_v35  ;;  %v8828_v39 = vld [vmem:[#allocation47_spill] sm:$0xff]  ;;  %v8829_v35 = vld [vmem:[#allocation34_spill] sm:$0xff] }
 0x2e1   : > { %3229 = vmatprep.subr.bf16.mxu0 %v6911_v29  ;;  %3302 = vmatprep.subr.bf16.mxu1 %v8682_v57  ;;  %v8830_v29 = vld [vmem:[#allocation25_spill] sm:$0xff] }
 0x2e4   : > { %3230 = vmatpush1.bf16.msra.mxu0 %v6930_v9  ;;  %3303 = vmatpush1.bf16.msra.mxu1 %v6935_v31  ;;  %v8831_v9 = vld [vmem:[#allocation6_spill] sm:$0xff]  ;;  %v8832_v31 = vld [vmem:[#allocation7_spill] sm:$0xff] }
 0x2e5   : > { %3231 = vmatprep.subr.bf16.mxu0 %v6945_v0  ;;  %3304 = vmatprep.subr.bf16.mxu1 %v8682_v57  ;;  %v8833_v0 = vld [vmem:[#allocation8_spill] sm:$0xff] }
 0x2e8   : > { %3232 = vmatpush1.bf16.msra.mxu0 %v6962_v1  ;;  %3305 = vmatpush1.bf16.msra.mxu1 %v6967_v45  ;;  %v8834_v1 = vld [vmem:[#allocation9_spill] sm:$0xff]  ;;  %v8835_v45 = vld [vmem:[#allocation10_spill] sm:$0xff] }
 0x2e9   : > { %3233 = vmatprep.subr.bf16.mxu0 %v6984_v43  ;;  %3306 = vmatprep.subr.bf16.mxu1 %v8682_v57  ;;  %v8813_v43 = vld [vmem:[#allocation18_spill] sm:$0xff] }
 0x2ec   : > { %3234 = vmatpush1.bf16.msra.mxu0 %v7007_v61  ;;  %3307 = vmatpush1.bf16.msra.mxu1 %v7012_v59  ;;  %v8836_v61 = vld [vmem:[#allocation24_spill] sm:$0xff]  ;;  %v8837_v59 = vld [vmem:[#allocation45_spill] sm:$0xff] }
 0x2ed   : > { %3235 = vmatprep.subr.bf16.mxu0 %v7029_v33  ;;  %3308 = vmatprep.subr.bf16.mxu1 %v8682_v57  ;;  %v8814_v33 = vld [vmem:[#allocation33_spill] sm:$0xff] }
 0x2f0   : > { %3236 = vmatpush1.bf16.msra.mxu0 %v7045_v4  ;;  %3309 = vmatpush1.bf16.msra.mxu1 %v7050_v17  ;;  %v8838_v4 = vld [vmem:[#allocation11_spill] sm:$0xff]  ;;  %v8839_v17 = vld [vmem:[#allocation12_spill] sm:$0xff] }
 0x2f1   : > { %3237 = vmatprep.subr.bf16.mxu0 %v7062_v36  ;;  %3310 = vmatprep.subr.bf16.mxu1 %v8682_v57  ;;  %v8840_v36 = vld [vmem:[#allocation13_spill] sm:$0xff] }
 0x2f4   : > { %3238 = vmatpush1.bf16.msra.mxu0 %v7073_v23  ;;  %3311 = vmatpush1.bf16.msra.mxu1 %v7078_v49  ;;  %v8841_v23 = vld [vmem:[#allocation14_spill] sm:$0xff]  ;;  %v8842_v49 = vld [vmem:[#allocation15_spill] sm:$0xff] }
 0x2f5   : > { %3363 = vmatprep.subr.bf16.mxu0 %v7087_v12  ;;  %3436 = vmatprep.subr.bf16.mxu1 %v8682_v57  ;;  %v8843_v12 = vld [vmem:[#allocation16_spill] sm:$0xff] }
 0x2f7   : > { %3246 = vmatmul.mubr.bf16.vlgmr.msra.gmra.mrb[64].mxu0 %v8813_v43  ;;  %3319 = vmatmul.mubr.bf16.vlgmr.msra.gmra.mrb[96].mxu1 %v8813_v43 }
 0x2f8   : > { %4970 = vmatprep.mubr.msk.bf16.mxu0 %vm2131_vm4, %v8814_v33  ;;  %4974 = vmatprep.mubr.msk.bf16.mxu1 %vm2131_vm4, %v8814_v33 }
 0x2f9   : > { %3364 = vmatpush1.bf16.msra.mxu0 %v8815_v15  ;;  %3437 = vmatpush1.bf16.msra.mxu1 %v8816_v19 }
 0x2fa   : > { %3365 = vmatprep.subr.bf16.mxu0 %v8817_v28  ;;  %3438 = vmatprep.subr.bf16.mxu1 %v8682_v57 }
 0x2fd   : > { %3366 = vmatpush1.bf16.msra.mxu0 %v8818_v46  ;;  %3439 = vmatpush1.bf16.msra.mxu1 %v8819_v40 }
 0x2fe   : > { %3367 = vmatprep.subr.bf16.mxu0 %v8820_v25  ;;  %3440 = vmatprep.subr.bf16.mxu1 %v8682_v57 }
 0x2ff   : > { %3256 = vmatmul.mubr.bf16.gmra.mrb[68].mxu0 %v8821_v50  ;;  %3327 = vmatmul.mubr.bf16.gmra.mrb[100].mxu1 %v8821_v50 }
 0x300   : > { %4971 = vmatprep.mubr.msk.bf16.mxu0 %vm2131_vm4, %v8822_v20  ;;  %4975 = vmatprep.mubr.msk.bf16.mxu1 %vm2131_vm4, %v8822_v20 }
 0x301   : > { %3368 = vmatpush1.bf16.msra.mxu0 %v8823_v53  ;;  %3441 = vmatpush1.bf16.msra.mxu1 %v8824_v16  ;;  %v5502_v16 = vld [vmem:[%s8537_s5 + $0x50] sm:$0xff]  }
 0x302   : > { %3369 = vmatprep.subr.bf16.mxu0 %v8825_v6  ;;  %3442 = vmatprep.subr.bf16.mxu1 %v8682_v57  ;;  %v5503_v6 = vld [vmem:[%s8537_s5] sm:$0xff]  }
 0x305   : > { %3370 = vmatpush1.bf16.msra.mxu0 %v8826_v3  ;;  %3443 = vmatpush1.bf16.msra.mxu1 %v8827_v18 }
 0x306   : > { %3371 = vmatprep.subr.bf16.mxu0 %v8828_v39  ;;  %3444 = vmatprep.subr.bf16.mxu1 %v8682_v57 }
 0x307   : > { %3266 = vmatmul.mubr.bf16.gmra.mrb[72].mxu0 %v8829_v35  ;;  %3335 = vmatmul.mubr.bf16.gmra.mrb[104].mxu1 %v8829_v35 }
 0x308   : > { %4972 = vmatprep.mubr.msk.bf16.mxu0 %vm2131_vm4, %v8830_v29  ;;  %4976 = vmatprep.mubr.msk.bf16.mxu1 %vm2131_vm4, %v8830_v29 }
 0x309   : > { %3372 = vmatpush1.bf16.msra.mxu0 %v8831_v9  ;;  %3445 = vmatpush1.bf16.msra.mxu1 %v8832_v31 }
 0x30a   : > { %3373 = vmatprep.subr.bf16.mxu0 %v8833_v0  ;;  %3446 = vmatprep.subr.bf16.mxu1 %v8682_v57 }
 0x30d   : > { %3374 = vmatpush1.bf16.msra.mxu0 %v7254_v11  ;;  %3447 = vmatpush1.bf16.msra.mxu1 %v8834_v1  ;;  %v8844_v11 = vld [vmem:[#allocation17_spill] sm:$0xff] }
 0x30e   : > { %3375 = vmatprep.subr.bf16.mxu0 %v8835_v45  ;;  %3448 = vmatprep.subr.bf16.mxu1 %v8682_v57 }
 0x30f   : > { %3276 = vmatmul.mubr.bf16.gmra.mrb[76].mxu0 %v8836_v61  ;;  %3343 = vmatmul.mubr.bf16.gmra.mrb[108].mxu1 %v8836_v61 }
 0x310   : > { %4977 = vmatprep.mubr.msk.bf16.mxu0 %vm2131_vm4, %v8837_v59  ;;  %4981 = vmatprep.mubr.msk.bf16.mxu1 %vm2131_vm4, %v8837_v59 }
 0x311   : > { %3376 = vmatpush1.bf16.msra.mxu0 %v7285_v22  ;;  %3449 = vmatpush1.bf16.msra.mxu1 %v8838_v4  ;;  %v8845_v22 = vld [vmem:[#allocation19_spill] sm:$0xff] }
 0x312   : > { %3377 = vmatprep.subr.bf16.mxu0 %v7303_v5  ;;  %3450 = vmatprep.subr.bf16.mxu1 %v8682_v57  ;;  %v8846_v5 = vld [vmem:[#allocation20_spill] sm:$0xff] }
 0x315   : > { %3378 = vmatpush1.bf16.msra.mxu0 %v7321_v48  ;;  %3451 = vmatpush1.bf16.msra.mxu1 %v7326_v24  ;;  %v8849_v48 = vld [vmem:[#allocation48_spill] sm:$0xff]  ;;  %v8850_v24 = vld [vmem:[#allocation37_spill] sm:$0xff] }
 0x316   : > { %3379 = vmatprep.subr.bf16.mxu0 %v8839_v17  ;;  %3452 = vmatprep.subr.bf16.mxu1 %v8682_v57  ;;  %v5504_v17 = vld [vmem:[%s8537_s5 + $0x58] sm:$0xff]  }
 0x319   : > { %3380 = vmatpush1.bf16.msra.mxu0 %v7353_v32  ;;  %3453 = vmatpush1.bf16.msra.mxu1 %v7358_v63  ;;  %v8851_v32 = vld [vmem:[#allocation21_spill] sm:$0xff]  ;;  %v8852_v63 = vld [vmem:[#allocation26_spill] sm:$0xff] }
 0x31a   : > { %3381 = vmatprep.subr.bf16.mxu0 %v7373_v38  ;;  %3454 = vmatprep.subr.bf16.mxu1 %v8682_v57  ;;  %v8848_v38 = vld [vmem:[#allocation36_spill] sm:$0xff] }
 0x31d   : > { %3382 = vmatpush1.bf16.msra.mxu0 %v7389_v51  ;;  %3455 = vmatpush1.bf16.msra.mxu1 %v7394_v42  ;;  %v8853_v51 = vld [vmem:[#allocation38_spill] sm:$0xff] }
 0x31e   : > { %3383 = vmatprep.subr.bf16.mxu0 %v8840_v36  ;;  %3456 = vmatprep.subr.bf16.mxu1 %v8682_v57  ;;  %v5505_v36 = vld [vmem:[%s8537_s5 + $0x8] sm:$0xff]  }
 0x321   : > { %3384 = vmatpush1.bf16.msra.mxu0 %v8841_v23  ;;  %3457 = vmatpush1.bf16.msra.mxu1 %v8842_v49 }
 0x322   : > { %3385 = vmatprep.subr.bf16.mxu0 %v8843_v12  ;;  %3458 = vmatprep.subr.bf16.mxu1 %v8682_v57 }
 0x325   : > { %3386 = vmatpush1.bf16.msra.mxu0 %v7433_v21  ;;  %3459 = vmatpush1.bf16.msra.mxu1 %v8844_v11  ;;  %v5506_v11 = vld [vmem:[%s8537_s5 + $0x60] sm:$0xff]  }
 0x326   : > { %3387 = vmatprep.subr.bf16.mxu0 %v8845_v22  ;;  %3460 = vmatprep.subr.bf16.mxu1 %v8682_v57  ;;  %v5507_v22 = vld [vmem:[%s8537_s5 + $0x10] sm:$0xff]  }
 0x329   : > { %3388 = vmatpush1.bf16.msra.mxu0 %v7454_v56  ;;  %3461 = vmatpush1.bf16.msra.mxu1 %v8846_v5 }
 0x32a   : > { %3873 = vmatprep.subr.bf16.mxu0 %v8682_v57  ;;  %4007 = vmatprep.subr.bf16.mxu1 %v8682_v57 }
 0x32c   : > { %3396 = vmatmul.mubr.bf16.vlgmr.msra.gmra.mrb[64].mxu0 %v8847_v60  ;;  %3469 = vmatmul.mubr.bf16.vlgmr.msra.gmra.mrb[96].mxu1 %v8847_v60 }
 0x32d   : > { %4978 = vmatprep.mubr.msk.bf16.mxu0 %vm2131_vm4, %v8848_v38  ;;  %4982 = vmatprep.mubr.msk.bf16.mxu1 %vm2131_vm4, %v8848_v38 }
 0x32e   : > { %3874 = vmatpush1.bf16.msra.mxu0 %v5502_v16  ;;  %4008 = vmatpush1.bf16.msra.mxu1 %v5503_v6 }
 0x32f   : > { %3875 = vmatprep.subr.bf16.mxu0 %v8682_v57  ;;  %4009 = vmatprep.subr.bf16.mxu1 %v8682_v57 }
 0x332   : > { %3876 = vmatpush1.bf16.msra.mxu0 %v5504_v17  ;;  %4010 = vmatpush1.bf16.msra.mxu1 %v5505_v36 }
 0x333   : > { %3877 = vmatprep.subr.bf16.mxu0 %v8682_v57  ;;  %4011 = vmatprep.subr.bf16.mxu1 %v8682_v57 }
 0x334   : > { %3406 = vmatmul.mubr.bf16.gmra.mrb[68].mxu0 %v8849_v48  ;;  %3477 = vmatmul.mubr.bf16.gmra.mrb[100].mxu1 %v8849_v48 }
 0x335   : > { %4979 = vmatprep.mubr.msk.bf16.mxu0 %vm2131_vm4, %v8850_v24  ;;  %4983 = vmatprep.mubr.msk.bf16.mxu1 %vm2131_vm4, %v8850_v24 }
 0x336   : > { %3878 = vmatpush1.bf16.msra.mxu0 %v5506_v11  ;;  %4012 = vmatpush1.bf16.msra.mxu1 %v5507_v22 }
 0x337   : > { %3879 = vmatprep.subr.bf16.mxu0 %v8682_v57  ;;  %4013 = vmatprep.subr.bf16.mxu1 %v8682_v57 }
 0x33c   : > { %3416 = vmatmul.mubr.bf16.gmra.mrb[72].mxu0 %v8851_v32  ;;  %3485 = vmatmul.mubr.bf16.gmra.mrb[104].mxu1 %v8851_v32 }
 0x33d   : > { %4980 = vmatprep.mubr.msk.bf16.mxu0 %vm2131_vm4, %v8852_v63  ;;  %4984 = vmatprep.mubr.msk.bf16.mxu1 %vm2131_vm4, %v8852_v63 }
 0x344   : > { %3426 = vmatmul.mubr.bf16.gmra.mrb[76].mxu0 %v8853_v51  ;;  %3493 = vmatmul.mubr.bf16.gmra.mrb[108].mxu1 %v8853_v51 }
 0x360   : > { %v7841_v42 = vpop.f32.mrb[48].mxu0  ;;  %v3020_v27 = vpop.f32.mrb[80].mxu1 }
 0x361   : > { %v2949_v56 = vpop.f32.mrb[49].mxu0  ;;  %v3022_v21 = vpop.f32.mrb[81].mxu1 }
 0x362   : > { %v7843_v41 = vpop.f32.mrb[50].mxu0  ;;  %v3023_v30 = vpop.f32.mrb[82].mxu1 }
 0x363   : > { %v2953_v54 = vpop.f32.mrb[51].mxu0  ;;  %v3025_v62 = vpop.f32.mrb[83].mxu1 }
 0x368   : > { %v7845_v13 = vpop.f32.mrb[52].mxu0  ;;  %v7847_v10 = vpop.f32.mrb[84].mxu1 }
 0x369   : > { %v2959_v52 = vpop.f32.mrb[53].mxu0  ;;  %v3030_v14 = vpop.f32.mrb[85].mxu1 }
 0x36a   : > { %v7849_v26 = vpop.f32.mrb[54].mxu0  ;;  %v7851_v58 = vpop.f32.mrb[86].mxu1 }
 0x36b   : > { %v7853_v44 = vpop.f32.mrb[55].mxu0  ;;  %v3033_v8 = vpop.f32.mrb[87].mxu1 }
 0x370   : > { %v7855_v7 = vpop.f32.mrb[56].mxu0  ;;  %v7857_v34 = vpop.f32.mrb[88].mxu1 }
 0x371   : > { %v7859_v47 = vpop.f32.mrb[57].mxu0  ;;  %v3038_v2 = vpop.f32.mrb[89].mxu1 }
 0x372   : > { %v7861_v55 = vpop.f32.mrb[58].mxu0  ;;  %v7863_v43 = vpop.f32.mrb[90].mxu1 }
 0x373   : > { %v7865_v33 = vpop.f32.mrb[59].mxu0  ;;  %v3041_v15 = vpop.f32.mrb[91].mxu1 }
 0x378   : > { %v7867_v19 = vpop.f32.mrb[60].mxu0  ;;  %v7869_v28 = vpop.f32.mrb[92].mxu1 }
 0x379   : > { %v7871_v46 = vpop.f32.mrb[61].mxu0  ;;  %v3046_v40 = vpop.f32.mrb[93].mxu1 }
 0x37a   : > { %v7873_v25 = vpop.f32.mrb[62].mxu0  ;;  %v7875_v50 = vpop.f32.mrb[94].mxu1 }
 0x37b   : > { %v7877_v20 = vpop.f32.mrb[63].mxu0  ;;  %v3049_v53 = vpop.f32.mrb[95].mxu1 }
 0x3ff   : > { %v7885_v3 = vpop.f32.mrb[64].mxu0  ;;  %v3470_v18 = vpop.f32.mrb[96].mxu1 }
 0x400   : > { %v3525_v39 = vmax.f32 %v7841_v42, %v7885_v3  ;;  %v3527_v35 = vmax.f32 %v3020_v27, %v3470_v18  ;;  %v3399_v29 = vpop.f32.mrb[65].mxu0  ;;  %v3472_v9 = vpop.f32.mrb[97].mxu1 }
 0x401   : > { %v7891_v31 = vmax.f32 %v2949_v56, %v3399_v29  ;;  %v7893_v0 = vpop.f32.mrb[66].mxu0  ;;  %v3473_v1 = vpop.f32.mrb[98].mxu1  ;;  %v5512_v29 = vld [vmem:[%s8537_s5 + $0x78] sm:$0xff]   ;;  %v5513_v9 = vld [vmem:[%s8537_s5 + $0x28] sm:$0xff]  }
 0x402   : > { %v3528_v45 = vmax.f32 %v7843_v41, %v7893_v0  ;;  %v3530_v61 = vmax.f32 %v3023_v30, %v3473_v1  ;;  %3567 = vrot.lane.b32.xlu1 %v3527_v35, %s5667_s16  ;;  %v3403_v59 = vpop.f32.mrb[67].mxu0  ;;  %v3475_v4 = vpop.f32.mrb[99].mxu1 }
 0x403   : > { %v7904_v23 = vmax.f32 %v2953_v54, %v3403_v59  ;;  %3565 = vrot.lane.b32.xlu0 %v7891_v31, %s5667_s16 }
 0x406   : > { %3571 = vrot.lane.b32.xlu1 %v3530_v61, %s5667_s16 }
 0x407   : > { %v3478_v49 = vpop.f32.mrb[100].mxu1  ;;  %3569 = vrot.lane.b32.xlu0 %v7904_v23, %s5667_s16  ;;  %v7913_v12 = vpop.f32.mrb[68].mxu0 }
 0x408   : > { %v3533_v5 = vmax.f32 %v7847_v10, %v3478_v49  ;;  %v3531_v60 = vmax.f32 %v7845_v13, %v7913_v12  ;;  %v3409_v38 = vpop.f32.mrb[69].mxu0  ;;  %v3480_v48 = vpop.f32.mrb[101].mxu1  ;;  %v5508_v10 = vld [vmem:[%s8537_s5 + $0x68] sm:$0xff]  }
 0x409   : > { %v7924_v24 = vmax.f32 %v2959_v52, %v3409_v38  ;;  %v7926_v32 = vpop.f32.mrb[70].mxu0  ;;  %v3481_v63 = vpop.f32.mrb[102].mxu1  ;;  %v5509_v52 = vld [vmem:[%s8537_s5 + $0x18] sm:$0xff]   ;;  %3880 = vmatpush1.bf16.msra.mxu0 %v5508_v10  ;;  %v8854_v10 = vsub.s32 1, %v6649_v37 }
 0x40a   : > { %v3534_v51 = vmax.f32 %v7849_v26, %v7926_v32  ;;  %v3536_v27 = vmax.f32 %v7851_v58, %v3481_v63  ;;  %3575 = vrot.lane.b32.xlu1 %v3533_v5, %s5667_s16  ;;  %v3413_v56 = vpop.f32.mrb[71].mxu0  ;;  %v3483_v21 = vpop.f32.mrb[103].mxu1  ;;  %4014 = vmatpush1.bf16.msra.mxu1 %v5509_v52  ;;  %v5517_v48 = vld [vmem:[%s8537_s5 + $0x38] sm:$0xff]   ;;  %v5518_v63 = vld [vmem:[%s8537_s5 + $0x90] sm:$0xff]  }
 0x40b   : > { %v7934_v30 = vmax.f32 %v7853_v44, %v3413_v56  ;;  %3573 = vrot.lane.b32.xlu0 %v7924_v24, %s5667_s16  ;;  %3881 = vmatprep.subr.bf16.mxu0 %v8682_v57  ;;  %v5520_v56 = vld [vmem:[%s8537_s5 + $0x98] sm:$0xff]   ;;  %v5521_v21 = vld [vmem:[%s8537_s5 + $0x48] sm:$0xff]  }
 0x40c   : > { %4015 = vmatprep.subr.bf16.mxu1 %v8682_v57 }
 0x40e   : > { %3579 = vrot.lane.b32.xlu1 %v3536_v27, %s5667_s16  ;;  %v5519_v27 = vld [vmem:[%s8537_s5 + $0x40] sm:$0xff]  }
 0x40f   : > { %v3486_v54 = vpop.f32.mrb[104].mxu1  ;;  %3577 = vrot.lane.b32.xlu0 %v7934_v30, %s5667_s16  ;;  %v7942_v62 = vpop.f32.mrb[72].mxu0 }
 0x410   : > { %v3539_v14 = vmax.f32 %v7857_v34, %v3486_v54  ;;  %v3537_v58 = vmax.f32 %v7855_v7, %v7942_v62  ;;  %v3419_v44 = vpop.f32.mrb[73].mxu0  ;;  %v3488_v8 = vpop.f32.mrb[105].mxu1  ;;  %v3638_v54 = vld [vmem:[%s8536_s4] sm:$0x3] }
 0x411   : > { %v7954_v2 = vmax.f32 %v7859_v47, %v3419_v44  ;;  %v7956_v15 = vpop.f32.mrb[74].mxu0  ;;  %v3489_v40 = vpop.f32.mrb[106].mxu1  ;;  %v5510_v47 = vld [vmem:[%s8537_s5 + $0x70] sm:$0xff]   ;;  %v8047_v52 = vrot.slane %v3638_v54, %v8854_v10  ;;  %v8855_v8 = vsub.s32 0, %v6649_v37 }
 0x412   : > { %v3540_v53 = vmax.f32 %v7861_v55, %v7956_v15  ;;  %v3542_v16 = vmax.f32 %v7863_v43, %v3489_v40  ;;  %3583 = vrot.lane.b32.xlu1 %v3539_v14, %s5667_s16  ;;  %v3423_v34 = vpop.f32.mrb[75].mxu0  ;;  %v3491_v6 = vpop.f32.mrb[107].mxu1  ;;  %v5511_v43 = vld [vmem:[%s8537_s5 + $0x20] sm:$0xff]   ;;  %3882 = vmatpush1.bf16.msra.mxu0 %v5510_v47 }
 0x413   : > { %v7964_v18 = vmax.f32 %v7865_v33, %v3423_v34  ;;  %3581 = vrot.lane.b32.xlu0 %v7954_v2, %s5667_s16  ;;  %4016 = vmatpush1.bf16.msra.mxu1 %v5511_v43  ;;  %v8052_v40 = vrot.slane %v3638_v54, %v8855_v8 }
 0x414   : > { %3883 = vmatprep.subr.bf16.mxu0 %v8682_v57  ;;  %4017 = vmatprep.subr.bf16.mxu1 %v8682_v57 }
 0x416   : > { %3587 = vrot.lane.b32.xlu1 %v3542_v16, %s5667_s16  ;;  %3884 = vmatpush1.bf16.msra.mxu0 %v5512_v29 }
 0x417   : > { %v3494_v33 = vpop.f32.mrb[108].mxu1  ;;  %3585 = vrot.lane.b32.xlu0 %v7964_v18, %s5667_s16  ;;  %v7979_v35 = vpop.f32.mrb[76].mxu0  ;;  %4018 = vmatpush1.bf16.msra.mxu1 %v5513_v9 }
 0x418   : > { %v3545_v1 = vmax.f32 %v7869_v28, %v3494_v33  ;;  %v3543_v61 = vmax.f32 %v7867_v19, %v7979_v35  ;;  %v3429_v59 = vpop.f32.mrb[77].mxu0  ;;  %v3496_v4 = vpop.f32.mrb[109].mxu1  ;;  %3885 = vmatprep.subr.bf16.mxu0 %v8682_v57  ;;  %4019 = vmatprep.subr.bf16.mxu1 %v8682_v57 }
 0x419   : > { %v7992_v17 = vmax.f32 %v7871_v46, %v3429_v59  ;;  %v7994_v36 = vpop.f32.mrb[78].mxu0  ;;  %v3497_v49 = vpop.f32.mrb[110].mxu1  ;;  %v5514_v46 = vld [vmem:[%s8537_s5 + $0x80] sm:$0xff]  }
 0x41a   : > { %v3546_v11 = vmax.f32 %v7873_v25, %v7994_v36  ;;  %v3548_v22 = vmax.f32 %v7875_v50, %v3497_v49  ;;  %3591 = vrot.lane.b32.xlu1 %v3545_v1, %s5667_s16  ;;  %v3433_v28 = vpop.f32.mrb[79].mxu0  ;;  %v3499_v5 = vpop.f32.mrb[111].mxu1  ;;  %v5515_v50 = vld [vmem:[%s8537_s5 + $0x30] sm:$0xff]   ;;  %3886 = vmatpush1.bf16.msra.mxu0 %v5514_v46 }
 0x41b   : > { %v8002_v38 = vmax.f32 %v7877_v20, %v3433_v28  ;;  %3589 = vrot.lane.b32.xlu0 %v7992_v17, %s5667_s16  ;;  %4020 = vmatpush1.bf16.msra.mxu1 %v5515_v50  ;;  %v5516_v20 = vld [vmem:[%s8537_s5 + $0x88] sm:$0xff]  }
 0x41c   : > { %3887 = vmatprep.subr.bf16.mxu0 %v8682_v57  ;;  %4021 = vmatprep.subr.bf16.mxu1 %v8682_v57 }
 0x41e   : > { %3595 = vrot.lane.b32.xlu1 %v3548_v22, %s5667_s16  ;;  %3888 = vmatpush1.bf16.msra.mxu0 %v5516_v20 }
 0x41f   : > { %3593 = vrot.lane.b32.xlu0 %v8002_v38, %s5667_s16  ;;  %4022 = vmatpush1.bf16.msra.mxu1 %v5517_v48  ;;  %s5668_s16 = smov [#allocation3]  }
 0x420   : > { %3889 = vmatprep.subr.bf16.mxu0 %v8682_v57  ;;  %4023 = vmatprep.subr.bf16.mxu1 %v8682_v57  ;;  %s5605_s8 = sshll.u32 %s5668_s16, 4  ;;  %s5606_s8 = int_to_ptr.vmem [resolvable:$false] %s5605_s8 }
 0x421   : > { %s5607_s9 = scalar_lea.vmem %s5606_s8, 256  ;;  %p5608_p2 = scmp.lt.s32.totalorder %s8490_s18, %s5606_s8 }
 0x422   : > { %3890 = vmatpush1.bf16.msra.mxu0 %v5518_v63  ;;  %p5609_p3 = scmp.lt.s32.totalorder %s5607_s9, %s5601_s28 }
 0x423   : > { %4024 = vmatpush1.bf16.msra.mxu1 %v5519_v27  ;;  %3891 = vmatprep.subr.bf16.mxu0 %v8682_v57 }
 0x424   : > { %4025 = vmatprep.subr.bf16.mxu1 %v8682_v57  ;;  %p5610_p4 = por %p5609_p3, %p5608_p2 }
 0x426   : > { %3892 = vmatpush1.bf16.msra.mxu0 %v5520_v56  ;;  %p5611_p5 = pnand %p5610_p4, %p5604_p1 }
 0x427   : > { %4026 = vmatpush1.bf16.msra.mxu1 %v5521_v21  ;;  %4162 = vmatprep.subr.bf16.mxu0 %v8682_v57 }
 0x428   : > { %4318 = vmatprep.subr.bf16.mxu1 %v8682_v57 }
 0x474   : > { %v3568_v14 = vpop.permute.xlu1 %3567 }
 0x475   : > { %v3623_v44 = vmax.f32 %v7891_v31, %v3568_v14  ;;  %v3566_v16 = vpop.permute.xlu0 %3565 }
 0x476   : > { %v3598_v34 = vsel %vm3597_vm5, %v3566_v16, %v3568_v14 }
 0x477   : > { %v3651_v6 = vadd.f32 %v8047_v52, %v3623_v44  ;;  %v3622_v47 = vmax.f32 %v3525_v39, %v3598_v34 }
 0x478   : > { %v3572_v43 = vpop.permute.xlu1 %3571 }
 0x479   : > { %v3667_v33 = vmax.f32 %v3651_v6, 0.0  ;;  %v3650_v29 = vadd.f32 %v8052_v40, %v3622_v47  ;;  %v3625_v9 = vmax.f32 %v7904_v23, %v3572_v43  ;;  %v3570_v31 = vpop.permute.xlu0 %3569 }
 0x47a   : > { %v3599_v37 = vsel %vm3597_vm5, %v3570_v31, %v3572_v43 }
 0x47b   : > { %v3666_v1 = vmax.f32 %v3650_v29, 0.0  ;;  %v3653_v59 = vadd.f32 %v8047_v52, %v3625_v9  ;;  %v3624_v4 = vmax.f32 %v3528_v45, %v3599_v37  ;;  %v3683_v49 = vpack.c.bf16 %v3667_v33, %v3667_v33 }
 0x47c   : > { %v3576_v22 = vpop.permute.xlu1 %3575 }
 0x47d   : > { %v3682_v42 = vpack.c.bf16 %v3666_v1, %v3666_v1  ;;  %v3669_v3 = vmax.f32 %v3653_v59, 0.0  ;;  %v3652_v39 = vadd.f32 %v8052_v40, %v3624_v4  ;;  %v3574_v28 = vpop.permute.xlu0 %3573  ;;  %v3627_v5 = vmax.f32 %v7924_v24, %v3576_v22 }
 0x47e   : > { %v3600_v23 = vsel %vm3597_vm5, %v3574_v28, %v3576_v22  ;;  %v8069_v46 = vunpack.c.l.b16 %v3683_v49 }
 0x47f   : > { %v3685_v50 = vpack.c.bf16 %v3669_v3, %v3669_v3  ;;  %v3668_v20 = vmax.f32 %v3652_v39, 0.0  ;;  %v3655_v48 = vadd.f32 %v8047_v52, %v3627_v5  ;;  %v8072_v41 = vunpack.c.l.b16 %v3682_v42 }
 0x480   : > { %v3580_v63 = vpop.permute.xlu1 %3579  ;;  %v3626_v0 = vmax.f32 %v3531_v60, %v3600_v23  ;;  %v3792_v10 = vrot.slane %v8069_v46, 1  ;;  %v4082_v14 = vrot.slane %v8069_v46, 2  ;;  %v4238_v60 = vrot.slane %v8069_v46, 3 }
 0x481   : > { %v3629_v45 = vmax.f32 %v7934_v30, %v3580_v63  ;;  %v3578_v27 = vpop.permute.xlu0 %3577  ;;  %v8078_v24 = vunpack.c.l.b16 %v3685_v50  ;;  %v3684_v56 = vpack.c.bf16 %v3668_v20, %v3668_v20  ;;  %v3671_v21 = vmax.f32 %v3655_v48, 0.0 }
 0x482   : > { %v3654_v54 = vadd.f32 %v8052_v40, %v3626_v0  ;;  %v3601_v13 = vsel %vm3597_vm5, %v3578_v27, %v3580_v63  ;;  %v3771_v30 = vrot.slane %v8072_v41, 1  ;;  %v4068_v8 = vrot.slane %v8072_v41, 2 }
 0x483   : > { %v3657_v44 = vadd.f32 %v8047_v52, %v3629_v45  ;;  %v4083_v16 = vrot.slane %v8078_v24, 1  ;;  %v4224_v6 = vrot.slane %v8072_v41, 3  ;;  %v8090_v47 = vunpack.c.l.b16 %v3684_v56 }
 0x484   : > { %v3584_v12 = vpop.permute.xlu1 %3583  ;;  %v3687_v43 = vpack.c.bf16 %v3671_v21, %v3671_v21  ;;  %v3670_v33 = vmax.f32 %v3654_v54, 0.0  ;;  %v8094_v29 = vsel %vm3772_vm6, %v8078_v24, %v3792_v10  ;;  %v3628_v31 = vmax.f32 %v3534_v51, %v3601_v13 }
 0x485   : > { %v3582_v34 = vpop.permute.xlu0 %3581  ;;  %v3673_v9 = vmax.f32 %v3657_v44, 0.0  ;;  %v3631_v37 = vmax.f32 %v7954_v2, %v3584_v12  ;;  %v3927_v1 = vrot.slane %v8078_v24, 7  ;;  %v3773_v59 = vsel %vm3772_vm6, %v8090_v47, %v3771_v30 }
 0x486   : > { %v3913_v4 = vrot.slane %v8090_v47, 7  ;;  %v4069_v49 = vrot.slane %v8090_v47, 1  ;;  %v8105_v42 = vunpack.c.l.b16 %v3687_v43  ;;  %v4084_v3 = vsel %vm3772_vm6, %v4083_v16, %v4082_v14 }
 0x487   : > { %v3686_v39 = vpack.c.bf16 %v3670_v33, %v3670_v33  ;;  %v3689_v28 = vpack.c.bf16 %v3673_v9, %v3673_v9  ;;  %v3656_v2 = vadd.f32 %v8052_v40, %v3628_v31  ;;  %v3659_v5 = vadd.f32 %v8047_v52, %v3631_v37 }
 0x488   : > { %v3588_v22 = vpop.permute.xlu1 %3587  ;;  %v3914_v32 = vsel %vm3772_vm6, %v3913_v4, %v8072_v41  ;;  %v4070_v51 = vsel %vm3772_vm6, %v4069_v49, %v4068_v8  ;;  %v4239_v23 = vrot.slane %v8078_v24, 2  ;;  %v4225_v50 = vrot.slane %v8090_v47, 2 }
 0x489   : > { %v3586_v26 = vpop.permute.xlu0 %3585  ;;  %v4381_v20 = vrot.slane %v8090_v47, 3  ;;  %v3794_v48 = vrot.slane %v8105_v42, 7  ;;  %v3929_v63 = vrot.slane %v8105_v42, 6  ;;  %v8118_v0 = vunpack.c.l.b16 %v3686_v39 }
 0x48a   : > { %v8120_v45 = vunpack.c.l.b16 %v3689_v28  ;;  %v3672_v27 = vmax.f32 %v3656_v2, 0.0  ;;  %v8124_v21 = vsel %vm3775_vm7, %v8105_v42, %v4084_v3  ;;  %v3675_v54 = vmax.f32 %v3659_v5, 0.0 }
 0x48b   : > { %v3602_v10 = vsel %vm3597_vm5, %v3582_v34, %v3584_v12  ;;  %v3633_v14 = vmax.f32 %v7964_v18, %v3588_v22  ;;  %v3774_v44 = vrot.slane %v8118_v0, 7  ;;  %v3915_v13 = vrot.slane %v8118_v0, 6 }
 0x48c   : > { %v3592_v56 = vpop.permute.xlu1 %3591  ;;  %v8132_v30 = vsel %vm3775_vm7, %v8118_v0, %v4070_v51  ;;  %v3603_v8 = vsel %vm3597_vm5, %v3586_v26, %v3588_v22  ;;  %v4241_v43 = vrot.slane %v8105_v42, 1  ;;  %v4227_v33 = vrot.slane %v8118_v0, 1 }
 0x48d   : > { %v3590_v16 = vpop.permute.xlu0 %3589  ;;  %v4383_v9 = vrot.slane %v8118_v0, 2  ;;  %v3796_v12 = vrot.slane %v8120_v45, 6  ;;  %v8140_v18 = vsel %vm3775_vm7, %v3774_v44, %v3773_v59  ;;  %v8143_v34 = vsel %vm3775_vm7, %v3915_v13, %v3914_v32  ;;  %v5530_v0 = vld [vmem:[%s8537_s5 + $0xc0] sm:$0xff]  }
 0x48e   : > { %v3931_v31 = vrot.slane %v8120_v45, 5  ;;  %v3688_v37 = vpack.c.bf16 %v3672_v27, %v3672_v27  ;;  %v3691_v49 = vpack.c.bf16 %v3675_v54, %v3675_v54  ;;  %v3630_v22 = vmax.f32 %v3537_v58, %v3602_v10 }
 0x48f   : > { %v3661_v3 = vadd.f32 %v8047_v52, %v3633_v14  ;;  %v3632_v59 = vmax.f32 %v3540_v53, %v3603_v8  ;;  %v4086_v39 = vrot.slane %v8120_v45, 7  ;;  %v3635_v26 = vmax.f32 %v7992_v17, %v3592_v56 }
 0x490   : > { %v3596_v4 = vpop.permute.xlu1 %3595  ;;  %v8154_v28 = vunpack.c.l.b16 %v3688_v37  ;;  %v8158_v51 = vunpack.c.l.b16 %v3691_v49  ;;  %v3658_v7 = vadd.f32 %v8052_v40, %v3630_v22  ;;  %v3604_v2 = vsel %vm3597_vm5, %v3590_v16, %v3592_v56 }
 0x491   : > { %v3637_v32 = vmax.f32 %v8002_v38, %v3596_v4  ;;  %v3677_v62 = vmax.f32 %v3661_v3, 0.0  ;;  %v3660_v58 = vadd.f32 %v8052_v40, %v3632_v59  ;;  %v3594_v5 = vpop.permute.xlu0 %3593  ;;  %v3663_v13 = vadd.f32 %v8047_v52, %v3635_v26 }
 0x492   : > { %v3777_v55 = vrot.slane %v8154_v28, 6  ;;  %v3917_v15 = vrot.slane %v8154_v28, 5  ;;  %v4072_v53 = vrot.slane %v8154_v28, 7  ;;  %v3798_v17 = vrot.slane %v8158_v51, 5 }
 0x493   : > { %v3933_v38 = vrot.slane %v8158_v51, 4  ;;  %v4088_v27 = vrot.slane %v8158_v51, 6  ;;  %v4244_v54 = vrot.slane %v8158_v51, 7  ;;  %v3674_v10 = vmax.f32 %v3658_v7, 0.0 }
 0x494   : > { %v3693_v14 = vpack.c.bf16 %v3677_v62, %v3677_v62  ;;  %v3676_v44 = vmax.f32 %v3660_v58, 0.0  ;;  %v3634_v8 = vmax.f32 %v3543_v61, %v3604_v2  ;;  %v3665_v56 = vadd.f32 %v8047_v52, %v3637_v32 }
 0x495   : > { %v3605_v16 = vsel %vm3597_vm5, %v3594_v5, %v3596_v4  ;;  %v3795_v37 = vsel %vm3775_vm7, %v3794_v48, %v8094_v29  ;;  %v3690_v49 = vpack.c.bf16 %v3674_v10, %v3674_v10  ;;  %v3679_v59 = vmax.f32 %v3663_v13, 0.0 }
 0x496   : > { %v8178_v22 = vunpack.c.l.b16 %v3693_v14  ;;  %v3692_v3 = vpack.c.bf16 %v3676_v44, %v3676_v44  ;;  %v3662_v26 = vadd.f32 %v8052_v40, %v3634_v8  ;;  %v3681_v7 = vmax.f32 %v3665_v56, 0.0 }
 0x497   : > { %v3636_v19 = vmax.f32 %v3546_v11, %v3605_v16  ;;  %v3797_v35 = vsel %vm3778_vm8, %v3796_v12, %v3795_v37  ;;  %v8185_v61 = vunpack.c.l.b16 %v3690_v49  ;;  %v3695_v4 = vpack.c.bf16 %v3679_v59, %v3679_v59 }
 0x498   : > { %v8187_v52 = vunpack.c.l.b16 %v3692_v3  ;;  %v3799_v29 = vsel %vm3781_vm9, %v3798_v17, %v3797_v35  ;;  %v3678_v48 = vmax.f32 %v3662_v26, 0.0  ;;  %v3697_v32 = vpack.c.bf16 %v3681_v7, %v3681_v7 }
 0x499   : > { %v3664_v62 = vadd.f32 %v8052_v40, %v3636_v19  ;;  %v3800_v58 = vrot.slane %v8178_v22, 4  ;;  %v3780_v2 = vrot.slane %v8185_v61, 5  ;;  %v3919_v25 = vrot.slane %v8185_v61, 4 }
 0x49a   : > { %v4074_v36 = vrot.slane %v8185_v61, 6  ;;  %v4230_v11 = vrot.slane %v8185_v61, 7  ;;  %v3783_v12 = vrot.slane %v8187_v52, 4  ;;  %v3921_v5 = vrot.slane %v8187_v52, 3 }
 0x49b   : > { %v8198_v17 = vunpack.c.l.b16 %v3695_v4  ;;  %v3694_v10 = vpack.c.bf16 %v3678_v48, %v3678_v48  ;;  %v8200_v14 = vunpack.c.l.b16 %v3697_v32  ;;  %v3680_v40 = vmax.f32 %v3664_v62, 0.0 }
 0x49c   : > { %v3801_v44 = vsel %vm3784_vm10, %v3800_v58, %v3799_v29  ;;  %v3928_v13 = vsel %vm3772_vm6, %v3927_v1, %v8069_v46  ;;  %v3935_v37 = vrot.slane %v8178_v22, 3  ;;  %v3779_v62 = vsel %vm3778_vm8, %v3777_v55, %v8140_v18 }
 0x49d   : > { %v8207_v8 = vunpack.c.l.b16 %v3694_v10  ;;  %v3802_v56 = vrot.slane %v8198_v17, 3  ;;  %v3930_v16 = vsel %vm3775_vm7, %v3929_v63, %v3928_v13  ;;  %v3696_v49 = vpack.c.bf16 %v3680_v40, %v3680_v40 }
 0x49e   : > { %v3804_v3 = vrot.slane %v8200_v14, 2  ;;  %v3932_v59 = vsel %vm3778_vm8, %v3931_v31, %v3930_v16  ;;  %v3937_v26 = vrot.slane %v8198_v17, 2  ;;  %v3939_v48 = vrot.slane %v8200_v14, 1 }
 0x49f   : > { %v3786_v1 = vrot.slane %v8207_v8, 3  ;;  %v3923_v7 = vrot.slane %v8207_v8, 2  ;;  %v3803_v19 = vsel %vm3787_vm11, %v3802_v56, %v3801_v44  ;;  %v3934_v35 = vsel %vm3781_vm9, %v3933_v38, %v3932_v59 }
 0x4a0   : > { %v8223_v63 = vunpack.c.l.b16 %v3696_v49  ;;  %v3805_v4 = vsel %vm3790_vm12, %v3804_v3, %v3803_v19  ;;  %v3936_v29 = vsel %vm3784_vm10, %v3935_v37, %v3934_v35  ;;  %v3918_v38 = vsel %vm3778_vm8, %v3917_v15, %v8143_v34  ;;  %v5523_v37 = vld [vmem:[%s8537_s5 + $0xf0] sm:$0xff]  }
 0x4a1   : > { %v3807_v32 = vpack.c.b16 %v3805_v4, %v3805_v4  ;;  %v3938_v31 = vsel %vm3787_vm11, %v3937_v26, %v3936_v29  ;;  %v3782_v10 = vsel %vm3781_vm9, %v3780_v2, %v3779_v62  ;;  %v3920_v44 = vsel %vm3781_vm9, %v3919_v25, %v3918_v38 }
 0x4a2   : > { %v3940_v58 = vsel %vm3790_vm12, %v3939_v48, %v3938_v31  ;;  %v3789_v40 = vrot.slane %v8223_v63, 2  ;;  %v3785_v56 = vsel %vm3784_vm10, %v3783_v12, %v3782_v10  ;;  %v3922_v18 = vsel %vm3784_vm10, %v3921_v5, %v3920_v44  ;;  %v5522_v5 = vld [vmem:[%s8537_s5 + $0xa0] sm:$0xff]  }
 0x4a3   : > { %5015 = vmatprep.mubr.msk.bf16.mxu0 %vm3869_vm13, %v3807_v32  ;;  %v3942_v13 = vpack.c.b16 %v3940_v58, %v3940_v58  ;;  %v3925_v55 = vrot.slane %v8223_v63, 1  ;;  %v3788_v16 = vsel %vm3787_vm11, %v3786_v1, %v3785_v56  ;;  %v3924_v34 = vsel %vm3787_vm11, %v3923_v7, %v3922_v18  ;;  %v5524_v32 = vld [vmem:[%s8537_s5 + $0xa8] sm:$0xff]   ;;  %v5526_v18 = vld [vmem:[%s8537_s5 + $0xb0] sm:$0xff]  }
 0x4a4   : > { %v4087_v15 = vsel %vm3778_vm8, %v4086_v39, %v8124_v21  ;;  %v4090_v2 = vrot.slane %v8178_v22, 5  ;;  %v3791_v25 = vsel %vm3790_vm12, %v3789_v40, %v3788_v16  ;;  %v4092_v39 = vrot.slane %v8198_v17, 4 }
 0x4a5   : > { %5026 = vmatprep.mubr.msk.bf16.mxu1 %vm3869_vm13, %v3942_v13  ;;  %v3926_v12 = vsel %vm3790_vm12, %v3925_v55, %v3924_v34  ;;  %v4089_v21 = vsel %vm3781_vm9, %v4088_v27, %v4087_v15  ;;  %v3806_v49 = vpack.c.b16 %v3791_v25, %v3791_v25  ;;  %v4094_v26 = vrot.slane %v8200_v14, 3 }
 0x4a6   : > { %v3941_v3 = vpack.c.b16 %v3926_v12, %v3926_v12  ;;  %v4091_v59 = vsel %vm3784_vm10, %v4090_v2, %v4089_v21  ;;  %v4240_v7 = vsel %vm3772_vm6, %v4239_v23, %v4238_v60  ;;  %v4246_v19 = vrot.slane %v8178_v22, 6  ;;  %v5529_v21 = vld [vmem:[%s8537_s5 + $0x108] sm:$0xff]  }
 0x4a7   : > { %v4093_v1 = vsel %vm3787_vm11, %v4092_v39, %v4091_v59  ;;  %v4248_v27 = vrot.slane %v8198_v17, 5  ;;  %3906 = vmatmul.mubr.bf16.vlgmr.msra.gmra.mrb[80].mxu0 %v3806_v49  ;;  %v4242_v4 = vsel %vm3775_vm7, %v4241_v43, %v4240_v7  ;;  %v4250_v29 = vrot.slane %v8200_v14, 4  ;;  %v5525_v43 = vld [vmem:[%s8537_s5 + $0xf8] sm:$0xff]  }
 0x4a8   : > { %4040 = vmatmul.mubr.bf16.vlgmr.msra.gmra.mrb[112].mxu1 %v3941_v3  ;;  %v4095_v35 = vsel %vm3790_vm12, %v4094_v26, %v4093_v1  ;;  %v4073_v48 = vsel %vm3778_vm8, %v4072_v53, %v8132_v30  ;;  %4163 = vmatpush1.bf16.msra.mxu0 %v5522_v5  ;;  %v4243_v23 = vsel %vm3778_vm8, %v8120_v45, %v4242_v4  ;;  %v4076_v30 = vrot.slane %v8187_v52, 5  ;;  %v5533_v59 = vld [vmem:[%s8537_s5 + $0x118] sm:$0xff]   ;;  %v5534_v26 = vld [vmem:[%s8537_s5 + $0xd0] sm:$0xff]   ;;  %v5535_v1 = vld [vmem:[%s8537_s5 + $0x120] sm:$0xff]  }
 0x4a9   : > { %4319 = vmatpush1.bf16.msra.mxu1 %v5523_v37  ;;  %v4097_v60 = vpack.c.b16 %v4095_v35, %v4095_v35  ;;  %v4075_v31 = vsel %vm3781_vm9, %v4074_v36, %v4073_v48  ;;  %v4245_v53 = vsel %vm3781_vm9, %v4244_v54, %v4243_v23  ;;  %4164 = vmatprep.subr.bf16.mxu0 %v8682_v57  ;;  %v4078_v62 = vrot.slane %v8207_v8, 4  ;;  %v5537_v35 = vld [vmem:[%s8537_s5 + $0x128] sm:$0xff]   ;;  %v5539_v48 = vld [vmem:[%s8537_s5 + $0x130] sm:$0xff]  }
 0x4aa   : > { %4320 = vmatprep.subr.bf16.mxu1 %v8682_v57  ;;  %v4080_v38 = vrot.slane %v8223_v63, 3  ;;  %v4226_v36 = vsel %vm3772_vm6, %v4225_v50, %v4224_v6  ;;  %v4247_v58 = vsel %vm3784_vm10, %v4246_v19, %v4245_v53  ;;  %v4077_v54 = vsel %vm3784_vm10, %v4076_v30, %v4075_v31  ;;  %v5541_v31 = vld [vmem:[%s8537_s5 + $0x138] sm:$0xff]   ;;  %v5542_v53 = vld [vmem:[%s8537_s5 + $0x140] sm:$0xff]  }
 0x4ab   : > { %5057 = vmatprep.mubr.msk.bf16.mxu0 %vm3869_vm13, %v4097_v60  ;;  %v4228_v10 = vsel %vm3775_vm7, %v4227_v33, %v4226_v36  ;;  %v4232_v40 = vrot.slane %v8187_v52, 6  ;;  %v4249_v44 = vsel %vm3787_vm11, %v4248_v27, %v4247_v58  ;;  %v4079_v13 = vsel %vm3787_vm11, %v4078_v62, %v4077_v54  ;;  %v5527_v33 = vld [vmem:[%s8537_s5 + $0x100] sm:$0xff]   ;;  %v5536_v27 = vld [vmem:[%s8537_s5 + $0xd8] sm:$0xff]   ;;  %v5543_v36 = vld [vmem:[%s8537_s5 + $0x148] sm:$0xff]  }
 0x4ac   : > { %v4229_v56 = vsel %vm3778_vm8, %v8154_v28, %v4228_v10  ;;  %v4234_v6 = vrot.slane %v8207_v8, 5  ;;  %v4251_v50 = vsel %vm3790_vm12, %v4250_v29, %v4249_v44  ;;  %4165 = vmatpush1.bf16.msra.mxu0 %v5524_v32  ;;  %v8328_v55 = vsel %vm3790_vm12, %v4080_v38, %v4079_v13  ;;  %v5544_v58 = vld [vmem:[%s8537_s5 + $0x150] sm:$0xff]   ;;  %v5545_v54 = vld [vmem:[%s8537_s5 + $0x158] sm:$0xff]   ;;  %v5546_v10 = vld [vmem:[%s8537_s5 + $0x160] sm:$0xff]  }
 0x4ad   : > { %4321 = vmatpush1.bf16.msra.mxu1 %v5525_v43  ;;  %v4231_v16 = vsel %vm3781_vm9, %v4230_v11, %v4229_v56  ;;  %v4236_v34 = vrot.slane %v8223_v63, 4  ;;  %v4380_v15 = vrot.slane %v8072_v41, 4  ;;  %v4385_v2 = vrot.slane %v8154_v28, 1  ;;  %4166 = vmatprep.subr.bf16.mxu0 %v8682_v57  ;;  %v5528_v11 = vld [vmem:[%s8537_s5 + $0xb8] sm:$0xff]   ;;  %v5540_v43 = vld [vmem:[%s8537_s5 + $0xe8] sm:$0xff]   ;;  %v5548_v44 = vld [vmem:[%s8537_s5 + $0x170] sm:$0xff]  }
 0x4ae   : > { %v4253_v25 = vpack.c.b16 %v4251_v50, %v4251_v50  ;;  %4322 = vmatprep.subr.bf16.mxu1 %v8682_v57  ;;  %v4233_v12 = vsel %vm3784_vm10, %v4232_v40, %v4231_v16  ;;  %v4388_v28 = vrot.slane %v8187_v52, 7  ;;  %v4390_v47 = vrot.slane %v8207_v8, 6  ;;  %v5547_v40 = vld [vmem:[%s8537_s5 + $0x168] sm:$0xff]   ;;  %v5549_v13 = vld [vmem:[%s8537_s5 + $0x178] sm:$0xff]   ;;  %v5550_v56 = vld [vmem:[%s8537_s5 + $0x180] sm:$0xff]  }
 0x4af   : > { %v4235_v5 = vsel %vm3787_vm11, %v4234_v6, %v4233_v12  ;;  %v4382_v41 = vsel %vm3772_vm6, %v4381_v20, %v4380_v15  ;;  %v4392_v52 = vrot.slane %v8223_v63, 5  ;;  %v5532_v63 = vld [vmem:[%s8537_s5 + $0xc8] sm:$0xff]   ;;  %v4395_v7 = vrot.slane %v8078_v24, 3 }
 0x4b0   : > { %5088 = vmatprep.mubr.msk.bf16.mxu1 %vm3869_vm13, %v4253_v25  ;;  %v8342_v37 = vsel %vm3790_vm12, %v4236_v34, %v4235_v5  ;;  %4167 = vmatpush1.bf16.msra.mxu0 %v5526_v18  ;;  %v4384_v39 = vsel %vm3775_vm7, %v4383_v9, %v4382_v41  ;;  %v5531_v9 = vld [vmem:[%s8537_s5 + $0x110] sm:$0xff]   ;;  %v4397_v19 = vrot.slane %v8105_v42, 2  ;;  %v4394_v4 = vrot.slane %v8069_v46, 4  ;;  %v5538_v42 = vld [vmem:[%s8537_s5 + $0xe0] sm:$0xff]   ;;  %v5551_v6 = vld [vmem:[%s8537_s5 + $0x188] sm:$0xff]  }
 0x4b1   : > { %4323 = vmatpush1.bf16.msra.mxu1 %v5527_v33  ;;  %4168 = vmatprep.subr.bf16.mxu0 %v8682_v57  ;;  %v4386_v20 = vsel %vm3778_vm8, %v4385_v2, %v4384_v39  ;;  %v4399_v29 = vrot.slane %v8120_v45, 1  ;;  %v4402_v60 = vrot.slane %v8178_v22, 7  ;;  %v4404_v23 = vrot.slane %v8198_v17, 6 }
 0x4b2   : > { %4324 = vmatprep.subr.bf16.mxu1 %v8682_v57  ;;  %v4387_v49 = vsel %vm3781_vm9, %v8185_v61, %v4386_v20  ;;  %v4396_v24 = vsel %vm3772_vm6, %v4395_v7, %v4394_v4  ;;  %v4406_v32 = vrot.slane %v8200_v14, 5  ;;  %v4096_v62 = vpack.c.b16 %v8328_v55, %v8328_v55 }
 0x4b3   : > { %v4389_v3 = vsel %vm3784_vm10, %v4388_v28, %v4387_v49  ;;  %v4398_v46 = vsel %vm3775_vm7, %v4397_v19, %v4396_v24  ;;  %v5120_v49 = vld [vmem:[%s8538_s6] ss:$0 sm:$0xff] }
 0x4b4   : > { %4169 = vmatpush1.bf16.msra.mxu0 %v5528_v11  ;;  %v4391_v8 = vsel %vm3787_vm11, %v4390_v47, %v4389_v3  ;;  %v4400_v45 = vsel %vm3778_vm8, %v4399_v29, %v4398_v46 }
 0x4b5   : > { %4325 = vmatpush1.bf16.msra.mxu1 %v5529_v21  ;;  %4170 = vmatprep.subr.bf16.mxu0 %v8682_v57  ;;  %v8375_v61 = vsel %vm3790_vm12, %v4392_v52, %v4391_v8  ;;  %v4401_v30 = vsel %vm3781_vm9, %v8158_v51, %v4400_v45  ;;  %v4252_v51 = vpack.c.b16 %v8342_v37, %v8342_v37 }
 0x4b6   : > { %4326 = vmatprep.subr.bf16.mxu1 %v8682_v57  ;;  %v4403_v22 = vsel %vm3784_vm10, %v4402_v60, %v4401_v30  ;;  %v4408_v50 = vpack.c.b16 %v8375_v61, %v8375_v61 }
 0x4b7   : > { %v4405_v17 = vsel %vm3787_vm11, %v4404_v23, %v4403_v22 }
 0x4b8   : > { %4171 = vmatpush1.bf16.msra.mxu0 %v5530_v0  ;;  %v4407_v14 = vsel %vm3790_vm12, %v4406_v32, %v4405_v17 }
 0x4b9   : > { %4327 = vmatpush1.bf16.msra.mxu1 %v5531_v9  ;;  %4172 = vmatprep.subr.bf16.mxu0 %v8682_v57  ;;  %v4409_v38 = vpack.c.b16 %v4407_v14, %v4407_v14 }
 0x4ba   : > { %4328 = vmatprep.subr.bf16.mxu1 %v8682_v57 }
 0x4bc   : > { %4173 = vmatpush1.bf16.msra.mxu0 %v5532_v63 }
 0x4bd   : > { %4329 = vmatpush1.bf16.msra.mxu1 %v5533_v59  ;;  %4174 = vmatprep.subr.bf16.mxu0 %v8682_v57 }
 0x4be   : > { %4330 = vmatprep.subr.bf16.mxu1 %v8682_v57 }
 0x4c0   : > { %4175 = vmatpush1.bf16.msra.mxu0 %v5534_v26 }
 0x4c1   : > { %4331 = vmatpush1.bf16.msra.mxu1 %v5535_v1  ;;  %4176 = vmatprep.subr.bf16.mxu0 %v8682_v57 }
 0x4c2   : > { %4332 = vmatprep.subr.bf16.mxu1 %v8682_v57 }
 0x4c4   : > { %4177 = vmatpush1.bf16.msra.mxu0 %v5536_v27 }
 0x4c5   : > { %4333 = vmatpush1.bf16.msra.mxu1 %v5537_v35  ;;  %4178 = vmatprep.subr.bf16.mxu0 %v8682_v57 }
 0x4c6   : > { %4334 = vmatprep.subr.bf16.mxu1 %v8682_v57 }
 0x4c8   : > { %4179 = vmatpush1.bf16.msra.mxu0 %v5538_v42 }
 0x4c9   : > { %4335 = vmatpush1.bf16.msra.mxu1 %v5539_v48  ;;  %4180 = vmatprep.subr.bf16.mxu0 %v8682_v57 }
 0x4ca   : > { %4336 = vmatprep.subr.bf16.mxu1 %v8682_v57 }
 0x4cc   : > { %4181 = vmatpush1.bf16.msra.mxu0 %v5540_v43 }
 0x4cd   : > { %4337 = vmatpush1.bf16.msra.mxu1 %v5541_v31  ;;  %4474 = vmatprep.subr.bf16.mxu0 %v8682_v57 }
 0x4cf   : > { %4195 = vmatmul.mubr.bf16.vlgmr.msra.gmra.mrb[84].mxu0 %v4096_v62 }
 0x4d0   : > { %4351 = vmatmul.mubr.bf16.vlgmr.msra.gmra.mrb[116].mxu1 %v4252_v51  ;;  %4475 = vmatpush1.bf16.msra.mxu0 %v5542_v53 }
 0x4d1   : > { %5119 = vmatprep.mubr.msk.bf16.mxu0 %vm3869_vm13, %v4409_v38  ;;  %4476 = vmatprep.subr.bf16.mxu0 %v8682_v57 }
 0x4d4   : > { %4477 = vmatpush1.bf16.msra.mxu0 %v5543_v36 }
 0x4d5   : > { %4478 = vmatprep.subr.bf16.mxu0 %v8682_v57 }
 0x4d8   : > { %4479 = vmatpush1.bf16.msra.mxu0 %v5544_v58 }
 0x4d9   : > { %4480 = vmatprep.subr.bf16.mxu0 %v8682_v57 }
 0x4dc   : > { %4481 = vmatpush1.bf16.msra.mxu0 %v5545_v54 }
 0x4dd   : > { %4482 = vmatprep.subr.bf16.mxu0 %v8682_v57 }
 0x4e0   : > { %4483 = vmatpush1.bf16.msra.mxu0 %v5546_v10 }
 0x4e1   : > { %4484 = vmatprep.subr.bf16.mxu0 %v8682_v57 }
 0x4e4   : > { %4485 = vmatpush1.bf16.msra.mxu0 %v5547_v40 }
 0x4e5   : > { %4486 = vmatprep.subr.bf16.mxu0 %v8682_v57 }
 0x4e8   : > { %4487 = vmatpush1.bf16.msra.mxu0 %v5548_v44 }
 0x4e9   : > { %4488 = vmatprep.subr.bf16.mxu0 %v8682_v57 }
 0x4ec   : > { %4489 = vmatpush1.bf16.msra.mxu0 %v5549_v13 }
 0x4ed   : > { %4490 = vmatprep.subr.bf16.mxu0 %v8682_v57 }
 0x4f0   : > { %4491 = vmatpush1.bf16.msra.mxu0 %v5550_v56 }
 0x4f1   : > { %4492 = vmatprep.subr.bf16.mxu0 %v8682_v57 }
 0x4f4   : > { %4493 = vmatpush1.bf16.msra.mxu0 %v5551_v6 }
 0x4f7   : > { %4507 = vmatmul.mubr.bf16.vlgmr.msra.gmra.mrb[88].mxu0 %v4408_v50 }
 0x57a   : > { %v3907_v18 = vpop.f32.mrb[80].mxu0 }
 0x57b   : > { %v4041_v33 = vpop.f32.mrb[112].mxu1  ;;  %v3909_v16 = vpop.f32.mrb[81].mxu0 }
 0x57c   : > { %v4042_v55 = vadd.f32 %v4041_v33, %v3907_v18  ;;  %v4043_v34 = vpop.f32.mrb[113].mxu1  ;;  %v3910_v15 = vpop.f32.mrb[82].mxu0 }
 0x57d   : > { %v4044_v2 = vpop.f32.mrb[114].mxu1  ;;  %v3911_v25 = vpop.f32.mrb[83].mxu0 }
 0x57e   : > { %v4045_v12 = vpop.f32.mrb[115].mxu1 }
 0x5a2   : > { %v4196_v5 = vpop.f32.mrb[84].mxu0 }
 0x5a3   : > { %v4352_v37 = vpop.f32.mrb[116].mxu1  ;;  %v4202_v41 = vadd.f32 %v4196_v5, %v4042_v55  ;;  %v4198_v57 = vpop.f32.mrb[85].mxu0 }
 0x5a4   : > { %v4354_v28 = vpop.f32.mrb[117].mxu1  ;;  %v4199_v11 = vpop.f32.mrb[86].mxu0 }
 0x5a5   : > { %v4355_v21 = vpop.f32.mrb[118].mxu1  ;;  %v4358_v39 = vadd.f32 %v4352_v37, %v4202_v41  ;;  %v4200_v47 = vpop.f32.mrb[87].mxu0 }
 0x5a6   : > { %v4356_v20 = vpop.f32.mrb[119].mxu1 }
 0x5ca   : > { %v4508_v52 = vpop.f32.mrb[88].mxu0 }
 0x5cb   : > { %v4514_v3 = vadd.f32 %v4508_v52, %v4358_v39  ;;  %v4510_v0 = vpop.f32.mrb[89].mxu0 }
 0x5cc   : > { %v4511_v9 = vpop.f32.mrb[90].mxu0 }
 0x5cd   : > { %v4522_v8 = vadd.f32 %v5120_v49, %v4514_v3  ;;  %v4512_v61 = vpop.f32.mrb[91].mxu0 }
 0x5cf   : > { %4523 = vst [vmem:[%s442_s17] sm:$0xff] %v4522_v8 }
 0x5d0   : > { %5614 = shalt.err (!%p5611_p5)
}
 0x5d1   : > { %s5615_s29 = scalar_lea.hbm %s8488_s22, 128  ;;  %s5619_s15 = scalar_lea.hbm %s8539_s7, 256 }
 0x5d2   : > { %p5616_p7 = scmp.ne.s32.totalorder %s8488_s22, %s5615_s29  ;;  %p5620_p12 = scmp.lt.u32.totalorder %s8488_s22, %s8539_s7 }
 0x5d3   : > { %p5621_p13 = scmp.lt.u32.totalorder %s5619_s15, %s5615_s29  ;;  %p5623_p1 = scmp.lt.u32.totalorder %s5615_s29, %s8488_s22 }
 0x5d4   : > { %p5617_p10 = pnand %p5616_p7, %p5747_p6 }
 0x5d5   : > { %p5622_p0 = por %p5621_p13, %p5620_p12 }
 0x5d6   : > { %p5618_p11 = pneg %p5617_p10 }
 0x5d7   : > { %p5624_p2 = por %p5623_p1, %p5622_p0 }
 0x5d9   : > { %p5625_p3 = pnand %p5624_p2, %p5618_p11 }
 0x5db   : > { %5628 = shalt.err (!%p5625_p3)
}
 0x5dc   : > { %5254 = dma.vmem_to_hbm [thread:$0]  (%p5747_p6), %s8490_s18, 128, %s8488_s22, %s4525_s23  }
 0x5dd PF: > { %s4550_s19 = sand.u32 1, %s5651_s24   ;;  %p5257_p4 = pnand %p4605_p9, %p5751_p8 }
 0x5de   : > { %s4551_s21 = scalar_lea.sflag [#allocation4], %s4550_s19 }
 0x5df   : > { %5646 = dma.done.wait (!%p5257_p4), %s4551_s21, 128  }
 0x5e0   : > { %5648 = vsyncadd (!%p5257_p4), %s4551_s21, 4294967168  ;;  %p17_p5 = scmp.ge.s32.totalorder %s5732_s30, 4   ;;  %s8856_s24 = smov %s5655_s25 }
 0x5e1   : > { %s8857_s25 = smov %s5659_s26  ;;  %s8858_s26 = smov %s5745_s10 }
 0x5e2   : > { %s8859_s27 = smov %s5732_s30  ;;  %19 = sbr.rel (!%p17_p5) target bundleno = 3 (0x3), region = 138 }
 0x5e9   :  { %4556 = vsyncpa [#allocation4], 1 }
 0x5ea   :  { %4558 = vsyncpa [#allocation4 + $0x1], 1 }

</bundles_post_ra>
